<compile_context>
chip_gen: v5e
topology: v5e:2x2
jax: 0.10.0
libtpu: 0.0.40
codegen_flags: <defaults>
</compile_context>

<pallas_src>
import jax
import jax.numpy as jnp
import numpy as np
from jax.experimental import pallas as pl
from jax.experimental.pallas import tpu as pltpu


def _round_up(x, m):
    return (x + m - 1) // m * m


def value_net_kernel(x_ref, w1_ref, b1_ref, w2_ref, b2_ref, w3_ref, b3_ref, o_ref):
    # relu(x@W1+b1) -> relu(.@W2+b2) -> .*w3 lane-reduce + b3, one batch tile/step.
    x = x_ref[...].astype(w1_ref.dtype)            # bf16 (or f32) MXU feed
    h1 = jnp.dot(x, w1_ref[...], preferred_element_type=jnp.float32) + b1_ref[...]
    h1 = jnp.maximum(h1, 0.0)
    h2 = jnp.dot(h1.astype(w2_ref.dtype), w2_ref[...],
                 preferred_element_type=jnp.float32) + b2_ref[...]
    h2 = jnp.maximum(h2, 0.0)                      # (tile_b, hidden) f32

    # Final hidden->1 layer: VPU multiply + XLU lane reduction, producing the
    # result directly as a lane-dense (tile_b//128, 128) slab (each batch row
    # owns one lane) so the output store is a full-width vst, not a 1-lane
    # masked column store.  The leading-dim reshape is tile-boundary aligned.
    rows = o_ref.shape[0]                          # tile_b // 128 (static)
    hidden = h2.shape[-1]
    p = h2.reshape(rows, 128, hidden) * w3_ref[...].astype(jnp.float32)
    v = jnp.sum(p, axis=-1) + b3_ref[0]            # b3 is an SMEM scalar
    o_ref[...] = v.astype(o_ref.dtype)


def value_network_forward(state, params, tile_b=1024):
    """state: [B, state_dim] (f32 or bf16) -> value: [B, 1] f32."""
    w1, b1, w2, b2, w3, b3 = params
    B, state_dim = state.shape
    hidden = w1.shape[1]

    # ---- batch tiling -------------------------------------------------------
    b_pad = _round_up(B, 128)
    # >=1024-row tiles (never tiny tiles); multiple of 1024 keeps the output
    # block (tile_b//128, 128) fully (8,128)-aligned.
    tile_b = max(1024, _round_up(int(tile_b), 1024))
    if b_pad >= 2 * tile_b:
        # Ensure >=2 grid steps so the "parallel" axis uses both v7x TensorCores.
        tile_b = min(tile_b, _round_up(pl.cdiv(b_pad, 2), 1024))
        b_pad = _round_up(b_pad, tile_b)
    else:
        tile_b = b_pad                      # one tile covering the padded batch
    num_tiles = b_pad // tile_b
    if b_pad != B:
        state = jnp.pad(state, ((0, b_pad - B), (0, 0)))

    # Weights/biases: constant block index -> VMEM-resident across batch tiles;
    # single-buffered since they are never re-DMAed.
    def resident(shape):
        return pl.BlockSpec(shape, lambda i: (0,) * len(shape),
                            pipeline_mode=pl.Buffered(1))

    # ---- cost / VMEM hints --------------------------------------------------
    flops = 2 * b_pad * (state_dim * hidden + hidden * hidden + hidden)
    param_bytes = sum(int(a.size) * a.dtype.itemsize
                      for a in (w1, b1, w2, b2, w3, b3))
    bytes_accessed = int(state.size * state.dtype.itemsize + param_bytes + b_pad * 4)
    # Scoped VMEM default is 16 MiB (v5e) / 32 MiB (v6e, v7x); request what one
    # tile needs with 2x headroom, capped below v7x's 64 MiB physical VMEM.
    tile_vmem = (3 * tile_b * hidden * 4                         # f32 activations
                 + 2 * tile_b * state_dim * state.dtype.itemsize  # 2x input tile
                 + 2 * tile_b * 4                                 # 2x output tile
                 + 2 * param_bytes)                               # weights (worst case)
    vmem_limit = int(min(max(2 * tile_vmem, 32 << 20), 64 << 20))

    out = pl.pallas_call(
        value_net_kernel,
        out_shape=jax.ShapeDtypeStruct((b_pad // 128, 128), jnp.float32),
        grid=(num_tiles,),
        in_specs=[
            pl.BlockSpec((tile_b, state_dim), lambda i: (i, 0)),
            resident(w1.shape), resident(b1.shape),
            resident(w2.shape), resident(b2.shape),
            resident(w3.shape),
            pl.BlockSpec(memory_space=pltpu.MemorySpace.SMEM),   # b3 scalar
        ],
        # Lane-dense output slab: block (tile_b//128, 128), one per grid step.
        out_specs=pl.BlockSpec((tile_b // 128, 128), lambda i: (i, 0)),
        compiler_params=pltpu.CompilerParams(
            dimension_semantics=("parallel",),
            vmem_limit_bytes=vmem_limit,
        ),
        cost_estimate=pl.CostEstimate(
            flops=flops, transcendentals=0, bytes_accessed=bytes_accessed),
    )(state, w1, b1, w2, b2, w3, b3)

    # Undo the lane-dense packing: row i*128+j lives at out[i, j].
    return out.reshape(b_pad, 1)[:B]


def xavier_uniform(key, fan_in, fan_out, dtype=jnp.float32):
    # matches torch.nn.init.xavier_uniform_ (gain=1.0); stored [in, out] for MXU.
    limit = float(np.sqrt(6.0 / (fan_in + fan_out)))
    w = jax.random.uniform(key, (fan_in, fan_out), jnp.float32,
                           minval=-limit, maxval=limit)
    return w.astype(dtype)


def init_value_network(key, state_dim, hidden_dim=256, weight_dtype=jnp.bfloat16):
    # NOTE: keep hidden_dim a multiple of 256 when it is a free choice (v6e/v7x
    # MXU is 2x256x256; 128 suffices on v5e).  The module default (256) is ideal.
    k1, k2, k3 = jax.random.split(key, 3)
    w1 = xavier_uniform(k1, state_dim, hidden_dim, weight_dtype)   # [in, out]
    b1 = jnp.zeros((1, hidden_dim), jnp.float32)
    w2 = xavier_uniform(k2, hidden_dim, hidden_dim, weight_dtype)  # [in, out]
    b2 = jnp.zeros((1, hidden_dim), jnp.float32)
    w3 = xavier_uniform(k3, hidden_dim, 1, jnp.float32).T          # (1, hidden) row
    b3 = jnp.zeros((1,), jnp.float32)                              # SMEM scalar
    return (w1, b1, w2, b2, w3, b3)


def value_network_ref(state, params):
    w1, b1, w2, b2, w3, b3 = params
    f32 = lambda a: a.astype(jnp.float32)
    h1 = jnp.maximum(f32(state) @ f32(w1) + b1, 0.0)
    h2 = jnp.maximum(h1 @ f32(w2) + b2, 0.0)
    return jnp.sum(h2 * f32(w3), axis=-1, keepdims=True) + b3[0]


if __name__ == "__main__":
    key = jax.random.PRNGKey(0)
    k_params, k_state = jax.random.split(key)

    batch = 3000        # not a multiple of 128 -> exercises pad + tail slice;
                        # pads to 3072 -> 3 parallel grid steps of 1024 rows
    state_dim = 16
    hidden_dim = 256    # module default; fills one v6e/v7x MXU pass exactly

    params = init_value_network(k_params, state_dim, hidden_dim)
    state = jax.random.normal(k_state, (batch, state_dim), jnp.float32)

    out = value_network_forward(state, params)
    out = jax.block_until_ready(out)
    assert out.shape == (batch, 1)

    ref = value_network_ref(state, params)
    # bf16 matmul inputs (f32 accumulation) -> loosened tolerance; use
    # weight_dtype=jnp.float32 in init_value_network for tighter f32 parity.
    np.testing.assert_allclose(np.asarray(out), np.asarray(ref),
                               rtol=2e-2, atol=2e-2)

    print("KERNEL_OK")
</pallas_src>

<mosaic_0001>
module attributes {stable_mosaic.version = 11 : i64} {
  func.func @value_net_kernel(%arg0: i32, %arg1: memref<1024x16xf32, #tpu.memory_space<vmem>>, %arg2: memref<16x256xbf16, #tpu.memory_space<vmem>>, %arg3: memref<1x256xf32, #tpu.memory_space<vmem>>, %arg4: memref<256x256xbf16, #tpu.memory_space<vmem>>, %arg5: memref<1x256xf32, #tpu.memory_space<vmem>>, %arg6: memref<1x256xf32, #tpu.memory_space<vmem>>, %arg7: memref<1xf32, #tpu.memory_space<smem>>, %arg8: memref<8x128xf32, #tpu.memory_space<vmem>>) attributes {dimension_semantics = [#tpu.dimension_semantics<parallel>], iteration_bounds = array<i64: 3>, scalar_prefetch = 0 : i64, scratch_operands = 0 : i64, tpu.core_type = #tpu.core_type<tc>, window_params = [{transform_indices = @transform_0, window_bounds = array<i64: 1024, 16>}, {pipeline_mode = #tpu.pipeline_mode<synchronous>, transform_indices = @transform_1, window_bounds = array<i64: 16, 256>}, {pipeline_mode = #tpu.pipeline_mode<synchronous>, transform_indices = @transform_2, window_bounds = array<i64: 1, 256>}, {pipeline_mode = #tpu.pipeline_mode<synchronous>, transform_indices = @transform_3, window_bounds = array<i64: 256, 256>}, {pipeline_mode = #tpu.pipeline_mode<synchronous>, transform_indices = @transform_4, window_bounds = array<i64: 1, 256>}, {pipeline_mode = #tpu.pipeline_mode<synchronous>, transform_indices = @transform_5, window_bounds = array<i64: 1, 256>}, {transform_indices = @transform_6, window_bounds = array<i64: 1>}, {transform_indices = @transform_7, window_bounds = array<i64: 8, 128>}]} {
    %c0 = arith.constant 0 : index
    %c0_0 = arith.constant 0 : index
    %0 = vector.load %arg1[%c0, %c0_0] : memref<1024x16xf32, #tpu.memory_space<vmem>>, vector<1024x16xf32>
    %1 = arith.truncf %0 : vector<1024x16xf32> to vector<1024x16xbf16>
    %c0_1 = arith.constant 0 : index
    %c0_2 = arith.constant 0 : index
    %2 = vector.load %arg2[%c0_1, %c0_2] : memref<16x256xbf16, #tpu.memory_space<vmem>>, vector<16x256xbf16>
    %cst = arith.constant dense<0.000000e+00> : vector<1024x256xf32>
    %3 = tpu.matmul %1, %2, %cst {dimension_numbers = #tpu.dot_dimension_numbers<[1], [0], [0], [1], [0, 0, 1, 1], [], []>} : vector<1024x16xbf16>, vector<16x256xbf16>, vector<1024x256xf32> -> vector<1024x256xf32>
    %c0_3 = arith.constant 0 : index
    %c0_4 = arith.constant 0 : index
    %4 = vector.load %arg3[%c0_3, %c0_4] : memref<1x256xf32, #tpu.memory_space<vmem>>, vector<1x256xf32>
    %5 = vector.broadcast %4 : vector<1x256xf32> to vector<1024x256xf32>
    %6 = arith.addf %3, %5 : vector<1024x256xf32>
    %cst_5 = arith.constant 0.000000e+00 : f32
    %7 = vector.broadcast %cst_5 : f32 to vector<1024x256xf32>
    %8 = arith.maximumf %6, %7 : vector<1024x256xf32>
    %9 = arith.truncf %8 : vector<1024x256xf32> to vector<1024x256xbf16>
    %c0_6 = arith.constant 0 : index
    %c0_7 = arith.constant 0 : index
    %10 = vector.load %arg4[%c0_6, %c0_7] : memref<256x256xbf16, #tpu.memory_space<vmem>>, vector<256x256xbf16>
    %cst_8 = arith.constant dense<0.000000e+00> : vector<1024x256xf32>
    %11 = tpu.matmul %9, %10, %cst_8 {dimension_numbers = #tpu.dot_dimension_numbers<[1], [0], [0], [1], [0, 0, 1, 1], [], []>} : vector<1024x256xbf16>, vector<256x256xbf16>, vector<1024x256xf32> -> vector<1024x256xf32>
    %c0_9 = arith.constant 0 : index
    %c0_10 = arith.constant 0 : index
    %12 = vector.load %arg5[%c0_9, %c0_10] : memref<1x256xf32, #tpu.memory_space<vmem>>, vector<1x256xf32>
    %13 = vector.broadcast %12 : vector<1x256xf32> to vector<1024x256xf32>
    %14 = arith.addf %11, %13 : vector<1024x256xf32>
    %cst_11 = arith.constant 0.000000e+00 : f32
    %15 = vector.broadcast %cst_11 : f32 to vector<1024x256xf32>
    %16 = arith.maximumf %14, %15 : vector<1024x256xf32>
    %17 = vector.shape_cast %16 : vector<1024x256xf32> to vector<8x128x256xf32>
    %c0_12 = arith.constant 0 : index
    %c0_13 = arith.constant 0 : index
    %18 = vector.load %arg6[%c0_12, %c0_13] : memref<1x256xf32, #tpu.memory_space<vmem>>, vector<1x256xf32>
    %19 = vector.shape_cast %18 : vector<1x256xf32> to vector<1x1x256xf32>
    %20 = vector.broadcast %19 : vector<1x1x256xf32> to vector<8x128x256xf32>
    %21 = arith.mulf %17, %20 : vector<8x128x256xf32>
    %cst_14 = arith.constant dense<0.000000e+00> : vector<8x128xf32>
    %22 = vector.multi_reduction <add>, %21, %cst_14 [2] : vector<8x128x256xf32> to vector<8x128xf32>
    %c0_15 = arith.constant 0 : index
    %23 = memref.load %arg7[%c0_15] : memref<1xf32, #tpu.memory_space<smem>>
    %24 = vector.broadcast %23 : f32 to vector<8x128xf32>
    %25 = arith.addf %22, %24 : vector<8x128xf32>
    %c0_16 = arith.constant 0 : index
    %c0_17 = arith.constant 0 : index
    %26 = vector.load %arg8[%c0_16, %c0_17] : memref<8x128xf32, #tpu.memory_space<vmem>>, vector<8x128xf32>
    tpu.vector_store %arg8[%c0_16, %c0_17], %25 {strides = array<i32>} : memref<8x128xf32, #tpu.memory_space<vmem>>, vector<8x128xf32>,
    return
  }
  func.func @transform_0(%arg0: i32) -> (i32, i32) {
    %c0_i32 = arith.constant 0 : i32
    %c0_i32_0 = arith.constant 0 : i32
    return %arg0, %c0_i32 : i32, i32
  }
  func.func @transform_1(%arg0: i32) -> (i32, i32) {
    %c0_i32 = arith.constant 0 : i32
    %c0_i32_0 = arith.constant 0 : i32
    %c0_i32_1 = arith.constant 0 : i32
    return %c0_i32, %c0_i32_0 : i32, i32
  }
  func.func @transform_2(%arg0: i32) -> (i32, i32) {
    %c0_i32 = arith.constant 0 : i32
    %c0_i32_0 = arith.constant 0 : i32
    %c0_i32_1 = arith.constant 0 : i32
    return %c0_i32, %c0_i32_0 : i32, i32
  }
  func.func @transform_3(%arg0: i32) -> (i32, i32) {
    %c0_i32 = arith.constant 0 : i32
    %c0_i32_0 = arith.constant 0 : i32
    %c0_i32_1 = arith.constant 0 : i32
    return %c0_i32, %c0_i32_0 : i32, i32
  }
  func.func @transform_4(%arg0: i32) -> (i32, i32) {
    %c0_i32 = arith.constant 0 : i32
    %c0_i32_0 = arith.constant 0 : i32
    %c0_i32_1 = arith.constant 0 : i32
    return %c0_i32, %c0_i32_0 : i32, i32
  }
  func.func @transform_5(%arg0: i32) -> (i32, i32) {
    %c0_i32 = arith.constant 0 : i32
    %c0_i32_0 = arith.constant 0 : i32
    %c0_i32_1 = arith.constant 0 : i32
    return %c0_i32, %c0_i32_0 : i32, i32
  }
  func.func @transform_6(%arg0: i32) -> i32 {
    %c0_i32 = arith.constant 0 : i32
    %c0_i32_0 = arith.constant 0 : i32
    return %c0_i32 : i32
  }
  func.func @transform_7(%arg0: i32) -> (i32, i32) {
    %c0_i32 = arith.constant 0 : i32
    %c0_i32_0 = arith.constant 0 : i32
    return %arg0, %c0_i32 : i32, i32
  }
}

</mosaic_0001>

<bundles_post_ra>
// kernel: tpu_custom_call.1
= control target key start
LH: loop header
LB: loop body
LE: loop exit
PB: predicated region body
PF: predicated region fallthrough
CT: control target
= control target key end

     0   :  { %s7571_s0 = inlined_call_operand.vmem [shape: f32[3072,16], index: 0, kind: input, shape index: {}]   ;;  %s7572_s1 = inlined_call_operand.vmem [shape: bf16[16,256], index: 1, kind: input, shape index: {}]   ;;  %s7573_s2 = inlined_call_operand.vmem [shape: f32[1,256], index: 2, kind: input, shape index: {}]   ;;  %s7574_s3 = inlined_call_operand.vmem [shape: bf16[256,256], index: 3, kind: input, shape index: {}]   ;;  %s7575_s4 = inlined_call_operand.vmem [shape: f32[1,256], index: 4, kind: input, shape index: {}]   ;;  %s7576_s5 = inlined_call_operand.vmem [shape: f32[1,256], index: 5, kind: input, shape index: {}]   ;;  %s7577_s6 = inlined_call_operand.<no memory space> [shape: f32[1], index: 6, kind: input, shape index: {}]   ;;  %s7578_s7 = inlined_call_operand.hbm [shape: f32[24,128], index: 7, kind: output, shape index: {}]  }
   0x1   :  { %12 = sst [smem:[#allocation2]] %s7577_s6 }
   0x2   :  { %13 = vsyncpa [#allocation4], 0 }
   0x3   :  { %15 = vsyncpa [#allocation4 + $0x1], 0  ;;  %s5236_s26 = smov 0   ;;  %s5238_s27 = smov 0  }
   0x4   :  { %s5240_s28 = smov 0   ;;  %s5242_s29 = smov 0  }
   0x5 LB: > { %s5257_s6 = sadd.s32 4294967295, %s5191_s29   ;;  %s4771_s30 = sadd.s32 4294967294, %s5191_s29   ;;  %s5191_s29 = sphi %s5242_s29, %s7809_s29   ;;  %s5187_s28 = sphi %s5240_s28, %s7808_s28   ;;  %s5183_s27 = sphi %s5238_s27, %s7807_s27   ;;  %s5179_s26 = sphi %s5236_s26, %s7806_s26  }
   0x6   : > { %s5261_s8 = sadd.s32 1, %s5191_s29   ;;  %s180_s9 = sadd.s32 1, %s5187_s28 }
   0x7   : > { %s177_s10 = ssub.s32 %s5191_s29, %s5261_s8  ;;  %p190_p0 = scmp.ne.s32.totalorder %s5187_s28, %s5183_s27 }
   0x8   : > { %p178_p1 = scmp.eq.s32.totalorder %s177_s10, 0  ;;  %p191_p2 = scmp.eq.s32.totalorder %s5257_s6, 2 }
   0x9   : > { %p196_p3 = scmp.ne.s32.totalorder %s5183_s27, %s5179_s26  ;;  %p197_p4 = scmp.eq.s32.totalorder %s4771_s30, 2 }
   0xa   : > { %s5272_s11 = scalar_select %p178_p1, %s5187_s28, %s180_s9  }
   0xb   : > { %p5274_p5 = por %p191_p2, %p190_p0  ;;  %p5278_p6 = por %p197_p4, %p196_p3 }
   0xc   : > { %p4774_p7 = scmp.ge.s32.totalorder %s5191_s29, 1  ;;  %p242_p8 = scmp.lt.s32.totalorder %s5191_s29, 4 }
   0xe   : > { %p243_p9 = pnand %p4774_p7, %p242_p8 }
  0x10   : > { %246 = sbr.rel (%p243_p9) target bundleno = 1828 (0x724), region = 48 }
  0x15   : > { %v4780_v0 = vld [vmem:[%s7572_s1] sm:$0xf]  ;;  %v5047_v1 = vld [vmem:[%s7572_s1 + $0x4] sm:$0xf0]  ;;  %v5046_v2 = vld [vmem:[%s7572_s1 + $0x4] sm:$0xf] }
  0x16   : > { %v4781_v3 = vor.u32 %v5047_v1, %v4780_v0  ;;  %v4782_v4 = vld [vmem:[%s7572_s1 + $0x8] sm:$0xf0]  ;;  %s4776_s22 = sshll.u32 %s5257_s6, 7  ;;  %v5062_v5 = vld [vmem:[%s7574_s3 + $0x74] sm:$0xf]  ;;  %vm491_vm0 = vcmask 130048  }
  0x17   : > { %v4785_v6 = vor.u32 %v5046_v2, %v4782_v4  ;;  %p275_p10 = scmp.lt.s32.totalorder %s4776_s22, 383  ;;  %v4974_v7 = vld [vmem:[%s7574_s3 + $0x78] sm:$0xf0]  ;;  %v4972_v8 = vld [vmem:[%s7574_s3 + $0x70] sm:$0xf]  ;;  %s4142_s18 = sld [smem:[#allocation2]] }
  0x18   : > { %691 = vmatpush.bf16.msra.mxu0 %v4781_v3  ;;  %5080 = vmatpush.bf16.msra.mxu2 %v4781_v3  ;;  %v5306_v9 = vor.u32 %v5062_v5, %v4974_v7  ;;  %v5063_v10 = vld [vmem:[%s7574_s3 + $0x74] sm:$0xf0]  ;;  %v5036_v11 = vld [vmem:[%s7574_s3 + $0xf0] sm:$0xf]  ;;  %v5078_v15 = vld [vmem:[%s7574_s3 + $0xf4] sm:$0xf] }
  0x19   : > { %v5079_v12 = vld [vmem:[%s7574_s3 + $0xf4] sm:$0xf0]  ;;  %1020 = vmatpush.bf16.msra.mxu1 %v4785_v6  ;;  %5081 = vmatpush.bf16.msra.mxu3 %v4785_v6  ;;  %s7811_s22 = smov (!%p275_p10, %s4776_s22), 383  ;;  %v4973_v13 = vor.u32 %v5063_v10, %v4972_v8  ;;  %v5038_v16 = vld [vmem:[%s7574_s3 + $0xf8] sm:$0xf0]  ;;  %vm4405_vm1 = vcmask 130112  }
  0x1a   : > { %v5037_v14 = vor.u32 %v5079_v12, %v5036_v11  ;;  %v5041_v17 = vor.u32 %v5078_v15, %v5038_v16  ;;  %s4777_s25 = sshll.u32 %s7811_s22, 3  ;;  %v4964_v39 = vld [vmem:[%s7574_s3 + $0x60] sm:$0xf]  ;;  %v5061_v40 = vld [vmem:[%s7574_s3 + $0x64] sm:$0xf0]  ;;  %vm4409_vm2 = vcmask 195712  }
  0x1b   : > { %s5327_s10 = scalar_lea.vmem %s7571_s0, %s4777_s25  ;;  %v5060_v41 = vld [vmem:[%s7574_s3 + $0x64] sm:$0xf]  ;;  %v4965_v42 = vor.u32 %v5061_v40, %v4964_v39  ;;  %v4966_v43 = vld [vmem:[%s7574_s3 + $0x68] sm:$0xf0]  ;;  %v5028_v44 = vld [vmem:[%s7574_s3 + $0xe0] sm:$0xf] }
  0x1c   : > { %2582 = vmatpush.bf16.msrb.mxu0 %v5306_v9  ;;  %1924 = vmatpush.bf16.msrb.mxu2 %v4973_v13  ;;  %v281_v18 = vld [vmem:[%s5327_s10] sm:$0xff]  ;;  %v282_v19 = vld [vmem:[%s5327_s10 + $0x8] sm:$0xff]  ;;  %v347_v20 = vld [vmem:[%s5327_s10 + $0x210] sm:$0xff]  ;;  %v5376_v46 = vor.u32 %v5060_v41, %v4966_v43  ;;  %vm4413_vm3 = vcmask 261312   ;;  %vm4417_vm4 = vcmask 326912   ;;  %vm4421_vm5 = vcmask 392512  }
  0x1d   : > { %2253 = vmatpush.bf16.msrb.mxu3 %v5037_v14  ;;  %2911 = vmatpush.bf16.msrb.mxu1 %v5041_v17  ;;  %v409_v21 = vpack.c.bf16 %v282_v19, %v281_v18  ;;  %v348_v22 = vld [vmem:[%s5327_s10 + $0x218] sm:$0xff]  ;;  %v345_v23 = vld [vmem:[%s5327_s10 + $0x200] sm:$0xff]  ;;  %v346_v24 = vld [vmem:[%s5327_s10 + $0x208] sm:$0xff]  ;;  %vm4425_vm6 = vcmask 458112   ;;  %vm4429_vm7 = vcmask 523712   ;;  %vm4433_vm8 = vcmask 589312  }
  0x1e   : > { %v442_v25 = vpack.c.bf16 %v348_v22, %v347_v20  ;;  %v5335_v26 = vpack.c.bf16 %v346_v24, %v345_v23  ;;  %v283_v27 = vld [vmem:[%s5327_s10 + $0x10] sm:$0xff]  ;;  %v284_v28 = vld [vmem:[%s5327_s10 + $0x18] sm:$0xff]  ;;  %v349_v29 = vld [vmem:[%s5327_s10 + $0x220] sm:$0xff]  ;;  %vm4437_vm9 = vcmask 654912   ;;  %vm4441_vm10 = vcmask 720512   ;;  %s271_s19 = sand.u32 1, %s5183_s27  }
  0x1f   : > { %4786 = vmatmul.msk.bf16.vlgmr.msra.gmra.mxu0 %vm491_vm0, %v409_v21  ;;  %4850 = vmatmul.msk.bf16.vlgmr.msra.gmra.mxu1 %vm491_vm0, %v409_v21  ;;  %v350_v30 = vld [vmem:[%s5327_s10 + $0x228] sm:$0xff]  ;;  %v410_v31 = vpack.c.bf16 %v284_v28, %v283_v27  ;;  %v285_v33 = vld [vmem:[%s5327_s10 + $0x20] sm:$0xff]  ;;  %v351_v35 = vld [vmem:[%s5327_s10 + $0x230] sm:$0xff]  ;;  %vm4445_vm11 = vcmask 786112   ;;  %vm4449_vm12 = vcmask 851712   ;;  %vm4453_vm13 = vcmask 917312  }
  0x20   : > { %4819 = vmatmul.msk.bf16.vlgmr.msra.gmra.mxu2 %vm491_vm0, %v442_v25  ;;  %4882 = vmatmul.msk.bf16.vlgmr.msra.gmra.mxu3 %vm491_vm0, %v5335_v26  ;;  %v443_v32 = vpack.c.bf16 %v350_v30, %v349_v29  ;;  %v286_v34 = vld [vmem:[%s5327_s10 + $0x28] sm:$0xff]  ;;  %v352_v36 = vld [vmem:[%s5327_s10 + $0x238] sm:$0xff]  ;;  %v5076_v48 = vld [vmem:[%s7574_s3 + $0xe4] sm:$0xf]  ;;  %vm4457_vm14 = vcmask 982912   ;;  %vm4461_vm15 = vcmask 1048512  }
  0x21   : > { %v411_v37 = vpack.c.bf16 %v286_v34, %v285_v33  ;;  %v444_v38 = vpack.c.bf16 %v352_v36, %v351_v35  ;;  %v5077_v45 = vld [vmem:[%s7574_s3 + $0xe4] sm:$0xf0]  ;;  %v5030_v49 = vld [vmem:[%s7574_s3 + $0xe8] sm:$0xf0]  ;;  %1925 = vmatpush.bf16.msrb.mxu2 %v4965_v42  ;;  %2583 = vmatpush.bf16.msrb.mxu0 %v5376_v46  ;;  %v287_v51 = vld [vmem:[%s5327_s10 + $0x30] sm:$0xff]  ;;  %s4775_s20 = sshll.u32 %s271_s19, 3 }
  0x22   : > { %v5029_v47 = vor.u32 %v5077_v45, %v5028_v44  ;;  %v5033_v50 = vor.u32 %v5076_v48, %v5030_v49  ;;  %v288_v52 = vld [vmem:[%s5327_s10 + $0x38] sm:$0xff]  ;;  %v353_v53 = vld [vmem:[%s5327_s10 + $0x240] sm:$0xff]  ;;  %v354_v54 = vld [vmem:[%s5327_s10 + $0x248] sm:$0xff]  ;;  %s5043_s21 = sshll.u32 %s5257_s6, 3  ;;  %s273_s6 = scalar_lea.vmem [#allocation3], %s4775_s20 }
  0x23   : > { %v412_v55 = vpack.c.bf16 %v288_v52, %v287_v51  ;;  %v445_v56 = vpack.c.bf16 %v354_v54, %v353_v53  ;;  %v289_v57 = vld [vmem:[%s5327_s10 + $0x40] sm:$0xff]  ;;  %v290_v58 = vld [vmem:[%s5327_s10 + $0x48] sm:$0xff]  ;;  %v355_v59 = vld [vmem:[%s5327_s10 + $0x250] sm:$0xff]  ;;  %s4707_s25 = scalar_lea.hbm %s7578_s7, %s5043_s21  ;;  %s4709_s30 = sshll.u32 %s273_s6, 4  ;;  %s4710_s30 = int_to_ptr.vmem [resolvable:$true] %s4709_s30 }
  0x24   : > { %2254 = vmatpush.bf16.msrb.mxu3 %v5029_v47  ;;  %2912 = vmatpush.bf16.msrb.mxu1 %v5033_v50  ;;  %v356_v60 = vld [vmem:[%s5327_s10 + $0x258] sm:$0xff]  ;;  %v413_v61 = vpack.c.bf16 %v290_v58, %v289_v57  ;;  %v291_v63 = vld [vmem:[%s5327_s10 + $0x50] sm:$0xff]  ;;  %v357_v1 = vld [vmem:[%s5327_s10 + $0x260] sm:$0xff]  ;;  %s4711_s9 = sshll.u32 %s4707_s25, 4  ;;  %s4697_s22 = scalar_lea.sflag [#allocation4], %s271_s19  ;;  %s4712_s9 = int_to_ptr.hbm [resolvable:$true] %s4711_s9 }
  0x25   : > { %v446_v62 = vpack.c.bf16 %v356_v60, %v355_v59  ;;  %v292_v0 = vld [vmem:[%s5327_s10 + $0x58] sm:$0xff]  ;;  %v358_v2 = vld [vmem:[%s5327_s10 + $0x268] sm:$0xff]  ;;  %v293_v5 = vld [vmem:[%s5327_s10 + $0x60] sm:$0xff]  ;;  %s5143_s14 = sshra.s32 %s4712_s9, 4  ;;  %s5149_s17 = scalar_lea.hbm %s7578_s7, 24  ;;  %s5144_s14 = int_to_ptr.hbm [resolvable:$true] %s5143_s14 }
  0x26   : > { %v414_v3 = vpack.c.bf16 %v292_v0, %v291_v63  ;;  %v447_v4 = vpack.c.bf16 %v358_v2, %v357_v1  ;;  %v294_v6 = vld [vmem:[%s5327_s10 + $0x68] sm:$0xff]  ;;  %v359_v7 = vld [vmem:[%s5327_s10 + $0x270] sm:$0xff]  ;;  %v360_v8 = vld [vmem:[%s5327_s10 + $0x278] sm:$0xff]  ;;  %p5150_p0 = scmp.lt.s32.totalorder %s5144_s14, %s7578_s7 }
  0x27   : > { %v415_v10 = vpack.c.bf16 %v294_v6, %v293_v5  ;;  %v448_v11 = vpack.c.bf16 %v360_v8, %v359_v7  ;;  %v4956_v12 = vld [vmem:[%s7574_s3 + $0x50] sm:$0xf]  ;;  %v5059_v13 = vld [vmem:[%s7574_s3 + $0x54] sm:$0xf0]  ;;  %v5058_v17 = vld [vmem:[%s7574_s3 + $0x54] sm:$0xf] }
  0x28   : > { %v4957_v14 = vor.u32 %v5059_v13, %v4956_v12  ;;  %v5020_v15 = vld [vmem:[%s7574_s3 + $0xd0] sm:$0xf]  ;;  %v5075_v16 = vld [vmem:[%s7574_s3 + $0xd4] sm:$0xf0]  ;;  %v4958_v19 = vld [vmem:[%s7574_s3 + $0x58] sm:$0xf0] }
  0x29   : > { %v5021_v18 = vor.u32 %v5075_v16, %v5020_v15  ;;  %v295_v20 = vld [vmem:[%s5327_s10 + $0x70] sm:$0xff]  ;;  %v296_v21 = vld [vmem:[%s5327_s10 + $0x78] sm:$0xff]  ;;  %v361_v22 = vld [vmem:[%s5327_s10 + $0x280] sm:$0xff]  ;;  %v5438_v23 = vor.u32 %v5058_v17, %v4958_v19 }
  0x2a   : > { %1926 = vmatpush.bf16.msrb.mxu2 %v4957_v14  ;;  %v362_v24 = vld [vmem:[%s5327_s10 + $0x288] sm:$0xff]  ;;  %v5022_v27 = vld [vmem:[%s7574_s3 + $0xd8] sm:$0xf0]  ;;  %v416_v29 = vpack.c.bf16 %v296_v21, %v295_v20  ;;  %v363_v33 = vld [vmem:[%s5327_s10 + $0x290] sm:$0xff] }
  0x2b   : > { %2255 = vmatpush.bf16.msrb.mxu3 %v5021_v18  ;;  %2584 = vmatpush.bf16.msrb.mxu0 %v5438_v23  ;;  %v449_v30 = vpack.c.bf16 %v362_v24, %v361_v22  ;;  %v364_v34 = vld [vmem:[%s5327_s10 + $0x298] sm:$0xff]  ;;  %v475_v36 = vld [vmem:[%s7573_s2] sm:$0x3]  ;;  %v366_v60 = vld [vmem:[%s5327_s10 + $0x2a8] sm:$0xff] }
  0x2c   : > { %v450_v39 = vpack.c.bf16 %v364_v34, %v363_v33  ;;  %v5459_v40 = vperm.slane %v475_v36, 1  ;;  %v5461_v41 = vperm.slane %v475_v36, 0  ;;  %v365_v59 = vld [vmem:[%s5327_s10 + $0x2a0] sm:$0xff]  ;;  %v368_v33 = vld [vmem:[%s5327_s10 + $0x2b8] sm:$0xff] }
  0x2d   : > { %v451_v6 = vpack.c.bf16 %v366_v60, %v365_v59 }
  0x2f   : > { %4787 = vmatmul.msk.bf16.gmra.mxu0 %vm491_vm0, %v410_v31  ;;  %4851 = vmatmul.msk.bf16.gmra.mxu1 %vm491_vm0, %v410_v31  ;;  %v297_v31 = vld [vmem:[%s5327_s10 + $0x80] sm:$0xff] }
  0x30   : > { %4820 = vmatmul.msk.bf16.gmra.mxu2 %vm491_vm0, %v443_v32  ;;  %4883 = vmatmul.msk.bf16.gmra.mxu3 %vm491_vm0, %v442_v25  ;;  %v5074_v25 = vld [vmem:[%s7574_s3 + $0xd4] sm:$0xf] }
  0x31   : > { %v5025_v28 = vor.u32 %v5074_v25, %v5022_v27 }
  0x33   : > { %2913 = vmatpush.bf16.msrb.mxu1 %v5025_v28  ;;  %v301_v28 = vld [vmem:[%s5327_s10 + $0xa0] sm:$0xff] }
  0x3f   : > { %4788 = vmatmul.msk.bf16.gmra.mxu0 %vm491_vm0, %v411_v37  ;;  %4852 = vmatmul.msk.bf16.gmra.mxu1 %vm491_vm0, %v411_v37 }
  0x40   : > { %4821 = vmatmul.msk.bf16.gmra.mxu2 %vm491_vm0, %v444_v38  ;;  %4884 = vmatmul.msk.bf16.gmra.mxu3 %vm491_vm0, %v443_v32  ;;  %v298_v32 = vld [vmem:[%s5327_s10 + $0x88] sm:$0xff] }
  0x41   : > { %v417_v35 = vpack.c.bf16 %v298_v32, %v297_v31  ;;  %v367_v32 = vld [vmem:[%s5327_s10 + $0x2b0] sm:$0xff] }
  0x4f   : > { %4789 = vmatmul.msk.bf16.gmra.mxu0 %vm491_vm0, %v412_v55  ;;  %4853 = vmatmul.msk.bf16.gmra.mxu1 %vm491_vm0, %v412_v55  ;;  %v299_v55 = vld [vmem:[%s5327_s10 + $0x90] sm:$0xff] }
  0x50   : > { %4822 = vmatmul.msk.bf16.gmra.mxu2 %vm491_vm0, %v445_v56  ;;  %4885 = vmatmul.msk.bf16.gmra.mxu3 %vm491_vm0, %v444_v38 }
  0x5f   : > { %4790 = vmatmul.msk.bf16.gmra.mxu0 %vm491_vm0, %v413_v61  ;;  %4854 = vmatmul.msk.bf16.gmra.mxu1 %vm491_vm0, %v413_v61 }
  0x60   : > { %4823 = vmatmul.msk.bf16.gmra.mxu2 %vm491_vm0, %v446_v62  ;;  %4886 = vmatmul.msk.bf16.gmra.mxu3 %vm491_vm0, %v445_v56  ;;  %v300_v56 = vld [vmem:[%s5327_s10 + $0x98] sm:$0xff] }
  0x61   : > { %v418_v1 = vpack.c.bf16 %v300_v56, %v299_v55 }
  0x6f   : > { %4791 = vmatmul.msk.bf16.gmra.mxu0 %vm491_vm0, %v414_v3  ;;  %4855 = vmatmul.msk.bf16.gmra.mxu1 %vm491_vm0, %v414_v3 }
  0x70   : > { %4824 = vmatmul.msk.bf16.gmra.mxu2 %vm491_vm0, %v447_v4  ;;  %4887 = vmatmul.msk.bf16.gmra.mxu3 %vm491_vm0, %v446_v62 }
  0x7f   : > { %4792 = vmatmul.msk.bf16.gmra.mxu0 %vm491_vm0, %v415_v10  ;;  %4856 = vmatmul.msk.bf16.gmra.mxu1 %vm491_vm0, %v415_v10 }
  0x80   : > { %4825 = vmatmul.msk.bf16.gmra.mxu2 %vm491_vm0, %v448_v11  ;;  %4888 = vmatmul.msk.bf16.gmra.mxu3 %vm491_vm0, %v447_v4 }
  0x8f   : > { %4793 = vmatmul.msk.bf16.gmra.mxu0 %vm491_vm0, %v416_v29  ;;  %4857 = vmatmul.msk.bf16.gmra.mxu1 %vm491_vm0, %v416_v29  ;;  %v302_v29 = vld [vmem:[%s5327_s10 + $0xa8] sm:$0xff] }
  0x90   : > { %4826 = vmatmul.msk.bf16.gmra.mxu2 %vm491_vm0, %v449_v30  ;;  %4889 = vmatmul.msk.bf16.gmra.mxu3 %vm491_vm0, %v448_v11 }
  0x9c   : > { %v693_v37 = vpop.f32.mrf.mxu0  ;;  %v1022_v38 = vpop.f32.mrf.mxu1 }
  0x9d   : > { %v1023_v42 = vadd.f32 %v1022_v38, %v5459_v40  ;;  %v694_v43 = vadd.f32 %v693_v37, %v5461_v41  ;;  %v419_v38 = vpack.c.bf16 %v302_v29, %v301_v28 }
  0x9f   : > { %4794 = vmatmul.msk.bf16.gmra.mxu0 %vm491_vm0, %v417_v35  ;;  %4858 = vmatmul.msk.bf16.gmra.mxu1 %vm491_vm0, %v417_v35  ;;  %v1343_v49 = vmax.f32 %v1023_v42, 0.0  ;;  %v1342_v52 = vmax.f32 %v694_v43, 0.0 }
  0xa0   : > { %4827 = vmatmul.msk.bf16.gmra.mxu2 %vm491_vm0, %v450_v39  ;;  %4890 = vmatmul.msk.bf16.gmra.mxu3 %vm491_vm0, %v449_v30 }
  0xa3   : > { %v858_v44 = vpop.f32.mrf.mxu2  ;;  %v1182_v45 = vpop.f32.mrf.mxu3 }
  0xa4   : > { %v695_v47 = vpop.f32.mrf.mxu0  ;;  %v1024_v48 = vpop.f32.mrf.mxu1  ;;  %v859_v61 = vadd.f32 %v858_v44, %v5461_v41  ;;  %v1183_v62 = vadd.f32 %v1182_v45, %v5459_v40  ;;  %v452_v45 = vpack.c.bf16 %v368_v33, %v367_v32 }
  0xa5   : > { %v696_v50 = vadd.f32 %v695_v47, %v5461_v41  ;;  %v1025_v51 = vadd.f32 %v1024_v48, %v5459_v40 }
  0xa6   : > { %v1474_v7 = vmax.f32 %v859_v61, 0.0  ;;  %v1471_v8 = vmax.f32 %v1183_v62, 0.0 }
  0xa7   : > { %v1344_v53 = vmax.f32 %v696_v50, 0.0  ;;  %v1345_v54 = vmax.f32 %v1025_v51, 0.0  ;;  %v4948_v51 = vld [vmem:[%s7574_s3 + $0x40] sm:$0xf] }
  0xa9   : > { %v5473_v57 = vpack.c.bf16 %v1344_v53, %v1342_v52  ;;  %v5475_v58 = vpack.c.bf16 %v1345_v54, %v1343_v49  ;;  %v5057_v52 = vld [vmem:[%s7574_s3 + $0x44] sm:$0xf0] }
  0xaa   : > { %v4949_v53 = vor.u32 %v5057_v52, %v4948_v51 }
  0xab   : > { %v860_v63 = vpop.f32.mrf.mxu2  ;;  %v1184_v0 = vpop.f32.mrf.mxu3 }
  0xac   : > { %v861_v2 = vadd.f32 %v860_v63, %v5461_v41  ;;  %v1185_v3 = vadd.f32 %v1184_v0, %v5459_v40  ;;  %v698_v4 = vpop.f32.mrf.mxu0  ;;  %v1027_v5 = vpop.f32.mrf.mxu1  ;;  %1927 = vmatpush.bf16.msrb.mxu2 %v4949_v53 }
  0xad   : > { %v1028_v14 = vadd.f32 %v1027_v5, %v5459_v40  ;;  %v699_v15 = vadd.f32 %v698_v4, %v5461_v41  ;;  %v303_v4 = vld [vmem:[%s5327_s10 + $0xb0] sm:$0xff]  ;;  %v5012_v5 = vld [vmem:[%s7574_s3 + $0xc0] sm:$0xf] }
  0xae   : > { %v1476_v10 = vmax.f32 %v861_v2, 0.0  ;;  %v1473_v11 = vmax.f32 %v1185_v3, 0.0 }
  0xaf   : > { %4795 = vmatmul.msk.bf16.gmra.mxu0 %vm491_vm0, %v418_v1  ;;  %4859 = vmatmul.msk.bf16.gmra.mxu1 %vm491_vm0, %v418_v1  ;;  %v1347_v20 = vmax.f32 %v1028_v14, 0.0  ;;  %v1346_v24 = vmax.f32 %v699_v15, 0.0  ;;  %v4950_v14 = vld [vmem:[%s7574_s3 + $0x48] sm:$0xf0]  ;;  %v304_v15 = vld [vmem:[%s5327_s10 + $0xb8] sm:$0xff] }
  0xb0   : > { %4828 = vmatmul.msk.bf16.gmra.mxu2 %vm491_vm0, %v451_v6  ;;  %4891 = vmatmul.msk.bf16.gmra.mxu3 %vm491_vm0, %v450_v39  ;;  %v5487_v12 = vpack.c.bf16 %v1476_v10, %v1474_v7  ;;  %v5489_v13 = vpack.c.bf16 %v1473_v11, %v1471_v8  ;;  %v5056_v11 = vld [vmem:[%s7574_s3 + $0x44] sm:$0xf] }
  0xb2   : > { %7656 = vst [vmem:[#allocation6_spill] sm:$0xff] %v5487_v12 }
  0xb3   : > { %7657 = vst [vmem:[#allocation7_spill] sm:$0xff] %v5489_v13  ;;  %v863_v16 = vpop.f32.mrf.mxu2  ;;  %v1187_v17 = vpop.f32.mrf.mxu3 }
  0xb4   : > { %v700_v18 = vpop.f32.mrf.mxu0  ;;  %v1029_v19 = vpop.f32.mrf.mxu1  ;;  %v864_v30 = vadd.f32 %v863_v16, %v5461_v41  ;;  %v1188_v31 = vadd.f32 %v1187_v17, %v5459_v40  ;;  %v5539_v16 = vor.u32 %v5056_v11, %v4950_v14  ;;  %v5072_v17 = vld [vmem:[%s7574_s3 + $0xc4] sm:$0xf] }
  0xb5   : > { %v701_v21 = vadd.f32 %v700_v18, %v5461_v41  ;;  %v1030_v22 = vadd.f32 %v1029_v19, %v5459_v40  ;;  %v5014_v18 = vld [vmem:[%s7574_s3 + $0xc8] sm:$0xf0]  ;;  %v369_v19 = vld [vmem:[%s5327_s10 + $0x2c0] sm:$0xff] }
  0xb6   : > { %v1478_v47 = vmax.f32 %v864_v30, 0.0  ;;  %v1475_v48 = vmax.f32 %v1188_v31, 0.0  ;;  %2585 = vmatpush.bf16.msrb.mxu0 %v5539_v16  ;;  %v420_v30 = vpack.c.bf16 %v304_v15, %v303_v4 }
  0xb7   : > { %v1348_v25 = vmax.f32 %v701_v21, 0.0  ;;  %v1349_v27 = vmax.f32 %v1030_v22, 0.0  ;;  %v5017_v21 = vor.u32 %v5072_v17, %v5014_v18 }
  0xb9   : > { %v5501_v34 = vpack.c.bf16 %v1348_v25, %v1346_v24  ;;  %v5503_v35 = vpack.c.bf16 %v1349_v27, %v1347_v20  ;;  %v370_v20 = vld [vmem:[%s5327_s10 + $0x2c8] sm:$0xff]  ;;  %2914 = vmatpush.bf16.msrb.mxu1 %v5017_v21 }
  0xbb   : > { %v865_v36 = vpop.f32.mrf.mxu2  ;;  %v1189_v37 = vpop.f32.mrf.mxu3 }
  0xbc   : > { %v866_v39 = vadd.f32 %v865_v36, %v5461_v41  ;;  %v1190_v42 = vadd.f32 %v1189_v37, %v5459_v40  ;;  %v703_v43 = vpop.f32.mrf.mxu0  ;;  %v1032_v44 = vpop.f32.mrf.mxu1  ;;  %v453_v37 = vpack.c.bf16 %v370_v20, %v369_v19 }
  0xbd   : > { %v1033_v56 = vadd.f32 %v1032_v44, %v5459_v40  ;;  %v704_v59 = vadd.f32 %v703_v43, %v5461_v41 }
  0xbe   : > { %v1480_v49 = vmax.f32 %v866_v39, 0.0  ;;  %v1477_v50 = vmax.f32 %v1190_v42, 0.0 }
  0xbf   : > { %4796 = vmatmul.msk.bf16.gmra.mxu0 %vm491_vm0, %v419_v38  ;;  %4860 = vmatmul.msk.bf16.gmra.mxu1 %vm491_vm0, %v419_v38  ;;  %v1351_v0 = vmax.f32 %v1033_v56, 0.0  ;;  %v1350_v3 = vmax.f32 %v704_v59, 0.0 }
  0xc0   : > { %4829 = vmatmul.msk.bf16.gmra.mxu2 %vm491_vm0, %v452_v45  ;;  %4892 = vmatmul.msk.bf16.gmra.mxu3 %vm491_vm0, %v451_v6  ;;  %v5517_v54 = vpack.c.bf16 %v1480_v49, %v1478_v47  ;;  %v5519_v55 = vpack.c.bf16 %v1477_v50, %v1475_v48  ;;  %v5073_v6 = vld [vmem:[%s7574_s3 + $0xc4] sm:$0xf0] }
  0xc1   : > { %v5013_v10 = vor.u32 %v5073_v6, %v5012_v5 }
  0xc2   : > { %7658 = vst [vmem:[#allocation8_spill] sm:$0xff] %v5517_v54 }
  0xc3   : > { %7659 = vst [vmem:[#allocation9_spill] sm:$0xff] %v5519_v55  ;;  %v868_v60 = vpop.f32.mrf.mxu2  ;;  %v1192_v61 = vpop.f32.mrf.mxu3  ;;  %2256 = vmatpush.bf16.msrb.mxu3 %v5013_v10 }
  0xc4   : > { %v705_v62 = vpop.f32.mrf.mxu0  ;;  %v1034_v63 = vpop.f32.mrf.mxu1  ;;  %v869_v25 = vadd.f32 %v868_v60, %v5461_v41  ;;  %v1193_v27 = vadd.f32 %v1192_v61, %v5459_v40 }
  0xc5   : > { %v706_v1 = vadd.f32 %v705_v62, %v5461_v41  ;;  %v1035_v2 = vadd.f32 %v1034_v63, %v5459_v40  ;;  %v305_v63 = vld [vmem:[%s5327_s10 + $0xc0] sm:$0xff] }
  0xc6   : > { %v1482_v38 = vmax.f32 %v869_v25, 0.0  ;;  %v1479_v39 = vmax.f32 %v1193_v27, 0.0 }
  0xc7   : > { %v1352_v7 = vmax.f32 %v706_v1, 0.0  ;;  %v1353_v8 = vmax.f32 %v1035_v2, 0.0  ;;  %v371_v1 = vld [vmem:[%s5327_s10 + $0x2d0] sm:$0xff]  ;;  %v372_v2 = vld [vmem:[%s5327_s10 + $0x2d8] sm:$0xff] }
  0xc8   : > { %v454_v18 = vpack.c.bf16 %v372_v2, %v371_v1 }
  0xc9   : > { %v5549_v22 = vpack.c.bf16 %v1352_v7, %v1350_v3  ;;  %v5551_v24 = vpack.c.bf16 %v1353_v8, %v1351_v0  ;;  %v306_v0 = vld [vmem:[%s5327_s10 + $0xc8] sm:$0xff] }
  0xca   : > { %v421_v10 = vpack.c.bf16 %v306_v0, %v305_v63 }
  0xcb   : > { %v870_v28 = vpop.f32.mrf.mxu2  ;;  %v1194_v29 = vpop.f32.mrf.mxu3 }
  0xcc   : > { %v871_v31 = vadd.f32 %v870_v28, %v5461_v41  ;;  %v1195_v32 = vadd.f32 %v1194_v29, %v5459_v40  ;;  %v708_v33 = vpop.f32.mrf.mxu0  ;;  %v1037_v36 = vpop.f32.mrf.mxu1 }
  0xcd   : > { %v1038_v48 = vadd.f32 %v1037_v36, %v5459_v40  ;;  %v709_v49 = vadd.f32 %v708_v33, %v5461_v41 }
  0xce   : > { %v1484_v42 = vmax.f32 %v871_v31, 0.0  ;;  %v1481_v43 = vmax.f32 %v1195_v32, 0.0 }
  0xcf   : > { %4797 = vmatmul.msk.bf16.gmra.mxu0 %vm491_vm0, %v420_v30  ;;  %4861 = vmatmul.msk.bf16.gmra.mxu1 %vm491_vm0, %v420_v30  ;;  %v1355_v56 = vmax.f32 %v1038_v48, 0.0  ;;  %v1354_v60 = vmax.f32 %v709_v49, 0.0  ;;  %v307_v49 = vld [vmem:[%s5327_s10 + $0xd0] sm:$0xff] }
  0xd0   : > { %4830 = vmatmul.msk.bf16.gmra.mxu2 %vm491_vm0, %v453_v37  ;;  %4893 = vmatmul.msk.bf16.gmra.mxu3 %vm491_vm0, %v452_v45  ;;  %v5562_v44 = vpack.c.bf16 %v1484_v42, %v1482_v38  ;;  %v5564_v47 = vpack.c.bf16 %v1481_v43, %v1479_v39 }
  0xd2   : > { %7660 = vst [vmem:[#allocation10_spill] sm:$0xff] %v5562_v44 }
  0xd3   : > { %7661 = vst [vmem:[#allocation11_spill] sm:$0xff] %v5564_v47  ;;  %v873_v50 = vpop.f32.mrf.mxu2  ;;  %v1197_v51 = vpop.f32.mrf.mxu3 }
  0xd4   : > { %v710_v52 = vpop.f32.mrf.mxu0  ;;  %v1039_v53 = vpop.f32.mrf.mxu1  ;;  %v874_v5 = vadd.f32 %v873_v50, %v5461_v41  ;;  %v1198_v6 = vadd.f32 %v1197_v51, %v5459_v40  ;;  %v308_v50 = vld [vmem:[%s5327_s10 + $0xd8] sm:$0xff]  ;;  %v373_v51 = vld [vmem:[%s5327_s10 + $0x2e0] sm:$0xff] }
  0xd5   : > { %v711_v59 = vadd.f32 %v710_v52, %v5461_v41  ;;  %v1040_v45 = vadd.f32 %v1039_v53, %v5459_v40  ;;  %v374_v52 = vld [vmem:[%s5327_s10 + $0x2e8] sm:$0xff] }
  0xd6   : > { %v1486_v19 = vmax.f32 %v874_v5, 0.0  ;;  %v1483_v20 = vmax.f32 %v1198_v6, 0.0  ;;  %v455_v5 = vpack.c.bf16 %v374_v52, %v373_v51 }
  0xd7   : > { %v1356_v61 = vmax.f32 %v711_v59, 0.0  ;;  %v1357_v62 = vmax.f32 %v1040_v45, 0.0 }
  0xd9   : > { %v5574_v3 = vpack.c.bf16 %v1356_v61, %v1354_v60  ;;  %v5576_v4 = vpack.c.bf16 %v1357_v62, %v1355_v56  ;;  %v422_v62 = vpack.c.bf16 %v308_v50, %v307_v49 }
  0xdb   : > { %v875_v7 = vpop.f32.mrf.mxu2  ;;  %v1199_v8 = vpop.f32.mrf.mxu3 }
  0xdc   : > { %v876_v11 = vadd.f32 %v875_v7, %v5461_v41  ;;  %v1200_v14 = vadd.f32 %v1199_v8, %v5459_v40  ;;  %v713_v15 = vpop.f32.mrf.mxu0  ;;  %v1042_v17 = vpop.f32.mrf.mxu1 }
  0xdd   : > { %v1043_v29 = vadd.f32 %v1042_v17, %v5459_v40  ;;  %v714_v30 = vadd.f32 %v713_v15, %v5461_v41 }
  0xde   : > { %v1488_v21 = vmax.f32 %v876_v11, 0.0  ;;  %v1485_v25 = vmax.f32 %v1200_v14, 0.0 }
  0xdf   : > { %4798 = vmatmul.msk.bf16.gmra.mxu0 %vm491_vm0, %v421_v10  ;;  %4862 = vmatmul.msk.bf16.gmra.mxu1 %vm491_vm0, %v421_v10  ;;  %v1359_v38 = vmax.f32 %v1043_v29, 0.0  ;;  %v1358_v42 = vmax.f32 %v714_v30, 0.0 }
  0xe0   : > { %4831 = vmatmul.msk.bf16.gmra.mxu2 %vm491_vm0, %v454_v18  ;;  %4894 = vmatmul.msk.bf16.gmra.mxu3 %vm491_vm0, %v453_v37  ;;  %v5586_v27 = vpack.c.bf16 %v1488_v21, %v1486_v19  ;;  %v5588_v28 = vpack.c.bf16 %v1485_v25, %v1483_v20 }
  0xe2   : > { %7662 = vst [vmem:[#allocation12_spill] sm:$0xff] %v5586_v27 }
  0xe3   : > { %7663 = vst [vmem:[#allocation13_spill] sm:$0xff] %v5588_v28  ;;  %v878_v31 = vpop.f32.mrf.mxu2  ;;  %v1202_v32 = vpop.f32.mrf.mxu3 }
  0xe4   : > { %v715_v33 = vpop.f32.mrf.mxu0  ;;  %v1044_v36 = vpop.f32.mrf.mxu1  ;;  %v879_v59 = vadd.f32 %v878_v31, %v5461_v41  ;;  %v1203_v45 = vadd.f32 %v1202_v32, %v5459_v40 }
  0xe5   : > { %v716_v39 = vadd.f32 %v715_v33, %v5461_v41  ;;  %v1045_v37 = vadd.f32 %v1044_v36, %v5459_v40  ;;  %v4940_v36 = vld [vmem:[%s7574_s3 + $0x30] sm:$0xf] }
  0xe6   : > { %v1490_v6 = vmax.f32 %v879_v59, 0.0  ;;  %v1487_v7 = vmax.f32 %v1203_v45, 0.0 }
  0xe7   : > { %v1360_v43 = vmax.f32 %v716_v39, 0.0  ;;  %v1361_v48 = vmax.f32 %v1045_v37, 0.0  ;;  %v309_v39 = vld [vmem:[%s5327_s10 + $0xe0] sm:$0xff]  ;;  %v310_v37 = vld [vmem:[%s5327_s10 + $0xe8] sm:$0xff] }
  0xe9   : > { %v5598_v53 = vpack.c.bf16 %v1360_v43, %v1358_v42  ;;  %v5600_v56 = vpack.c.bf16 %v1361_v48, %v1359_v38  ;;  %v5055_v38 = vld [vmem:[%s7574_s3 + $0x34] sm:$0xf0]  ;;  %v375_v43 = vld [vmem:[%s5327_s10 + $0x2f0] sm:$0xff] }
  0xea   : > { %v4941_v42 = vor.u32 %v5055_v38, %v4940_v36  ;;  %v376_v48 = vld [vmem:[%s5327_s10 + $0x2f8] sm:$0xff] }
  0xeb   : > { %v880_v60 = vpop.f32.mrf.mxu2  ;;  %v1204_v61 = vpop.f32.mrf.mxu3  ;;  %v5071_v36 = vld [vmem:[%s7574_s3 + $0xb4] sm:$0xf0] }
  0xec   : > { %v881_v63 = vadd.f32 %v880_v60, %v5461_v41  ;;  %v1205_v0 = vadd.f32 %v1204_v61, %v5459_v40  ;;  %v718_v1 = vpop.f32.mrf.mxu0  ;;  %v1047_v2 = vpop.f32.mrf.mxu1  ;;  %1928 = vmatpush.bf16.msrb.mxu2 %v4941_v42  ;;  %v423_v60 = vpack.c.bf16 %v310_v37, %v309_v39  ;;  %v5054_v42 = vld [vmem:[%s7574_s3 + $0x34] sm:$0xf] }
  0xed   : > { %v1048_v15 = vadd.f32 %v1047_v2, %v5459_v40  ;;  %v719_v17 = vadd.f32 %v718_v1, %v5461_v41  ;;  %v456_v1 = vpack.c.bf16 %v376_v48, %v375_v43  ;;  %v4942_v43 = vld [vmem:[%s7574_s3 + $0x38] sm:$0xf0] }
  0xee   : > { %v1492_v8 = vmax.f32 %v881_v63, 0.0  ;;  %v1489_v10 = vmax.f32 %v1205_v0, 0.0  ;;  %v312_v48 = vld [vmem:[%s5327_s10 + $0xf8] sm:$0xff] }
  0xef   : > { %4799 = vmatmul.msk.bf16.gmra.mxu0 %vm491_vm0, %v422_v62  ;;  %4863 = vmatmul.msk.bf16.gmra.mxu1 %vm491_vm0, %v422_v62  ;;  %v1363_v29 = vmax.f32 %v1048_v15, 0.0  ;;  %v1362_v31 = vmax.f32 %v719_v17, 0.0 }
  0xf0   : > { %4832 = vmatmul.msk.bf16.gmra.mxu2 %vm491_vm0, %v455_v5  ;;  %4895 = vmatmul.msk.bf16.gmra.mxu3 %vm491_vm0, %v454_v18  ;;  %v5610_v11 = vpack.c.bf16 %v1492_v8, %v1490_v6  ;;  %v5612_v14 = vpack.c.bf16 %v1489_v10, %v1487_v7 }
  0xf2   : > { %7664 = vst [vmem:[#allocation14_spill] sm:$0xff] %v5610_v11 }
  0xf3   : > { %7665 = vst [vmem:[#allocation15_spill] sm:$0xff] %v5612_v14  ;;  %v883_v19 = vpop.f32.mrf.mxu2  ;;  %v1207_v20 = vpop.f32.mrf.mxu3 }
  0xf4   : > { %v720_v21 = vpop.f32.mrf.mxu0  ;;  %v1049_v25 = vpop.f32.mrf.mxu1  ;;  %v884_v51 = vadd.f32 %v883_v19, %v5461_v41  ;;  %v1208_v52 = vadd.f32 %v1207_v20, %v5459_v40 }
  0xf5   : > { %v721_v30 = vadd.f32 %v720_v21, %v5461_v41  ;;  %v1050_v18 = vadd.f32 %v1049_v25, %v5459_v40 }
  0xf6   : > { %v1494_v2 = vmax.f32 %v884_v51, 0.0  ;;  %v1491_v6 = vmax.f32 %v1208_v52, 0.0  ;;  %v5662_v51 = vor.u32 %v5054_v42, %v4942_v43  ;;  %v5070_v52 = vld [vmem:[%s7574_s3 + $0xb4] sm:$0xf] }
  0xf7   : > { %v1364_v32 = vmax.f32 %v721_v30, 0.0  ;;  %v1365_v33 = vmax.f32 %v1050_v18, 0.0 }
  0xf8   : > { %2586 = vmatpush.bf16.msrb.mxu0 %v5662_v51 }
  0xf9   : > { %v5628_v49 = vpack.c.bf16 %v1364_v32, %v1362_v31  ;;  %v5630_v50 = vpack.c.bf16 %v1365_v33, %v1363_v29  ;;  %v311_v32 = vld [vmem:[%s5327_s10 + $0xf0] sm:$0xff] }
  0xfa   : > { %v5004_v33 = vld [vmem:[%s7574_s3 + $0xb0] sm:$0xf] }
  0xfb   : > { %v885_v59 = vpop.f32.mrf.mxu2  ;;  %v1209_v45 = vpop.f32.mrf.mxu3  ;;  %v5005_v37 = vor.u32 %v5071_v36, %v5004_v33 }
  0xfc   : > { %v886_v61 = vadd.f32 %v885_v59, %v5461_v41  ;;  %v1210_v62 = vadd.f32 %v1209_v45, %v5459_v40  ;;  %v723_v63 = vpop.f32.mrf.mxu0  ;;  %v1052_v0 = vpop.f32.mrf.mxu1  ;;  %v5006_v59 = vld [vmem:[%s7574_s3 + $0xb8] sm:$0xf0]  ;;  %v377_v45 = vld [vmem:[%s5327_s10 + $0x300] sm:$0xff] }
  0xfd   : > { %v1053_v17 = vadd.f32 %v1052_v0, %v5459_v40  ;;  %v724_v19 = vadd.f32 %v723_v63, %v5461_v41  ;;  %2257 = vmatpush.bf16.msrb.mxu3 %v5005_v37 }
  0xfe   : > { %v1496_v7 = vmax.f32 %v886_v61, 0.0  ;;  %v1493_v8 = vmax.f32 %v1210_v62, 0.0  ;;  %v5009_v61 = vor.u32 %v5070_v52, %v5006_v59 }
  0xff   : > { %4800 = vmatmul.msk.bf16.gmra.mxu0 %vm491_vm0, %v423_v60  ;;  %4864 = vmatmul.msk.bf16.gmra.mxu1 %vm491_vm0, %v423_v60  ;;  %v1367_v30 = vmax.f32 %v1053_v17, 0.0  ;;  %v1366_v31 = vmax.f32 %v724_v19, 0.0  ;;  %v378_v60 = vld [vmem:[%s5327_s10 + $0x308] sm:$0xff] }
 0x100   : > { %4833 = vmatmul.msk.bf16.gmra.mxu2 %vm491_vm0, %v456_v1  ;;  %4896 = vmatmul.msk.bf16.gmra.mxu3 %vm491_vm0, %v455_v5  ;;  %v5640_v10 = vpack.c.bf16 %v1496_v7, %v1494_v2  ;;  %v5642_v15 = vpack.c.bf16 %v1493_v8, %v1491_v6  ;;  %v424_v8 = vpack.c.bf16 %v312_v48, %v311_v32 }
 0x101   : > { %2915 = vmatpush.bf16.msrb.mxu1 %v5009_v61  ;;  %v314_v61 = vld [vmem:[%s5327_s10 + $0x108] sm:$0xff] }
 0x102   : > { %7666 = vst [vmem:[#allocation16_spill] sm:$0xff] %v5640_v10 }
 0x103   : > { %7667 = vst [vmem:[#allocation17_spill] sm:$0xff] %v5642_v15  ;;  %v888_v20 = vpop.f32.mrf.mxu2  ;;  %v1212_v21 = vpop.f32.mrf.mxu3 }
 0x104   : > { %v725_v25 = vpop.f32.mrf.mxu0  ;;  %v1054_v29 = vpop.f32.mrf.mxu1  ;;  %v889_v0 = vadd.f32 %v888_v20, %v5461_v41  ;;  %v1213_v2 = vadd.f32 %v1212_v21, %v5459_v40 }
 0x105   : > { %v726_v18 = vadd.f32 %v725_v25, %v5461_v41  ;;  %v1055_v5 = vadd.f32 %v1054_v29, %v5459_v40 }
 0x107   : > { %v1368_v38 = vmax.f32 %v726_v18, 0.0  ;;  %v1369_v39 = vmax.f32 %v1055_v5, 0.0  ;;  %v457_v18 = vpack.c.bf16 %v378_v60, %v377_v45  ;;  %v1498_v5 = vmax.f32 %v889_v0, 0.0  ;;  %v313_v60 = vld [vmem:[%s5327_s10 + $0x100] sm:$0xff]  ;;  %v379_v0 = vld [vmem:[%s5327_s10 + $0x310] sm:$0xff] }
 0x109   : > { %v5672_v62 = vpack.c.bf16 %v1368_v38, %v1366_v31  ;;  %v5674_v63 = vpack.c.bf16 %v1369_v39, %v1367_v30  ;;  %v1495_v30 = vmax.f32 %v1213_v2, 0.0  ;;  %v380_v2 = vld [vmem:[%s5327_s10 + $0x318] sm:$0xff] }
 0x10b   : > { %v890_v6 = vpop.f32.mrf.mxu2  ;;  %v1214_v7 = vpop.f32.mrf.mxu3 }
 0x10c   : > { %v891_v17 = vadd.f32 %v890_v6, %v5461_v41  ;;  %v1215_v19 = vadd.f32 %v1214_v7, %v5459_v40  ;;  %v728_v25 = vpop.f32.mrf.mxu0  ;;  %v1057_v29 = vpop.f32.mrf.mxu1 }
 0x10d   : > { %v1058_v32 = vadd.f32 %v1057_v29, %v5459_v40  ;;  %v729_v36 = vadd.f32 %v728_v25, %v5461_v41  ;;  %v425_v29 = vpack.c.bf16 %v314_v61, %v313_v60 }
 0x10e   : > { %v1500_v31 = vmax.f32 %v891_v17, 0.0  ;;  %v1497_v33 = vmax.f32 %v1215_v19, 0.0 }
 0x10f   : > { %4801 = vmatmul.msk.bf16.gmra.mxu0 %vm491_vm0, %v424_v8  ;;  %4865 = vmatmul.msk.bf16.gmra.mxu1 %vm491_vm0, %v424_v8  ;;  %v1371_v43 = vmax.f32 %v1058_v32, 0.0  ;;  %v1370_v52 = vmax.f32 %v729_v36, 0.0  ;;  %v458_v32 = vpack.c.bf16 %v380_v2, %v379_v0 }
 0x110   : > { %4834 = vmatmul.msk.bf16.gmra.mxu2 %vm491_vm0, %v457_v18  ;;  %4897 = vmatmul.msk.bf16.gmra.mxu3 %vm491_vm0, %v456_v1  ;;  %v5685_v20 = vpack.c.bf16 %v1500_v31, %v1498_v5  ;;  %v5687_v21 = vpack.c.bf16 %v1497_v33, %v1495_v30 }
 0x112   : > { %7668 = vst [vmem:[#allocation18_spill] sm:$0xff] %v5685_v20 }
 0x113   : > { %7669 = vst [vmem:[#allocation19_spill] sm:$0xff] %v5687_v21  ;;  %v893_v38 = vpop.f32.mrf.mxu2  ;;  %v1217_v39 = vpop.f32.mrf.mxu3 }
 0x114   : > { %v730_v37 = vpop.f32.mrf.mxu0  ;;  %v1059_v42 = vpop.f32.mrf.mxu1  ;;  %v894_v8 = vadd.f32 %v893_v38, %v5461_v41  ;;  %v1218_v17 = vadd.f32 %v1217_v39, %v5459_v40 }
 0x115   : > { %v731_v48 = vadd.f32 %v730_v37, %v5461_v41  ;;  %v1060_v1 = vadd.f32 %v1059_v42, %v5459_v40 }
 0x116   : > { %v1502_v36 = vmax.f32 %v894_v8, 0.0  ;;  %v1499_v37 = vmax.f32 %v1218_v17, 0.0 }
 0x117   : > { %v1372_v59 = vmax.f32 %v731_v48, 0.0  ;;  %v1373_v45 = vmax.f32 %v1060_v1, 0.0 }
 0x119   : > { %v5697_v6 = vpack.c.bf16 %v1372_v59, %v1370_v52  ;;  %v5699_v7 = vpack.c.bf16 %v1373_v45, %v1371_v43 }
 0x11b   : > { %v895_v19 = vpop.f32.mrf.mxu2  ;;  %v1219_v25 = vpop.f32.mrf.mxu3 }
 0x11c   : > { %v896_v5 = vadd.f32 %v895_v19, %v5461_v41  ;;  %v1220_v30 = vadd.f32 %v1219_v25, %v5459_v40  ;;  %v733_v31 = vpop.f32.mrf.mxu0  ;;  %v1062_v33 = vpop.f32.mrf.mxu1  ;;  %v315_v19 = vld [vmem:[%s5327_s10 + $0x110] sm:$0xff]  ;;  %v316_v25 = vld [vmem:[%s5327_s10 + $0x118] sm:$0xff] }
 0x11d   : > { %v1063_v43 = vadd.f32 %v1062_v33, %v5459_v40  ;;  %v734_v1 = vadd.f32 %v733_v31, %v5461_v41 }
 0x11e   : > { %v1504_v42 = vmax.f32 %v896_v5, 0.0  ;;  %v1501_v48 = vmax.f32 %v1220_v30, 0.0  ;;  %v382_v5 = vld [vmem:[%s5327_s10 + $0x328] sm:$0xff] }
 0x11f   : > { %4802 = vmatmul.msk.bf16.gmra.mxu0 %vm491_vm0, %v425_v29  ;;  %4866 = vmatmul.msk.bf16.gmra.mxu1 %vm491_vm0, %v425_v29  ;;  %v1375_v61 = vmax.f32 %v1063_v43, 0.0  ;;  %v1374_v2 = vmax.f32 %v734_v1, 0.0  ;;  %v381_v29 = vld [vmem:[%s5327_s10 + $0x320] sm:$0xff] }
 0x120   : > { %4835 = vmatmul.msk.bf16.gmra.mxu2 %vm491_vm0, %v458_v32  ;;  %4898 = vmatmul.msk.bf16.gmra.mxu3 %vm491_vm0, %v457_v18  ;;  %v5709_v38 = vpack.c.bf16 %v1504_v42, %v1502_v36  ;;  %v5711_v39 = vpack.c.bf16 %v1501_v48, %v1499_v37  ;;  %v426_v48 = vpack.c.bf16 %v316_v25, %v315_v19 }
 0x122   : > { %7670 = vst [vmem:[#allocation20_spill] sm:$0xff] %v5709_v38 }
 0x123   : > { %7671 = vst [vmem:[#allocation21_spill] sm:$0xff] %v5711_v39  ;;  %v898_v52 = vpop.f32.mrf.mxu2  ;;  %v1222_v59 = vpop.f32.mrf.mxu3 }
 0x124   : > { %v735_v45 = vpop.f32.mrf.mxu0  ;;  %v1064_v60 = vpop.f32.mrf.mxu1  ;;  %v899_v31 = vadd.f32 %v898_v52, %v5461_v41  ;;  %v1223_v36 = vadd.f32 %v1222_v59, %v5459_v40 }
 0x125   : > { %v736_v0 = vadd.f32 %v735_v45, %v5461_v41  ;;  %v1065_v18 = vadd.f32 %v1064_v60, %v5459_v40 }
 0x126   : > { %v1503_v38 = vmax.f32 %v1223_v36, 0.0 }
 0x127   : > { %v1376_v8 = vmax.f32 %v736_v0, 0.0  ;;  %v1377_v17 = vmax.f32 %v1065_v18, 0.0  ;;  %v459_v0 = vpack.c.bf16 %v382_v5, %v381_v29  ;;  %v1506_v18 = vmax.f32 %v899_v31, 0.0 }
 0x129   : > { %v5721_v30 = vpack.c.bf16 %v1376_v8, %v1374_v2  ;;  %v5723_v33 = vpack.c.bf16 %v1377_v17, %v1375_v61 }
 0x12b   : > { %v900_v37 = vpop.f32.mrf.mxu2  ;;  %v1224_v42 = vpop.f32.mrf.mxu3 }
 0x12c   : > { %v901_v43 = vadd.f32 %v900_v37, %v5461_v41  ;;  %v1225_v1 = vadd.f32 %v1224_v42, %v5459_v40  ;;  %v738_v45 = vpop.f32.mrf.mxu0  ;;  %v1067_v60 = vpop.f32.mrf.mxu1 }
 0x12d   : > { %v1068_v61 = vadd.f32 %v1067_v60, %v5459_v40  ;;  %v739_v17 = vadd.f32 %v738_v45, %v5461_v41  ;;  %v318_v45 = vld [vmem:[%s5327_s10 + $0x128] sm:$0xff] }
 0x12e   : > { %v1508_v2 = vmax.f32 %v901_v43, 0.0  ;;  %v1505_v8 = vmax.f32 %v1225_v1, 0.0  ;;  %v5053_v43 = vld [vmem:[%s7574_s3 + $0x24] sm:$0xf0]  ;;  %v317_v1 = vld [vmem:[%s5327_s10 + $0x120] sm:$0xff] }
 0x12f   : > { %4803 = vmatmul.msk.bf16.gmra.mxu0 %vm491_vm0, %v426_v48  ;;  %4867 = vmatmul.msk.bf16.gmra.mxu1 %vm491_vm0, %v426_v48  ;;  %v1379_v31 = vmax.f32 %v1068_v61, 0.0  ;;  %v1378_v37 = vmax.f32 %v739_v17, 0.0  ;;  %v4932_v48 = vld [vmem:[%s7574_s3 + $0x20] sm:$0xf] }
 0x130   : > { %4836 = vmatmul.msk.bf16.gmra.mxu2 %vm491_vm0, %v459_v0  ;;  %4899 = vmatmul.msk.bf16.gmra.mxu3 %vm491_vm0, %v458_v32  ;;  %v5733_v52 = vpack.c.bf16 %v1508_v2, %v1506_v18  ;;  %v5735_v59 = vpack.c.bf16 %v1505_v8, %v1503_v38  ;;  %v4933_v60 = vor.u32 %v5053_v43, %v4932_v48  ;;  %v383_v18 = vld [vmem:[%s5327_s10 + $0x330] sm:$0xff]  ;;  %v384_v2 = vld [vmem:[%s5327_s10 + $0x338] sm:$0xff] }
 0x131   : > { %v460_v43 = vpack.c.bf16 %v384_v2, %v383_v18 }
 0x132   : > { %7672 = vst [vmem:[#allocation22_spill] sm:$0xff] %v5733_v52  ;;  %1929 = vmatpush.bf16.msrb.mxu2 %v4933_v60 }
 0x133   : > { %7673 = vst [vmem:[#allocation23_spill] sm:$0xff] %v5735_v59  ;;  %v903_v19 = vpop.f32.mrf.mxu2  ;;  %v1227_v25 = vpop.f32.mrf.mxu3 }
 0x134   : > { %v740_v29 = vpop.f32.mrf.mxu0  ;;  %v1069_v5 = vpop.f32.mrf.mxu1  ;;  %v904_v17 = vadd.f32 %v903_v19, %v5461_v41 }
 0x135   : > { %v741_v36 = vadd.f32 %v740_v29, %v5461_v41  ;;  %v1070_v32 = vadd.f32 %v1069_v5, %v5459_v40  ;;  %v1228_v29 = vadd.f32 %v1227_v25, %v5459_v40 }
 0x136   : > { %v1510_v20 = vmax.f32 %v904_v17, 0.0  ;;  %v319_v17 = vld [vmem:[%s5327_s10 + $0x130] sm:$0xff] }
 0x137   : > { %v1380_v42 = vmax.f32 %v741_v36, 0.0  ;;  %v1381_v38 = vmax.f32 %v1070_v32, 0.0  ;;  %v427_v32 = vpack.c.bf16 %v318_v45, %v317_v1 }
 0x139   : > { %v5751_v8 = vpack.c.bf16 %v1380_v42, %v1378_v37  ;;  %v5753_v61 = vpack.c.bf16 %v1381_v38, %v1379_v31  ;;  %v1507_v37 = vmax.f32 %v1228_v29, 0.0  ;;  %v4996_v29 = vld [vmem:[%s7574_s3 + $0xa0] sm:$0xf] }
 0x13b   : > { %v905_v5 = vpop.f32.mrf.mxu2  ;;  %v1229_v36 = vpop.f32.mrf.mxu3 }
 0x13c   : > { %v906_v52 = vadd.f32 %v905_v5, %v5461_v41  ;;  %v1230_v59 = vadd.f32 %v1229_v36, %v5459_v40  ;;  %v743_v39 = vpop.f32.mrf.mxu0  ;;  %v1072_v48 = vpop.f32.mrf.mxu1 }
 0x13d   : > { %v1073_v38 = vadd.f32 %v1072_v48, %v5459_v40  ;;  %v744_v1 = vadd.f32 %v743_v39, %v5461_v41  ;;  %v5069_v39 = vld [vmem:[%s7574_s3 + $0xa4] sm:$0xf0]  ;;  %v5052_v48 = vld [vmem:[%s7574_s3 + $0x24] sm:$0xf] }
 0x13e   : > { %v1512_v42 = vmax.f32 %v906_v52, 0.0  ;;  %v1509_v31 = vmax.f32 %v1230_v59, 0.0 }
 0x13f   : > { %4804 = vmatmul.msk.bf16.gmra.mxu0 %vm491_vm0, %v427_v32  ;;  %4868 = vmatmul.msk.bf16.gmra.mxu1 %vm491_vm0, %v427_v32  ;;  %v1383_v18 = vmax.f32 %v1073_v38, 0.0  ;;  %v4997_v32 = vor.u32 %v5069_v39, %v4996_v29  ;;  %v5068_v38 = vld [vmem:[%s7574_s3 + $0xa4] sm:$0xf] }
 0x140   : > { %4837 = vmatmul.msk.bf16.gmra.mxu2 %vm491_vm0, %v460_v43  ;;  %4900 = vmatmul.msk.bf16.gmra.mxu3 %vm491_vm0, %v459_v0  ;;  %v5763_v19 = vpack.c.bf16 %v1512_v42, %v1510_v20  ;;  %v5765_v25 = vpack.c.bf16 %v1509_v31, %v1507_v37  ;;  %v1382_v20 = vmax.f32 %v744_v1, 0.0  ;;  %v4934_v37 = vld [vmem:[%s7574_s3 + $0x28] sm:$0xf0]  ;;  %v320_v42 = vld [vmem:[%s5327_s10 + $0x138] sm:$0xff] }
 0x141   : > { %v5785_v31 = vor.u32 %v5052_v48, %v4934_v37  ;;  %v4998_v1 = vld [vmem:[%s7574_s3 + $0xa8] sm:$0xf0]  ;;  %2258 = vmatpush.bf16.msrb.mxu3 %v4997_v32 }
 0x142   : > { %7674 = vst [vmem:[#allocation24_spill] sm:$0xff] %v5763_v19 }
 0x143   : > { %7675 = vst [vmem:[#allocation25_spill] sm:$0xff] %v5765_v25  ;;  %v908_v45 = vpop.f32.mrf.mxu2  ;;  %v1232_v52 = vpop.f32.mrf.mxu3  ;;  %2587 = vmatpush.bf16.msrb.mxu0 %v5785_v31  ;;  %v428_v25 = vpack.c.bf16 %v320_v42, %v319_v17 }
 0x144   : > { %v745_v59 = vpop.f32.mrf.mxu0  ;;  %v1074_v60 = vpop.f32.mrf.mxu1  ;;  %v909_v39 = vadd.f32 %v908_v45, %v5461_v41  ;;  %v1233_v48 = vadd.f32 %v1232_v52, %v5459_v40 }
 0x145   : > { %v746_v2 = vadd.f32 %v745_v59, %v5461_v41  ;;  %v1075_v0 = vadd.f32 %v1074_v60, %v5459_v40  ;;  %v385_v59 = vld [vmem:[%s5327_s10 + $0x340] sm:$0xff]  ;;  %v386_v60 = vld [vmem:[%s5327_s10 + $0x348] sm:$0xff] }
 0x147   : > { %v1384_v5 = vmax.f32 %v746_v2, 0.0  ;;  %v1385_v36 = vmax.f32 %v1075_v0, 0.0  ;;  %v5001_v2 = vor.u32 %v5068_v38, %v4998_v1 }
 0x149   : > { %v5795_v0 = vpack.c.bf16 %v1384_v5, %v1382_v20  ;;  %v5797_v29 = vpack.c.bf16 %v1385_v36, %v1383_v18  ;;  %2916 = vmatpush.bf16.msrb.mxu1 %v5001_v2  ;;  %v461_v20 = vpack.c.bf16 %v386_v60, %v385_v59  ;;  %v1514_v5 = vmax.f32 %v909_v39, 0.0 }
 0x14a   : > { %v1511_v18 = vmax.f32 %v1233_v48, 0.0 }
 0x14b   : > { %v910_v37 = vpop.f32.mrf.mxu2  ;;  %v1234_v19 = vpop.f32.mrf.mxu3 }
 0x14c   : > { %v911_v21 = vadd.f32 %v910_v37, %v5461_v41  ;;  %v1235_v10 = vadd.f32 %v1234_v19, %v5459_v40  ;;  %v748_v32 = vpop.f32.mrf.mxu0  ;;  %v1077_v38 = vpop.f32.mrf.mxu1  ;;  %v321_v37 = vld [vmem:[%s5327_s10 + $0x140] sm:$0xff] }
 0x14d   : > { %v1078_v52 = vadd.f32 %v1077_v38, %v5459_v40 }
 0x14e   : > { %v1516_v36 = vmax.f32 %v911_v21, 0.0  ;;  %v1513_v1 = vmax.f32 %v1235_v10, 0.0  ;;  %v749_v10 = vadd.f32 %v748_v32, %v5461_v41 }
 0x14f   : > { %4805 = vmatmul.msk.bf16.gmra.mxu0 %vm491_vm0, %v428_v25  ;;  %4869 = vmatmul.msk.bf16.gmra.mxu1 %vm491_vm0, %v428_v25  ;;  %v1387_v59 = vmax.f32 %v1078_v52, 0.0 }
 0x150   : > { %4838 = vmatmul.msk.bf16.gmra.mxu2 %vm491_vm0, %v461_v20  ;;  %4901 = vmatmul.msk.bf16.gmra.mxu3 %vm491_vm0, %v460_v43  ;;  %v5808_v45 = vpack.c.bf16 %v1516_v36, %v1514_v5  ;;  %v5810_v19 = vpack.c.bf16 %v1513_v1, %v1511_v18  ;;  %v1386_v2 = vmax.f32 %v749_v10, 0.0  ;;  %v322_v5 = vld [vmem:[%s5327_s10 + $0x148] sm:$0xff]  ;;  %v387_v18 = vld [vmem:[%s5327_s10 + $0x350] sm:$0xff]  ;;  %v388_v36 = vld [vmem:[%s5327_s10 + $0x358] sm:$0xff] }
 0x151   : > { %v462_v15 = vpack.c.bf16 %v388_v36, %v387_v18 }
 0x152   : > { %7676 = vst [vmem:[#allocation26_spill] sm:$0xff] %v5808_v45 }
 0x153   : > { %7677 = vst [vmem:[#allocation27_spill] sm:$0xff] %v5810_v19  ;;  %v913_v21 = vpop.f32.mrf.mxu2  ;;  %v1237_v17 = vpop.f32.mrf.mxu3 }
 0x154   : > { %v750_v42 = vpop.f32.mrf.mxu0  ;;  %v1079_v25 = vpop.f32.mrf.mxu1  ;;  %v914_v32 = vadd.f32 %v913_v21, %v5461_v41  ;;  %v1238_v45 = vadd.f32 %v1237_v17, %v5459_v40 }
 0x155   : > { %v751_v60 = vadd.f32 %v750_v42, %v5461_v41  ;;  %v1080_v43 = vadd.f32 %v1079_v25, %v5459_v40  ;;  %v429_v42 = vpack.c.bf16 %v322_v5, %v321_v37 }
 0x156   : > { %v1518_v11 = vmax.f32 %v914_v32, 0.0  ;;  %v1515_v14 = vmax.f32 %v1238_v45, 0.0 }
 0x157   : > { %v1388_v39 = vmax.f32 %v751_v60, 0.0  ;;  %v1389_v48 = vmax.f32 %v1080_v43, 0.0 }
 0x159   : > { %v5820_v1 = vpack.c.bf16 %v1388_v39, %v1386_v2  ;;  %v5822_v38 = vpack.c.bf16 %v1389_v48, %v1387_v59 }
 0x15b   : > { %v915_v52 = vpop.f32.mrf.mxu2  ;;  %v1239_v19 = vpop.f32.mrf.mxu3 }
 0x15c   : > { %v916_v25 = vadd.f32 %v915_v52, %v5461_v41  ;;  %v1240_v10 = vadd.f32 %v1239_v19, %v5459_v40  ;;  %v753_v60 = vpop.f32.mrf.mxu0  ;;  %v1082_v43 = vpop.f32.mrf.mxu1 }
 0x15d   : > { %v1083_v45 = vadd.f32 %v1082_v43, %v5459_v40  ;;  %v754_v17 = vadd.f32 %v753_v60, %v5461_v41 }
 0x15e   : > { %v1520_v2 = vmax.f32 %v916_v25, 0.0  ;;  %v1517_v39 = vmax.f32 %v1240_v10, 0.0  ;;  %v389_v25 = vld [vmem:[%s5327_s10 + $0x360] sm:$0xff]  ;;  %v390_v10 = vld [vmem:[%s5327_s10 + $0x368] sm:$0xff] }
 0x15f   : > { %4806 = vmatmul.msk.bf16.gmra.mxu0 %vm491_vm0, %v429_v42  ;;  %4870 = vmatmul.msk.bf16.gmra.mxu1 %vm491_vm0, %v429_v42  ;;  %v1391_v18 = vmax.f32 %v1083_v45, 0.0  ;;  %v1390_v32 = vmax.f32 %v754_v17, 0.0  ;;  %v323_v42 = vld [vmem:[%s5327_s10 + $0x150] sm:$0xff] }
 0x160   : > { %4839 = vmatmul.msk.bf16.gmra.mxu2 %vm491_vm0, %v462_v15  ;;  %4902 = vmatmul.msk.bf16.gmra.mxu3 %vm491_vm0, %v461_v20  ;;  %v5832_v21 = vpack.c.bf16 %v1520_v2, %v1518_v11  ;;  %v5834_v19 = vpack.c.bf16 %v1517_v39, %v1515_v14  ;;  %v324_v14 = vld [vmem:[%s5327_s10 + $0x158] sm:$0xff] }
 0x162   : > { %7678 = vst [vmem:[#allocation28_spill] sm:$0xff] %v5832_v21 }
 0x163   : > { %7679 = vst [vmem:[#allocation29_spill] sm:$0xff] %v5834_v19  ;;  %v918_v59 = vpop.f32.mrf.mxu2  ;;  %v1242_v48 = vpop.f32.mrf.mxu3  ;;  %v463_v19 = vpack.c.bf16 %v390_v10, %v389_v25 }
 0x164   : > { %v755_v37 = vpop.f32.mrf.mxu0  ;;  %v1084_v5 = vpop.f32.mrf.mxu1  ;;  %v919_v60 = vadd.f32 %v918_v59, %v5461_v41  ;;  %v1243_v39 = vadd.f32 %v1242_v48, %v5459_v40 }
 0x165   : > { %v756_v36 = vadd.f32 %v755_v37, %v5461_v41  ;;  %v1085_v20 = vadd.f32 %v1084_v5, %v5459_v40  ;;  %v430_v37 = vpack.c.bf16 %v324_v14, %v323_v42 }
 0x166   : > { %v1522_v27 = vmax.f32 %v919_v60, 0.0  ;;  %v1519_v28 = vmax.f32 %v1243_v39, 0.0 }
 0x167   : > { %v1392_v11 = vmax.f32 %v756_v36, 0.0  ;;  %v1393_v52 = vmax.f32 %v1085_v20, 0.0 }
 0x169   : > { %v5844_v2 = vpack.c.bf16 %v1392_v11, %v1390_v32  ;;  %v5846_v43 = vpack.c.bf16 %v1393_v52, %v1391_v18 }
 0x16b   : > { %v920_v45 = vpop.f32.mrf.mxu2  ;;  %v1244_v21 = vpop.f32.mrf.mxu3 }
 0x16c   : > { %v921_v5 = vadd.f32 %v920_v45, %v5461_v41  ;;  %v1245_v17 = vadd.f32 %v1244_v21, %v5459_v40  ;;  %v758_v36 = vpop.f32.mrf.mxu0  ;;  %v1087_v20 = vpop.f32.mrf.mxu1  ;;  %v4924_v45 = vld [vmem:[%s7574_s3 + $0x10] sm:$0xf] }
 0x16d   : > { %v1088_v21 = vadd.f32 %v1087_v20, %v5459_v40  ;;  %v759_v18 = vadd.f32 %v758_v36, %v5461_v41  ;;  %v391_v20 = vld [vmem:[%s5327_s10 + $0x370] sm:$0xff] }
 0x16e   : > { %v1524_v32 = vmax.f32 %v921_v5, 0.0  ;;  %v1521_v11 = vmax.f32 %v1245_v17, 0.0  ;;  %v325_v5 = vld [vmem:[%s5327_s10 + $0x160] sm:$0xff]  ;;  %v326_v17 = vld [vmem:[%s5327_s10 + $0x168] sm:$0xff] }
 0x16f   : > { %4807 = vmatmul.msk.bf16.gmra.mxu0 %vm491_vm0, %v430_v37  ;;  %4871 = vmatmul.msk.bf16.gmra.mxu1 %vm491_vm0, %v430_v37  ;;  %v1395_v10 = vmax.f32 %v1088_v21, 0.0  ;;  %v5051_v37 = vld [vmem:[%s7574_s3 + $0x14] sm:$0xf0] }
 0x170   : > { %4840 = vmatmul.msk.bf16.gmra.mxu2 %vm491_vm0, %v463_v19  ;;  %4903 = vmatmul.msk.bf16.gmra.mxu3 %vm491_vm0, %v462_v15  ;;  %v5856_v59 = vpack.c.bf16 %v1524_v32, %v1522_v27  ;;  %v5858_v48 = vpack.c.bf16 %v1521_v11, %v1519_v28  ;;  %v1394_v15 = vmax.f32 %v759_v18, 0.0  ;;  %v4925_v36 = vor.u32 %v5051_v37, %v4924_v45  ;;  %v392_v32 = vld [vmem:[%s5327_s10 + $0x378] sm:$0xff] }
 0x171   : > { %v464_v37 = vpack.c.bf16 %v392_v32, %v391_v20 }
 0x172   : > { %7680 = vst [vmem:[#allocation30_spill] sm:$0xff] %v5856_v59  ;;  %1930 = vmatpush.bf16.msrb.mxu2 %v4925_v36 }
 0x173   : > { %7681 = vst [vmem:[#allocation31_spill] sm:$0xff] %v5858_v48  ;;  %v923_v52 = vpop.f32.mrf.mxu2  ;;  %v1247_v42 = vpop.f32.mrf.mxu3 }
 0x174   : > { %v760_v14 = vpop.f32.mrf.mxu0  ;;  %v1089_v25 = vpop.f32.mrf.mxu1  ;;  %v924_v18 = vadd.f32 %v923_v52, %v5461_v41 }
 0x175   : > { %v761_v60 = vadd.f32 %v760_v14, %v5461_v41  ;;  %v1090_v27 = vadd.f32 %v1089_v25, %v5459_v40  ;;  %v1248_v14 = vadd.f32 %v1247_v42, %v5459_v40 }
 0x176   : > { %v1526_v47 = vmax.f32 %v924_v18, 0.0  ;;  %v4988_v18 = vld [vmem:[%s7574_s3 + $0x90] sm:$0xf] }
 0x177   : > { %v1396_v39 = vmax.f32 %v761_v60, 0.0  ;;  %v1397_v28 = vmax.f32 %v1090_v27, 0.0  ;;  %v431_v27 = vpack.c.bf16 %v326_v17, %v325_v5 }
 0x179   : > { %v5874_v11 = vpack.c.bf16 %v1396_v39, %v1394_v15  ;;  %v5876_v21 = vpack.c.bf16 %v1397_v28, %v1395_v10  ;;  %v1523_v15 = vmax.f32 %v1248_v14, 0.0 }
 0x17b   : > { %v925_v25 = vpop.f32.mrf.mxu2  ;;  %v1249_v60 = vpop.f32.mrf.mxu3 }
 0x17c   : > { %v926_v59 = vadd.f32 %v925_v25, %v5461_v41  ;;  %v1250_v48 = vadd.f32 %v1249_v60, %v5459_v40  ;;  %v763_v44 = vpop.f32.mrf.mxu0  ;;  %v1092_v45 = vpop.f32.mrf.mxu1 }
 0x17d   : > { %v1093_v28 = vadd.f32 %v1092_v45, %v5459_v40  ;;  %v764_v5 = vadd.f32 %v763_v44, %v5461_v41  ;;  %v5067_v44 = vld [vmem:[%s7574_s3 + $0x94] sm:$0xf0]  ;;  %v4990_v45 = vld [vmem:[%s7574_s3 + $0x98] sm:$0xf0] }
 0x17e   : > { %v1528_v39 = vmax.f32 %v926_v59, 0.0  ;;  %v1525_v10 = vmax.f32 %v1250_v48, 0.0  ;;  %v4989_v60 = vor.u32 %v5067_v44, %v4988_v18 }
 0x17f   : > { %4808 = vmatmul.msk.bf16.gmra.mxu0 %vm491_vm0, %v431_v27  ;;  %4872 = vmatmul.msk.bf16.gmra.mxu1 %vm491_vm0, %v431_v27  ;;  %v1399_v20 = vmax.f32 %v1093_v28, 0.0  ;;  %v5066_v27 = vld [vmem:[%s7574_s3 + $0x94] sm:$0xf] }
 0x180   : > { %4841 = vmatmul.msk.bf16.gmra.mxu2 %vm491_vm0, %v464_v37  ;;  %4904 = vmatmul.msk.bf16.gmra.mxu3 %vm491_vm0, %v463_v19  ;;  %v5886_v52 = vpack.c.bf16 %v1528_v39, %v1526_v47  ;;  %v5888_v42 = vpack.c.bf16 %v1525_v10, %v1523_v15  ;;  %v1398_v19 = vmax.f32 %v764_v5, 0.0  ;;  %v327_v15 = vld [vmem:[%s5327_s10 + $0x170] sm:$0xff]  ;;  %v328_v39 = vld [vmem:[%s5327_s10 + $0x178] sm:$0xff]  ;;  %v4993_v10 = vor.u32 %v5066_v27, %v4990_v45 }
 0x181   : > { %2259 = vmatpush.bf16.msrb.mxu3 %v4989_v60 }
 0x182   : > { %7682 = vst [vmem:[#allocation32_spill] sm:$0xff] %v5886_v52  ;;  %2917 = vmatpush.bf16.msrb.mxu1 %v4993_v10  ;;  %v432_v52 = vpack.c.bf16 %v328_v39, %v327_v15 }
 0x183   : > { %7683 = vst [vmem:[#allocation33_spill] sm:$0xff] %v5888_v42  ;;  %v928_v17 = vpop.f32.mrf.mxu2  ;;  %v1252_v59 = vpop.f32.mrf.mxu3 }
 0x184   : > { %v765_v48 = vpop.f32.mrf.mxu0  ;;  %v1094_v36 = vpop.f32.mrf.mxu1  ;;  %v929_v28 = vadd.f32 %v928_v17, %v5461_v41  ;;  %v1253_v5 = vadd.f32 %v1252_v59, %v5459_v40 }
 0x185   : > { %v766_v32 = vadd.f32 %v765_v48, %v5461_v41  ;;  %v1095_v47 = vadd.f32 %v1094_v36, %v5459_v40  ;;  %v393_v48 = vld [vmem:[%s5327_s10 + $0x380] sm:$0xff]  ;;  %v394_v36 = vld [vmem:[%s5327_s10 + $0x388] sm:$0xff] }
 0x186   : > { %v465_v17 = vpack.c.bf16 %v394_v36, %v393_v48  ;;  %v1530_v55 = vmax.f32 %v929_v28, 0.0  ;;  %v1527_v59 = vmax.f32 %v1253_v5, 0.0  ;;  %v329_v48 = vld [vmem:[%s5327_s10 + $0x180] sm:$0xff]  ;;  %v330_v36 = vld [vmem:[%s5327_s10 + $0x188] sm:$0xff] }
 0x187   : > { %v1400_v14 = vmax.f32 %v766_v32, 0.0  ;;  %v1401_v25 = vmax.f32 %v1095_v47, 0.0 }
 0x189   : > { %v5912_v32 = vpack.c.bf16 %v1400_v14, %v1398_v19  ;;  %v5914_v47 = vpack.c.bf16 %v1401_v25, %v1399_v20  ;;  %v5050_v20 = vld [vmem:[%s7574_s3 + $0x14] sm:$0xf]  ;;  %v4926_v19 = vld [vmem:[%s7574_s3 + $0x18] sm:$0xf0] }
 0x18a   : > { %v5926_v14 = vor.u32 %v5050_v20, %v4926_v19 }
 0x18b   : > { %7684 = vst [vmem:[#allocation34_spill] sm:$0xff] %v5914_v47  ;;  %v930_v18 = vpop.f32.mrf.mxu2  ;;  %v1254_v44 = vpop.f32.mrf.mxu3 }
 0x18c   : > { %v931_v42 = vadd.f32 %v930_v18, %v5461_v41  ;;  %v1255_v54 = vadd.f32 %v1254_v44, %v5459_v40  ;;  %v768_v27 = vpop.f32.mrf.mxu0  ;;  %v1097_v45 = vpop.f32.mrf.mxu1  ;;  %2588 = vmatpush.bf16.msrb.mxu0 %v5926_v14  ;;  %v395_v18 = vld [vmem:[%s5327_s10 + $0x390] sm:$0xff]  ;;  %v396_v44 = vld [vmem:[%s5327_s10 + $0x398] sm:$0xff] }
 0x18d   : > { %v1098_v25 = vadd.f32 %v1097_v45, %v5459_v40 }
 0x18e   : > { %v1532_v12 = vmax.f32 %v931_v42, 0.0  ;;  %v1529_v13 = vmax.f32 %v1255_v54, 0.0 }
 0x18f   : > { %4809 = vmatmul.msk.bf16.gmra.mxu0 %vm491_vm0, %v432_v52  ;;  %4873 = vmatmul.msk.bf16.gmra.mxu1 %vm491_vm0, %v432_v52  ;;  %v769_v52 = vadd.f32 %v768_v27, %v5461_v41  ;;  %v1403_v28 = vmax.f32 %v1098_v25, 0.0 }
 0x190   : > { %4842 = vmatmul.msk.bf16.gmra.mxu2 %vm491_vm0, %v465_v17  ;;  %4905 = vmatmul.msk.bf16.gmra.mxu3 %vm491_vm0, %v464_v37  ;;  %v5930_v54 = vpack.c.bf16 %v1532_v12, %v1530_v55  ;;  %v5932_v42 = vpack.c.bf16 %v1529_v13, %v1527_v59 }
 0x191   : > { %v1402_v55 = vmax.f32 %v769_v52, 0.0 }
 0x192   : > { %7685 = vst [vmem:[#allocation35_spill] sm:$0xff] %v5930_v54  ;;  %v466_v54 = vpack.c.bf16 %v396_v44, %v395_v18 }
 0x193   : > { %7686 = vst [vmem:[#allocation36_spill] sm:$0xff] %v5932_v42  ;;  %v933_v60 = vpop.f32.mrf.mxu2  ;;  %v1257_v15 = vpop.f32.mrf.mxu3 }
 0x194   : > { %v770_v39 = vpop.f32.mrf.mxu0  ;;  %v1099_v10 = vpop.f32.mrf.mxu1  ;;  %v934_v27 = vadd.f32 %v933_v60, %v5461_v41  ;;  %v1258_v20 = vadd.f32 %v1257_v15, %v5459_v40 }
 0x195   : > { %v771_v37 = vadd.f32 %v770_v39, %v5461_v41  ;;  %v1100_v12 = vadd.f32 %v1099_v10, %v5459_v40  ;;  %v433_v39 = vpack.c.bf16 %v330_v36, %v329_v48 }
 0x196   : > { %v1534_v42 = vmax.f32 %v934_v27, 0.0  ;;  %v1531_v47 = vmax.f32 %v1258_v20, 0.0 }
 0x197   : > { %v1404_v13 = vmax.f32 %v771_v37, 0.0  ;;  %v1405_v5 = vmax.f32 %v1100_v12, 0.0 }
 0x199   : > { %v5943_v45 = vpack.c.bf16 %v1404_v13, %v1402_v55  ;;  %v5945_v59 = vpack.c.bf16 %v1405_v5, %v1403_v28 }
 0x19b   : > { %7687 = vst [vmem:[#allocation37_spill] sm:$0xff] %v5943_v45  ;;  %v935_v19 = vpop.f32.mrf.mxu2  ;;  %v1259_v25 = vpop.f32.mrf.mxu3 }
 0x19c   : > { %7688 = vst [vmem:[#allocation38_spill] sm:$0xff] %v5945_v59  ;;  %v936_v10 = vadd.f32 %v935_v19, %v5461_v41  ;;  %v1260_v52 = vadd.f32 %v1259_v25, %v5459_v40  ;;  %v773_v37 = vpop.f32.mrf.mxu0  ;;  %v1102_v12 = vpop.f32.mrf.mxu1 }
 0x19d   : > { %v1103_v28 = vadd.f32 %v1102_v12, %v5459_v40  ;;  %v774_v5 = vadd.f32 %v773_v37, %v5461_v41 }
 0x19e   : > { %v1536_v55 = vmax.f32 %v936_v10, 0.0  ;;  %v1533_v13 = vmax.f32 %v1260_v52, 0.0  ;;  %v397_v10 = vld [vmem:[%s5327_s10 + $0x3a0] sm:$0xff]  ;;  %v398_v52 = vld [vmem:[%s5327_s10 + $0x3a8] sm:$0xff] }
 0x19f   : > { %4810 = vmatmul.msk.bf16.gmra.mxu0 %vm491_vm0, %v433_v39  ;;  %4874 = vmatmul.msk.bf16.gmra.mxu1 %vm491_vm0, %v433_v39  ;;  %v1407_v27 = vmax.f32 %v1103_v28, 0.0  ;;  %v1406_v19 = vmax.f32 %v774_v5, 0.0  ;;  %v331_v39 = vld [vmem:[%s5327_s10 + $0x190] sm:$0xff] }
 0x1a0   : > { %4843 = vmatmul.msk.bf16.gmra.mxu2 %vm491_vm0, %v466_v54  ;;  %4906 = vmatmul.msk.bf16.gmra.mxu3 %vm491_vm0, %v465_v17  ;;  %v5955_v60 = vpack.c.bf16 %v1536_v55, %v1534_v42  ;;  %v5957_v15 = vpack.c.bf16 %v1533_v13, %v1531_v47  ;;  %v332_v47 = vld [vmem:[%s5327_s10 + $0x198] sm:$0xff] }
 0x1a2   : > { %7689 = vst [vmem:[#allocation39_spill] sm:$0xff] %v5955_v60 }
 0x1a3   : > { %7690 = vst [vmem:[#allocation40_spill] sm:$0xff] %v5957_v15  ;;  %v938_v48 = vpop.f32.mrf.mxu2  ;;  %v1262_v36 = vpop.f32.mrf.mxu3  ;;  %v467_v15 = vpack.c.bf16 %v398_v52, %v397_v10 }
 0x1a4   : > { %v775_v18 = vpop.f32.mrf.mxu0  ;;  %v1104_v44 = vpop.f32.mrf.mxu1  ;;  %v939_v37 = vadd.f32 %v938_v48, %v5461_v41  ;;  %v1263_v13 = vadd.f32 %v1262_v36, %v5459_v40 }
 0x1a5   : > { %v776_v20 = vadd.f32 %v775_v18, %v5461_v41  ;;  %v1105_v17 = vadd.f32 %v1104_v44, %v5459_v40  ;;  %v434_v18 = vpack.c.bf16 %v332_v47, %v331_v39 }
 0x1a6   : > { %v1538_v59 = vmax.f32 %v939_v37, 0.0  ;;  %v1535_v45 = vmax.f32 %v1263_v13, 0.0 }
 0x1a7   : > { %v1408_v42 = vmax.f32 %v776_v20, 0.0  ;;  %v1409_v25 = vmax.f32 %v1105_v17, 0.0 }
 0x1a9   : > { %v5967_v55 = vpack.c.bf16 %v1408_v42, %v1406_v19  ;;  %v5969_v12 = vpack.c.bf16 %v1409_v25, %v1407_v27 }
 0x1ab   : > { %v940_v28 = vpop.f32.mrf.mxu2  ;;  %v1264_v60 = vpop.f32.mrf.mxu3 }
 0x1ac   : > { %v941_v44 = vadd.f32 %v940_v28, %v5461_v41  ;;  %v1265_v5 = vadd.f32 %v1264_v60, %v5459_v40  ;;  %v778_v20 = vpop.f32.mrf.mxu0  ;;  %v1107_v17 = vpop.f32.mrf.mxu1 }
 0x1ad   : > { %v1108_v60 = vadd.f32 %v1107_v17, %v5459_v40  ;;  %v779_v27 = vadd.f32 %v778_v20, %v5461_v41  ;;  %v334_v20 = vld [vmem:[%s5327_s10 + $0x1a8] sm:$0xff]  ;;  %v399_v17 = vld [vmem:[%s5327_s10 + $0x3b0] sm:$0xff] }
 0x1ae   : > { %v1540_v19 = vmax.f32 %v941_v44, 0.0  ;;  %v1537_v42 = vmax.f32 %v1265_v5, 0.0  ;;  %v333_v5 = vld [vmem:[%s5327_s10 + $0x1a0] sm:$0xff] }
 0x1af   : > { %4811 = vmatmul.msk.bf16.gmra.mxu0 %vm491_vm0, %v434_v18  ;;  %4875 = vmatmul.msk.bf16.gmra.mxu1 %vm491_vm0, %v434_v18  ;;  %v1411_v52 = vmax.f32 %v1108_v60, 0.0  ;;  %v1410_v13 = vmax.f32 %v779_v27, 0.0 }
 0x1b0   : > { %4844 = vmatmul.msk.bf16.gmra.mxu2 %vm491_vm0, %v467_v15  ;;  %4907 = vmatmul.msk.bf16.gmra.mxu3 %vm491_vm0, %v466_v54  ;;  %v5979_v48 = vpack.c.bf16 %v1540_v19, %v1538_v59  ;;  %v5981_v36 = vpack.c.bf16 %v1537_v42, %v1535_v45  ;;  %v4916_v45 = vld [vmem:[%s7574_s3] sm:$0xf]  ;;  %v5049_v59 = vld [vmem:[%s7574_s3 + $0x4] sm:$0xf0]  ;;  %v400_v19 = vld [vmem:[%s5327_s10 + $0x3b8] sm:$0xff] }
 0x1b1   : > { %v4917_v44 = vor.u32 %v5049_v59, %v4916_v45 }
 0x1b2   : > { %7691 = vst [vmem:[#allocation41_spill] sm:$0xff] %v5979_v48 }
 0x1b3   : > { %7692 = vst [vmem:[#allocation42_spill] sm:$0xff] %v5981_v36  ;;  %v943_v25 = vpop.f32.mrf.mxu2  ;;  %v1267_v39 = vpop.f32.mrf.mxu3  ;;  %1931 = vmatpush.bf16.msrb.mxu2 %v4917_v44  ;;  %v468_v44 = vpack.c.bf16 %v400_v19, %v399_v17 }
 0x1b4   : > { %v780_v47 = vpop.f32.mrf.mxu0  ;;  %v1109_v10 = vpop.f32.mrf.mxu1 }
 0x1b5   : > { %v781_v37 = vadd.f32 %v780_v47, %v5461_v41  ;;  %v1110_v54 = vadd.f32 %v1109_v10, %v5459_v40  ;;  %v944_v47 = vadd.f32 %v943_v25, %v5461_v41  ;;  %v1268_v10 = vadd.f32 %v1267_v39, %v5459_v40 }
 0x1b7   : > { %v1412_v28 = vmax.f32 %v781_v37, 0.0  ;;  %v1413_v18 = vmax.f32 %v1110_v54, 0.0  ;;  %5082 = vmatpush.bf16.msra.mxu2 %v5306_v9  ;;  %v435_v37 = vpack.c.bf16 %v334_v20, %v333_v5 }
 0x1b9   : > { %v5997_v42 = vpack.c.bf16 %v1412_v28, %v1410_v13  ;;  %v5999_v60 = vpack.c.bf16 %v1413_v18, %v1411_v52  ;;  %v1542_v13 = vmax.f32 %v944_v47, 0.0  ;;  %v1539_v28 = vmax.f32 %v1268_v10, 0.0 }
 0x1bb   : > { %v945_v48 = vpop.f32.mrf.mxu2  ;;  %v1269_v27 = vpop.f32.mrf.mxu3  ;;  %5083 = vmatpush.bf16.msra.mxu2 %v5376_v46 }
 0x1bc   : > { %v946_v54 = vadd.f32 %v945_v48, %v5461_v41  ;;  %v1270_v45 = vadd.f32 %v1269_v27, %v5459_v40  ;;  %v783_v59 = vpop.f32.mrf.mxu0  ;;  %v1112_v36 = vpop.f32.mrf.mxu1 }
 0x1bd   : > { %v1113_v25 = vadd.f32 %v1112_v36, %v5459_v40  ;;  %v784_v39 = vadd.f32 %v783_v59, %v5461_v41  ;;  %v4980_v36 = vld [vmem:[%s7574_s3 + $0x80] sm:$0xf]  ;;  %v4982_v59 = vld [vmem:[%s7574_s3 + $0x88] sm:$0xf0] }
 0x1be   : > { %v1544_v52 = vmax.f32 %v946_v54, 0.0  ;;  %v1541_v18 = vmax.f32 %v1270_v45, 0.0  ;;  %v5064_v45 = vld [vmem:[%s7574_s3 + $0x84] sm:$0xf] }
 0x1bf   : > { %4812 = vmatmul.msk.bf16.gmra.mxu0 %vm491_vm0, %v435_v37  ;;  %4876 = vmatmul.msk.bf16.gmra.mxu1 %vm491_vm0, %v435_v37  ;;  %v1415_v19 = vmax.f32 %v1113_v25, 0.0  ;;  %v1414_v10 = vmax.f32 %v784_v39, 0.0  ;;  %v402_v25 = vld [vmem:[%s5327_s10 + $0x3c8] sm:$0xff] }
 0x1c0   : > { %4845 = vmatmul.msk.bf16.gmra.mxu2 %vm491_vm0, %v468_v44  ;;  %4908 = vmatmul.msk.bf16.gmra.mxu3 %vm491_vm0, %v467_v15  ;;  %v6011_v9 = vpack.c.bf16 %v1544_v52, %v1542_v13  ;;  %v6013_v48 = vpack.c.bf16 %v1541_v18, %v1539_v28  ;;  %v335_v13 = vld [vmem:[%s5327_s10 + $0x1b0] sm:$0xff]  ;;  %v336_v28 = vld [vmem:[%s5327_s10 + $0x1b8] sm:$0xff]  ;;  %v4985_v52 = vor.u32 %v5064_v45, %v4982_v59  ;;  %v401_v18 = vld [vmem:[%s5327_s10 + $0x3c0] sm:$0xff] }
 0x1c1   : > { %5084 = vmatpush.bf16.msra.mxu2 %v5438_v23  ;;  %v5065_v23 = vld [vmem:[%s7574_s3 + $0x84] sm:$0xf0] }
 0x1c2   : > { %7693 = vst [vmem:[#allocation43_spill] sm:$0xff] %v6011_v9  ;;  %v4981_v54 = vor.u32 %v5065_v23, %v4980_v36  ;;  %2918 = vmatpush.bf16.msrb.mxu1 %v4985_v52  ;;  %v436_v36 = vpack.c.bf16 %v336_v28, %v335_v13 }
 0x1c3   : > { %7694 = vst [vmem:[#allocation44_spill] sm:$0xff] %v6013_v48  ;;  %v948_v5 = vpop.f32.mrf.mxu2  ;;  %v1272_v46 = vpop.f32.mrf.mxu3 }
 0x1c4   : > { %v785_v20 = vpop.f32.mrf.mxu0  ;;  %v1114_v17 = vpop.f32.mrf.mxu1  ;;  %2260 = vmatpush.bf16.msrb.mxu3 %v4981_v54 }
 0x1c5   : > { %v786_v15 = vadd.f32 %v785_v20, %v5461_v41  ;;  %v1115_v47 = vadd.f32 %v1114_v17, %v5459_v40  ;;  %5085 = vmatpush.bf16.msra.mxu2 %v5539_v16  ;;  %v949_v20 = vadd.f32 %v948_v5, %v5461_v41  ;;  %v1273_v17 = vadd.f32 %v1272_v46, %v5459_v40  ;;  %v4918_v5 = vld [vmem:[%s7574_s3 + $0x8] sm:$0xf0] }
 0x1c7   : > { %v1416_v27 = vmax.f32 %v786_v15, 0.0  ;;  %v1417_v37 = vmax.f32 %v1115_v47, 0.0 }
 0x1c9   : > { %v6037_v39 = vpack.c.bf16 %v1416_v27, %v1414_v10  ;;  %v6039_v16 = vpack.c.bf16 %v1417_v37, %v1415_v19  ;;  %5086 = vmatpush.bf16.msra.mxu2 %v5662_v51  ;;  %v469_v10 = vpack.c.bf16 %v402_v25, %v401_v18  ;;  %v1546_v27 = vmax.f32 %v949_v20, 0.0  ;;  %v5048_v51 = vld [vmem:[%s7574_s3 + $0x4] sm:$0xf] }
 0x1ca   : > { %v1543_v19 = vmax.f32 %v1273_v17, 0.0  ;;  %v4921_v46 = vor.u32 %v5048_v51, %v4918_v5 }
 0x1cb   : > { %v950_v15 = vpop.f32.mrf.mxu2  ;;  %v1274_v47 = vpop.f32.mrf.mxu3 }
 0x1cc   : > { %v951_v23 = vadd.f32 %v950_v15, %v5461_v41  ;;  %v1275_v45 = vadd.f32 %v1274_v47, %v5459_v40  ;;  %v788_v59 = vpop.f32.mrf.mxu0  ;;  %v1117_v54 = vpop.f32.mrf.mxu1  ;;  %2589 = vmatpush.bf16.msrb.mxu0 %v4921_v46 }
 0x1cd   : > { %5087 = vmatpush.bf16.msra.mxu2 %v5785_v31  ;;  %v1118_v28 = vadd.f32 %v1117_v54, %v5459_v40  ;;  %v789_v52 = vadd.f32 %v788_v59, %v5461_v41  ;;  %v338_v54 = vld [vmem:[%s5327_s10 + $0x1c8] sm:$0xff] }
 0x1ce   : > { %v1548_v37 = vmax.f32 %v951_v23, 0.0  ;;  %v1545_v9 = vmax.f32 %v1275_v45, 0.0  ;;  %v337_v45 = vld [vmem:[%s5327_s10 + $0x1c0] sm:$0xff] }
 0x1cf   : > { %4813 = vmatmul.msk.bf16.gmra.mxu0 %vm491_vm0, %v436_v36  ;;  %4877 = vmatmul.msk.bf16.gmra.mxu1 %vm491_vm0, %v436_v36  ;;  %v1419_v17 = vmax.f32 %v1118_v28, 0.0  ;;  %v1418_v47 = vmax.f32 %v789_v52, 0.0 }
 0x1d0   : > { %4846 = vmatmul.msk.bf16.gmra.mxu2 %vm491_vm0, %v469_v10  ;;  %4909 = vmatmul.msk.bf16.gmra.mxu3 %vm491_vm0, %v468_v44  ;;  %v6057_v13 = vpack.c.bf16 %v1548_v37, %v1546_v27  ;;  %v6059_v31 = vpack.c.bf16 %v1545_v9, %v1543_v19  ;;  %v403_v27 = vld [vmem:[%s5327_s10 + $0x3d0] sm:$0xff] }
 0x1d1   : > { %5088 = vmatpush.bf16.msra.mxu2 %v5926_v14  ;;  %v404_v14 = vld [vmem:[%s5327_s10 + $0x3d8] sm:$0xff] }
 0x1d2   : > { %7695 = vst [vmem:[#allocation45_spill] sm:$0xff] %v6057_v13 }
 0x1d3   : > { %7696 = vst [vmem:[#allocation46_spill] sm:$0xff] %v6059_v31  ;;  %v953_v18 = vpop.f32.mrf.mxu2  ;;  %v1277_v25 = vpop.f32.mrf.mxu3 }
 0x1d4   : > { %v790_v20 = vpop.f32.mrf.mxu0  ;;  %v1119_v44 = vpop.f32.mrf.mxu1  ;;  %v954_v37 = vadd.f32 %v953_v18, %v5461_v41  ;;  %v1278_v51 = vadd.f32 %v1277_v25, %v5459_v40 }
 0x1d5   : > { %v791_v15 = vadd.f32 %v790_v20, %v5461_v41  ;;  %v1120_v9 = vadd.f32 %v1119_v44, %v5459_v40  ;;  %5089 = vmatpush.bf16.msra.mxu2 %v4921_v46  ;;  %v437_v20 = vpack.c.bf16 %v338_v54, %v337_v45 }
 0x1d6   : > { %v1550_v13 = vmax.f32 %v954_v37, 0.0  ;;  %v1547_v31 = vmax.f32 %v1278_v51, 0.0 }
 0x1d7   : > { %v1420_v36 = vmax.f32 %v791_v15, 0.0  ;;  %v1421_v23 = vmax.f32 %v1120_v9, 0.0  ;;  %v470_v9 = vpack.c.bf16 %v404_v14, %v403_v27 }
 0x1d9   : > { %v6070_v19 = vpack.c.bf16 %v1420_v36, %v1418_v47  ;;  %v6072_v59 = vpack.c.bf16 %v1421_v23, %v1419_v17 }
 0x1db   : > { %7697 = vst [vmem:[#allocation47_spill] sm:$0xff] %v6072_v59  ;;  %v955_v5 = vpop.f32.mrf.mxu2  ;;  %v1279_v28 = vpop.f32.mrf.mxu3 }
 0x1dc   : > { %v956_v46 = vadd.f32 %v955_v5, %v5461_v41  ;;  %v1280_v52 = vadd.f32 %v1279_v28, %v5459_v40  ;;  %v793_v44 = vpop.f32.mrf.mxu0  ;;  %v1122_v15 = vpop.f32.mrf.mxu1 }
 0x1dd   : > { %v1123_v17 = vadd.f32 %v1122_v15, %v5459_v40  ;;  %v794_v23 = vadd.f32 %v793_v44, %v5461_v41 }
 0x1de   : > { %v1552_v47 = vmax.f32 %v956_v46, 0.0  ;;  %v1549_v36 = vmax.f32 %v1280_v52, 0.0  ;;  %v405_v46 = vld [vmem:[%s5327_s10 + $0x3e0] sm:$0xff]  ;;  %v406_v52 = vld [vmem:[%s5327_s10 + $0x3e8] sm:$0xff] }
 0x1df   : > { %4814 = vmatmul.msk.bf16.gmra.mxu0 %vm491_vm0, %v437_v20  ;;  %4878 = vmatmul.msk.bf16.gmra.mxu1 %vm491_vm0, %v437_v20  ;;  %v1423_v37 = vmax.f32 %v1123_v17, 0.0  ;;  %v1422_v5 = vmax.f32 %v794_v23, 0.0  ;;  %v339_v20 = vld [vmem:[%s5327_s10 + $0x1d0] sm:$0xff] }
 0x1e0   : > { %4847 = vmatmul.msk.bf16.gmra.mxu2 %vm491_vm0, %v470_v9  ;;  %4910 = vmatmul.msk.bf16.gmra.mxu3 %vm491_vm0, %v469_v10  ;;  %v6082_v18 = vpack.c.bf16 %v1552_v47, %v1550_v13  ;;  %v6084_v25 = vpack.c.bf16 %v1549_v36, %v1547_v31  ;;  %v340_v31 = vld [vmem:[%s5327_s10 + $0x1d8] sm:$0xff] }
 0x1e2   : > { %7698 = vst [vmem:[#allocation48_spill] sm:$0xff] %v6082_v18 }
 0x1e3   : > { %7699 = vst [vmem:[#allocation49_spill] sm:$0xff] %v6084_v25  ;;  %v958_v45 = vpop.f32.mrf.mxu2  ;;  %v1282_v54 = vpop.f32.mrf.mxu3  ;;  %v471_v25 = vpack.c.bf16 %v406_v52, %v405_v46 }
 0x1e4   : > { %v795_v27 = vpop.f32.mrf.mxu0  ;;  %v1124_v14 = vpop.f32.mrf.mxu1  ;;  %v959_v44 = vadd.f32 %v958_v45, %v5461_v41  ;;  %v1283_v36 = vadd.f32 %v1282_v54, %v5459_v40 }
 0x1e5   : > { %v796_v51 = vadd.f32 %v795_v27, %v5461_v41  ;;  %v1125_v10 = vadd.f32 %v1124_v14, %v5459_v40  ;;  %v438_v27 = vpack.c.bf16 %v340_v31, %v339_v20 }
 0x1e6   : > { %v1554_v48 = vmax.f32 %v959_v44, 0.0  ;;  %v1551_v59 = vmax.f32 %v1283_v36, 0.0 }
 0x1e7   : > { %v1424_v13 = vmax.f32 %v796_v51, 0.0  ;;  %v1425_v28 = vmax.f32 %v1125_v10, 0.0 }
 0x1e9   : > { %v6094_v47 = vpack.c.bf16 %v1424_v13, %v1422_v5  ;;  %v6096_v15 = vpack.c.bf16 %v1425_v28, %v1423_v37 }
 0x1eb   : > { %7700 = vst [vmem:[#allocation50_spill] sm:$0xff] %v6094_v47  ;;  %v960_v17 = vpop.f32.mrf.mxu2  ;;  %v1284_v18 = vpop.f32.mrf.mxu3 }
 0x1ec   : > { %7701 = vst [vmem:[#allocation51_spill] sm:$0xff] %v6096_v15  ;;  %v961_v14 = vadd.f32 %v960_v17, %v5461_v41  ;;  %v1285_v23 = vadd.f32 %v1284_v18, %v5459_v40  ;;  %v798_v51 = vpop.f32.mrf.mxu0  ;;  %v1127_v10 = vpop.f32.mrf.mxu1 }
 0x1ed   : > { %v1128_v54 = vadd.f32 %v1127_v10, %v5459_v40  ;;  %v799_v37 = vadd.f32 %v798_v51, %v5461_v41 }
 0x1ee   : > { %v1556_v5 = vmax.f32 %v961_v14, 0.0  ;;  %v1553_v13 = vmax.f32 %v1285_v23, 0.0  ;;  %v407_v14 = vld [vmem:[%s5327_s10 + $0x3f0] sm:$0xff]  ;;  %v408_v23 = vld [vmem:[%s5327_s10 + $0x3f8] sm:$0xff] }
 0x1ef   : > { %4815 = vmatmul.msk.bf16.gmra.mxu0 %vm491_vm0, %v438_v27  ;;  %4879 = vmatmul.msk.bf16.gmra.mxu1 %vm491_vm0, %v438_v27  ;;  %v1427_v52 = vmax.f32 %v1128_v54, 0.0  ;;  %v1426_v36 = vmax.f32 %v799_v37, 0.0  ;;  %v341_v27 = vld [vmem:[%s5327_s10 + $0x1e0] sm:$0xff] }
 0x1f0   : > { %4848 = vmatmul.msk.bf16.gmra.mxu2 %vm491_vm0, %v471_v25  ;;  %4911 = vmatmul.msk.bf16.gmra.mxu3 %vm491_vm0, %v470_v9  ;;  %v6106_v45 = vpack.c.bf16 %v1556_v5, %v1554_v48  ;;  %v6108_v18 = vpack.c.bf16 %v1553_v13, %v1551_v59  ;;  %v342_v59 = vld [vmem:[%s5327_s10 + $0x1e8] sm:$0xff] }
 0x1f2   : > { %7702 = vst [vmem:[#allocation52_spill] sm:$0xff] %v6106_v45 }
 0x1f3   : > { %7703 = vst [vmem:[#allocation53_spill] sm:$0xff] %v6108_v18  ;;  %v963_v28 = vpop.f32.mrf.mxu2  ;;  %v1287_v20 = vpop.f32.mrf.mxu3  ;;  %v472_v18 = vpack.c.bf16 %v408_v23, %v407_v14 }
 0x1f4   : > { %v800_v31 = vpop.f32.mrf.mxu0  ;;  %v1129_v46 = vpop.f32.mrf.mxu1  ;;  %v964_v51 = vadd.f32 %v963_v28, %v5461_v41  ;;  %v1288_v13 = vadd.f32 %v1287_v20, %v5459_v40 }
 0x1f5   : > { %v801_v44 = vadd.f32 %v800_v31, %v5461_v41  ;;  %v1130_v9 = vadd.f32 %v1129_v46, %v5459_v40  ;;  %v439_v31 = vpack.c.bf16 %v342_v59, %v341_v27 }
 0x1f6   : > { %v1558_v15 = vmax.f32 %v964_v51, 0.0  ;;  %v1555_v47 = vmax.f32 %v1288_v13, 0.0 }
 0x1f7   : > { %v1428_v48 = vmax.f32 %v801_v44, 0.0  ;;  %v1429_v17 = vmax.f32 %v1130_v9, 0.0 }
 0x1f9   : > { %v6118_v5 = vpack.c.bf16 %v1428_v48, %v1426_v36  ;;  %v6120_v10 = vpack.c.bf16 %v1429_v17, %v1427_v52 }
 0x1fb   : > { %v965_v54 = vpop.f32.mrf.mxu2  ;;  %v1289_v45 = vpop.f32.mrf.mxu3 }
 0x1fc   : > { %v966_v46 = vadd.f32 %v965_v54, %v5461_v41  ;;  %v1290_v37 = vadd.f32 %v1289_v45, %v5459_v40  ;;  %v803_v44 = vpop.f32.mrf.mxu0  ;;  %v1132_v9 = vpop.f32.mrf.mxu1 }
 0x1fd   : > { %v1133_v20 = vadd.f32 %v1132_v9, %v5459_v40  ;;  %v804_v52 = vadd.f32 %v803_v44, %v5461_v41 }
 0x1fe   : > { %v1560_v36 = vmax.f32 %v966_v46, 0.0  ;;  %v1557_v48 = vmax.f32 %v1290_v37, 0.0  ;;  %v344_v46 = vld [vmem:[%s5327_s10 + $0x1f8] sm:$0xff] }
 0x1ff   : > { %4816 = vmatmul.msk.bf16.gmra.mxu0 %vm491_vm0, %v439_v31  ;;  %4880 = vmatmul.msk.bf16.gmra.mxu1 %vm491_vm0, %v439_v31  ;;  %v1431_v23 = vmax.f32 %v1133_v20, 0.0  ;;  %v1430_v54 = vmax.f32 %v804_v52, 0.0 }
 0x200   : > { %4849 = vmatmul.msk.bf16.gmra.mxu2 %vm491_vm0, %v472_v18  ;;  %4912 = vmatmul.msk.bf16.gmra.mxu3 %vm491_vm0, %v471_v25  ;;  %v6130_v28 = vpack.c.bf16 %v1560_v36, %v1558_v15  ;;  %v6132_v45 = vpack.c.bf16 %v1557_v48, %v1555_v47  ;;  %v343_v15 = vld [vmem:[%s5327_s10 + $0x1f0] sm:$0xff]  ;;  %s5145_s10 = scalar_lea.hbm %s5144_s14, 8 }
 0x201   : > { %v440_v20 = vpack.c.bf16 %v344_v46, %v343_v15  ;;  %p5146_p11 = scmp.ne.s32.totalorder %s5144_s14, %s5145_s10  ;;  %p5151_p1 = scmp.lt.s32.totalorder %s5149_s17, %s5145_s10 }
 0x202   : > { %7704 = vst [vmem:[#allocation54_spill] sm:$0xff] %v6130_v28 }
 0x203   : > { %7705 = vst [vmem:[#allocation55_spill] sm:$0xff] %v6132_v45  ;;  %v968_v17 = vpop.f32.mrf.mxu2  ;;  %v1292_v27 = vpop.f32.mrf.mxu3  ;;  %p5147_p12 = pnand %p5146_p11, %p5274_p5  ;;  %p5152_p2 = por %p5151_p1, %p5150_p0 }
 0x204   : > { %v805_v59 = vpop.f32.mrf.mxu0  ;;  %v1134_v14 = vpop.f32.mrf.mxu1  ;;  %v969_v44 = vadd.f32 %v968_v17, %v5461_v41  ;;  %v1293_v9 = vadd.f32 %v1292_v27, %v5459_v40 }
 0x205   : > { %v806_v51 = vadd.f32 %v805_v59, %v5461_v41  ;;  %v1135_v13 = vadd.f32 %v1134_v14, %v5459_v40  ;;  %p5148_p13 = pneg %p5147_p12 }
 0x206   : > { %v1559_v28 = vmax.f32 %v1293_v9, 0.0 }
 0x207   : > { %v1432_v25 = vmax.f32 %v806_v51, 0.0  ;;  %v1433_v31 = vmax.f32 %v1135_v13, 0.0  ;;  %v1562_v13 = vmax.f32 %v969_v44, 0.0  ;;  %p5153_p3 = pnand %p5152_p2, %p5148_p13 }
 0x209   : > { %v6140_v47 = vpack.c.bf16 %v1432_v25, %v1430_v54  ;;  %v6142_v37 = vpack.c.bf16 %v1433_v31, %v1431_v23 }
 0x20b   : > { %v970_v36 = vpop.f32.mrf.mxu2  ;;  %v1294_v48 = vpop.f32.mrf.mxu3 }
 0x20c   : > { %v971_v59 = vadd.f32 %v970_v36, %v5461_v41  ;;  %v1295_v14 = vadd.f32 %v1294_v48, %v5459_v40  ;;  %v808_v52 = vpop.f32.mrf.mxu0  ;;  %v1137_v51 = vpop.f32.mrf.mxu1 }
 0x20d   : > { %v1138_v23 = vadd.f32 %v1137_v51, %v5459_v40  ;;  %v809_v25 = vadd.f32 %v808_v52, %v5461_v41 }
 0x20e   : > { %v1564_v45 = vmax.f32 %v971_v59, 0.0  ;;  %v1561_v54 = vmax.f32 %v1295_v14, 0.0 }
 0x20f   : > { %4817 = vmatmul.msk.bf16.gmra.mxu0 %vm491_vm0, %v440_v20  ;;  %4881 = vmatmul.msk.bf16.gmra.mxu1 %vm491_vm0, %v440_v20  ;;  %v1435_v9 = vmax.f32 %v1138_v23, 0.0 }
 0x210   : > { %4913 = vmatmul.msk.bf16.gmra.mxu3 %vm491_vm0, %v472_v18  ;;  %1932 = vmatmul.bf16.vlgmr.msrb.gmra.mxu2 %v5473_v57  ;;  %v6152_v17 = vpack.c.bf16 %v1564_v45, %v1562_v13  ;;  %v6154_v27 = vpack.c.bf16 %v1561_v54, %v1559_v28  ;;  %v1434_v18 = vmax.f32 %v809_v25, 0.0 }
 0x212   : > { %7706 = vst [vmem:[#allocation56_spill] sm:$0xff] %v6152_v17 }
 0x213   : > { %7707 = vst [vmem:[#allocation57_spill] sm:$0xff] %v6154_v27  ;;  %v973_v31 = vpop.f32.mrf.mxu2  ;;  %v1297_v15 = vpop.f32.mrf.mxu3 }
 0x214   : > { %v810_v46 = vpop.f32.mrf.mxu0  ;;  %v1139_v44 = vpop.f32.mrf.mxu1  ;;  %v974_v14 = vadd.f32 %v973_v31, %v5461_v41  ;;  %v1298_v52 = vadd.f32 %v1297_v15, %v5459_v40 }
 0x215   : > { %v811_v36 = vadd.f32 %v810_v46, %v5461_v41  ;;  %v1140_v48 = vadd.f32 %v1139_v44, %v5459_v40 }
 0x216   : > { %v1566_v44 = vmax.f32 %v974_v14, 0.0  ;;  %v1563_v25 = vmax.f32 %v1298_v52, 0.0 }
 0x217   : > { %v1436_v20 = vmax.f32 %v811_v36, 0.0  ;;  %v1437_v59 = vmax.f32 %v1140_v48, 0.0 }
 0x219   : > { %v6160_v45 = vpack.c.bf16 %v1436_v20, %v1434_v18  ;;  %v6162_v28 = vpack.c.bf16 %v1437_v59, %v1435_v9 }
 0x21b   : > { %v975_v51 = vpop.f32.mrf.mxu2  ;;  %v1299_v13 = vpop.f32.mrf.mxu3 }
 0x21c   : > { %v976_v54 = vadd.f32 %v975_v51, %v5461_v41  ;;  %v1300_v23 = vadd.f32 %v1299_v13, %v5459_v40  ;;  %v813_v46 = vpop.f32.mrf.mxu0  ;;  %v1142_v17 = vpop.f32.mrf.mxu1 }
 0x21d   : > { %v1143_v9 = vadd.f32 %v1142_v17, %v5459_v40  ;;  %v814_v18 = vadd.f32 %v813_v46, %v5461_v41 }
 0x21e   : > { %v1568_v36 = vmax.f32 %v976_v54, 0.0  ;;  %v1565_v48 = vmax.f32 %v1300_v23, 0.0 }
 0x21f   : > { %4818 = vmatmul.msk.bf16.gmra.mxu0 %vm491_vm0, %v5335_v26  ;;  %2919 = vmatmul.bf16.vlgmr.msrb.gmra.mxu1 %v5475_v58  ;;  %v1439_v51 = vmax.f32 %v1143_v9, 0.0  ;;  %v1438_v54 = vmax.f32 %v814_v18, 0.0  ;;  %vm4680_vm0 = vcmask 1041409  }
 0x220   : > { %1937 = vmatmul.bf16.gmra.mxu2 %v5501_v34  ;;  %2261 = vmatmul.bf16.vlgmr.msrb.gmra.mxu3 %v5475_v58  ;;  %v6173_v31 = vpack.c.bf16 %v1568_v36, %v1566_v44  ;;  %v6175_v15 = vpack.c.bf16 %v1565_v48, %v1563_v25 }
 0x222   : > { %7708 = vst [vmem:[#allocation58_spill] sm:$0xff] %v6173_v31 }
 0x223   : > { %7709 = vst [vmem:[#allocation59_spill] sm:$0xff] %v6175_v15  ;;  %v978_v20 = vpop.f32.mrf.mxu2  ;;  %v1302_v59 = vpop.f32.mrf.mxu3 }
 0x224   : > { %v815_v14 = vpop.f32.mrf.mxu0  ;;  %v1144_v52 = vpop.f32.mrf.mxu1  ;;  %v979_v17 = vadd.f32 %v978_v20, %v5461_v41  ;;  %v1303_v46 = vadd.f32 %v1302_v59, %v5459_v40 }
 0x225   : > { %v816_v26 = vadd.f32 %v815_v14, %v5461_v41  ;;  %v1145_v13 = vadd.f32 %v1144_v52, %v5459_v40 }
 0x226   : > { %v1570_v52 = vmax.f32 %v979_v17, 0.0  ;;  %v1567_v18 = vmax.f32 %v1303_v46, 0.0 }
 0x227   : > { %v1440_v23 = vmax.f32 %v816_v26, 0.0  ;;  %v1441_v58 = vmax.f32 %v1145_v13, 0.0 }
 0x229   : > { %v6181_v44 = vpack.c.bf16 %v1440_v23, %v1438_v54  ;;  %v6183_v25 = vpack.c.bf16 %v1441_v58, %v1439_v51 }
 0x22b   : > { %v980_v36 = vpop.f32.mrf.mxu2  ;;  %v1304_v48 = vpop.f32.mrf.mxu3 }
 0x22c   : > { %v981_v31 = vadd.f32 %v980_v36, %v5461_v41  ;;  %v1305_v9 = vadd.f32 %v1304_v48, %v5459_v40  ;;  %v818_v14 = vpop.f32.mrf.mxu0  ;;  %v1147_v15 = vpop.f32.mrf.mxu1 }
 0x22d   : > { %v1148_v51 = vadd.f32 %v1147_v15, %v5459_v40  ;;  %v819_v54 = vadd.f32 %v818_v14, %v5461_v41 }
 0x22e   : > { %v1572_v26 = vmax.f32 %v981_v31, 0.0  ;;  %v1569_v13 = vmax.f32 %v1305_v9, 0.0 }
 0x22f   : > { %2590 = vmatmul.bf16.vlgmr.msrb.gmra.mxu0 %v5473_v57  ;;  %2924 = vmatmul.bf16.gmra.mxu1 %v5503_v35  ;;  %v1443_v46 = vmax.f32 %v1148_v51, 0.0  ;;  %v1442_v48 = vmax.f32 %v819_v54, 0.0 }
 0x230   : > { %1942 = vmatmul.bf16.gmra.mxu2 %v5549_v22  ;;  %2266 = vmatmul.bf16.gmra.mxu3 %v5503_v35  ;;  %v6193_v20 = vpack.c.bf16 %v1572_v26, %v1570_v52  ;;  %v6195_v59 = vpack.c.bf16 %v1569_v13, %v1567_v18 }
 0x232   : > { %7710 = vst [vmem:[#allocation60_spill] sm:$0xff] %v6193_v20 }
 0x233   : > { %7711 = vst [vmem:[#allocation61_spill] sm:$0xff] %v6195_v59  ;;  %v983_v23 = vpop.f32.mrf.mxu2  ;;  %v1307_v58 = vpop.f32.mrf.mxu3 }
 0x234   : > { %v820_v31 = vpop.f32.mrf.mxu0  ;;  %v1149_v17 = vpop.f32.mrf.mxu1  ;;  %v984_v15 = vadd.f32 %v983_v23, %v5461_v41  ;;  %v1308_v14 = vadd.f32 %v1307_v58, %v5459_v40 }
 0x235   : > { %v821_v57 = vadd.f32 %v820_v31, %v5461_v41  ;;  %v1150_v36 = vadd.f32 %v1149_v17, %v5459_v40 }
 0x236   : > { %v1574_v17 = vmax.f32 %v984_v15, 0.0  ;;  %v1571_v54 = vmax.f32 %v1308_v14, 0.0 }
 0x237   : > { %v1444_v9 = vmax.f32 %v821_v57, 0.0  ;;  %v1445_v35 = vmax.f32 %v1150_v36, 0.0 }
 0x239   : > { %v6201_v52 = vpack.c.bf16 %v1444_v9, %v1442_v48  ;;  %v6203_v18 = vpack.c.bf16 %v1445_v35, %v1443_v46 }
 0x23b   : > { %v985_v26 = vpop.f32.mrf.mxu2  ;;  %v1309_v13 = vpop.f32.mrf.mxu3 }
 0x23c   : > { %v986_v20 = vadd.f32 %v985_v26, %v5461_v41  ;;  %v1310_v51 = vadd.f32 %v1309_v13, %v5459_v40  ;;  %v823_v31 = vpop.f32.mrf.mxu0  ;;  %v1152_v59 = vpop.f32.mrf.mxu1 }
 0x23d   : > { %v1153_v46 = vadd.f32 %v1152_v59, %v5459_v40  ;;  %v824_v48 = vadd.f32 %v823_v31, %v5461_v41 }
 0x23e   : > { %v1576_v57 = vmax.f32 %v986_v20, 0.0  ;;  %v1573_v36 = vmax.f32 %v1310_v51, 0.0 }
 0x23f   : > { %2595 = vmatmul.bf16.gmra.mxu0 %v5501_v34  ;;  %2929 = vmatmul.bf16.gmra.mxu1 %v5551_v24  ;;  %v1447_v14 = vmax.f32 %v1153_v46, 0.0  ;;  %v1446_v13 = vmax.f32 %v824_v48, 0.0 }
 0x240   : > { %1947 = vmatmul.bf16.gmra.mxu2 %v5574_v3  ;;  %2271 = vmatmul.bf16.gmra.mxu3 %v5551_v24  ;;  %v6213_v23 = vpack.c.bf16 %v1576_v57, %v1574_v17  ;;  %v6215_v58 = vpack.c.bf16 %v1573_v36, %v1571_v54 }
 0x242   : > { %7712 = vst [vmem:[#allocation62_spill] sm:$0xff] %v6213_v23 }
 0x243   : > { %7713 = vst [vmem:[#allocation63_spill] sm:$0xff] %v6215_v58  ;;  %v988_v9 = vpop.f32.mrf.mxu2  ;;  %v1312_v35 = vpop.f32.mrf.mxu3 }
 0x244   : > { %v825_v20 = vpop.f32.mrf.mxu0  ;;  %v1154_v15 = vpop.f32.mrf.mxu1  ;;  %v989_v59 = vadd.f32 %v988_v9, %v5461_v41  ;;  %v1313_v31 = vadd.f32 %v1312_v35, %v5459_v40 }
 0x245   : > { %v826_v34 = vadd.f32 %v825_v20, %v5461_v41  ;;  %v1155_v26 = vadd.f32 %v1154_v15, %v5459_v40 }
 0x246   : > { %v1578_v15 = vmax.f32 %v989_v59, 0.0  ;;  %v1575_v48 = vmax.f32 %v1313_v31, 0.0 }
 0x247   : > { %v1448_v51 = vmax.f32 %v826_v34, 0.0  ;;  %v1449_v24 = vmax.f32 %v1155_v26, 0.0 }
 0x249   : > { %v6221_v17 = vpack.c.bf16 %v1448_v51, %v1446_v13  ;;  %v6223_v54 = vpack.c.bf16 %v1449_v24, %v1447_v14 }
 0x24b   : > { %v990_v57 = vpop.f32.mrf.mxu2  ;;  %v1314_v36 = vpop.f32.mrf.mxu3 }
 0x24c   : > { %v991_v23 = vadd.f32 %v990_v57, %v5461_v41  ;;  %v1315_v46 = vadd.f32 %v1314_v36, %v5459_v40  ;;  %v828_v20 = vpop.f32.mrf.mxu0  ;;  %v1157_v58 = vpop.f32.mrf.mxu1 }
 0x24d   : > { %v1158_v14 = vadd.f32 %v1157_v58, %v5459_v40  ;;  %v829_v13 = vadd.f32 %v828_v20, %v5461_v41 }
 0x24e   : > { %v1580_v34 = vmax.f32 %v991_v23, 0.0  ;;  %v1577_v26 = vmax.f32 %v1315_v46, 0.0 }
 0x24f   : > { %2600 = vmatmul.bf16.gmra.mxu0 %v5549_v22  ;;  %2934 = vmatmul.bf16.gmra.mxu1 %v5576_v4  ;;  %v1451_v31 = vmax.f32 %v1158_v14, 0.0  ;;  %v1450_v36 = vmax.f32 %v829_v13, 0.0 }
 0x250   : > { %1952 = vmatmul.bf16.gmra.mxu2 %v5598_v53  ;;  %2276 = vmatmul.bf16.gmra.mxu3 %v5576_v4  ;;  %v6233_v9 = vpack.c.bf16 %v1580_v34, %v1578_v15  ;;  %v6235_v35 = vpack.c.bf16 %v1577_v26, %v1575_v48 }
 0x252   : > { %7714 = vst [vmem:[#allocation64_spill] sm:$0xff] %v6233_v9 }
 0x253   : > { %7715 = vst [vmem:[#allocation65_spill] sm:$0xff] %v6235_v35  ;;  %v993_v51 = vpop.f32.mrf.mxu2  ;;  %v1317_v24 = vpop.f32.mrf.mxu3 }
 0x254   : > { %v830_v23 = vpop.f32.mrf.mxu0  ;;  %v1159_v59 = vpop.f32.mrf.mxu1  ;;  %v994_v58 = vadd.f32 %v993_v51, %v5461_v41  ;;  %v1318_v20 = vadd.f32 %v1317_v24, %v5459_v40 }
 0x255   : > { %v831_v22 = vadd.f32 %v830_v23, %v5461_v41  ;;  %v1160_v57 = vadd.f32 %v1159_v59, %v5459_v40 }
 0x256   : > { %v1582_v59 = vmax.f32 %v994_v58, 0.0  ;;  %v1579_v13 = vmax.f32 %v1318_v20, 0.0 }
 0x257   : > { %v1452_v46 = vmax.f32 %v831_v22, 0.0  ;;  %v1453_v4 = vmax.f32 %v1160_v57, 0.0 }
 0x259   : > { %v6241_v15 = vpack.c.bf16 %v1452_v46, %v1450_v36  ;;  %v6243_v48 = vpack.c.bf16 %v1453_v4, %v1451_v31 }
 0x25b   : > { %v995_v34 = vpop.f32.mrf.mxu2  ;;  %v1319_v26 = vpop.f32.mrf.mxu3 }
 0x25c   : > { %v996_v9 = vadd.f32 %v995_v34, %v5461_v41  ;;  %v1320_v14 = vadd.f32 %v1319_v26, %v5459_v40  ;;  %v833_v23 = vpop.f32.mrf.mxu0  ;;  %v1162_v35 = vpop.f32.mrf.mxu1 }
 0x25d   : > { %v1163_v31 = vadd.f32 %v1162_v35, %v5459_v40  ;;  %v834_v36 = vadd.f32 %v833_v23, %v5461_v41 }
 0x25e   : > { %v1584_v22 = vmax.f32 %v996_v9, 0.0  ;;  %v1581_v57 = vmax.f32 %v1320_v14, 0.0 }
 0x25f   : > { %2605 = vmatmul.bf16.gmra.mxu0 %v5574_v3  ;;  %2939 = vmatmul.bf16.gmra.mxu1 %v5600_v56  ;;  %v1455_v20 = vmax.f32 %v1163_v31, 0.0  ;;  %v1454_v26 = vmax.f32 %v834_v36, 0.0 }
 0x260   : > { %1957 = vmatmul.bf16.gmra.mxu2 %v5628_v49  ;;  %2281 = vmatmul.bf16.gmra.mxu3 %v5600_v56  ;;  %v6253_v51 = vpack.c.bf16 %v1584_v22, %v1582_v59  ;;  %v6255_v24 = vpack.c.bf16 %v1581_v57, %v1579_v13 }
 0x262   : > { %7716 = vst [vmem:[#allocation66_spill] sm:$0xff] %v6253_v51 }
 0x263   : > { %7717 = vst [vmem:[#allocation67_spill] sm:$0xff] %v6255_v24  ;;  %v998_v46 = vpop.f32.mrf.mxu2  ;;  %v1322_v4 = vpop.f32.mrf.mxu3 }
 0x264   : > { %v835_v9 = vpop.f32.mrf.mxu0  ;;  %v1164_v58 = vpop.f32.mrf.mxu1  ;;  %v999_v35 = vadd.f32 %v998_v46, %v5461_v41  ;;  %v1323_v23 = vadd.f32 %v1322_v4, %v5459_v40 }
 0x265   : > { %v836_v3 = vadd.f32 %v835_v9, %v5461_v41  ;;  %v1165_v34 = vadd.f32 %v1164_v58, %v5459_v40 }
 0x266   : > { %v1586_v58 = vmax.f32 %v999_v35, 0.0  ;;  %v1583_v36 = vmax.f32 %v1323_v23, 0.0 }
 0x267   : > { %v1456_v14 = vmax.f32 %v836_v3, 0.0  ;;  %v1457_v56 = vmax.f32 %v1165_v34, 0.0 }
 0x269   : > { %v6261_v59 = vpack.c.bf16 %v1456_v14, %v1454_v26  ;;  %v6263_v13 = vpack.c.bf16 %v1457_v56, %v1455_v20 }
 0x26b   : > { %v1000_v22 = vpop.f32.mrf.mxu2  ;;  %v1324_v57 = vpop.f32.mrf.mxu3 }
 0x26c   : > { %v1001_v51 = vadd.f32 %v1000_v22, %v5461_v41  ;;  %v1325_v31 = vadd.f32 %v1324_v57, %v5459_v40  ;;  %v838_v9 = vpop.f32.mrf.mxu0  ;;  %v1167_v24 = vpop.f32.mrf.mxu1 }
 0x26d   : > { %v1168_v20 = vadd.f32 %v1167_v24, %v5459_v40  ;;  %v839_v26 = vadd.f32 %v838_v9, %v5461_v41 }
 0x26e   : > { %v1588_v3 = vmax.f32 %v1001_v51, 0.0  ;;  %v1585_v34 = vmax.f32 %v1325_v31, 0.0 }
 0x26f   : > { %2610 = vmatmul.bf16.gmra.mxu0 %v5598_v53  ;;  %2944 = vmatmul.bf16.gmra.mxu1 %v5630_v50  ;;  %v1459_v23 = vmax.f32 %v1168_v20, 0.0  ;;  %v1458_v57 = vmax.f32 %v839_v26, 0.0 }
 0x270   : > { %1962 = vmatmul.bf16.gmra.mxu2 %v5672_v62  ;;  %2286 = vmatmul.bf16.gmra.mxu3 %v5630_v50  ;;  %v6273_v46 = vpack.c.bf16 %v1588_v3, %v1586_v58  ;;  %v6275_v4 = vpack.c.bf16 %v1585_v34, %v1583_v36 }
 0x272   : > { %7718 = vst [vmem:[#allocation68_spill] sm:$0xff] %v6273_v46 }
 0x273   : > { %7719 = vst [vmem:[#allocation69_spill] sm:$0xff] %v6275_v4  ;;  %v1003_v14 = vpop.f32.mrf.mxu2  ;;  %v1327_v56 = vpop.f32.mrf.mxu3 }
 0x274   : > { %v840_v51 = vpop.f32.mrf.mxu0  ;;  %v1169_v35 = vpop.f32.mrf.mxu1  ;;  %v1004_v24 = vadd.f32 %v1003_v14, %v5461_v41  ;;  %v1328_v9 = vadd.f32 %v1327_v56, %v5459_v40 }
 0x275   : > { %v841_v53 = vadd.f32 %v840_v51, %v5461_v41  ;;  %v1170_v22 = vadd.f32 %v1169_v35, %v5459_v40 }
 0x276   : > { %v1590_v35 = vmax.f32 %v1004_v24, 0.0  ;;  %v1587_v26 = vmax.f32 %v1328_v9, 0.0 }
 0x277   : > { %v1460_v31 = vmax.f32 %v841_v53, 0.0  ;;  %v1461_v50 = vmax.f32 %v1170_v22, 0.0 }
 0x279   : > { %v6281_v58 = vpack.c.bf16 %v1460_v31, %v1458_v57  ;;  %v6283_v36 = vpack.c.bf16 %v1461_v50, %v1459_v23 }
 0x27b   : > { %7720 = vst [vmem:[#allocation70_spill] sm:$0xff] %v6283_v36  ;;  %v1005_v3 = vpop.f32.mrf.mxu2  ;;  %v1329_v34 = vpop.f32.mrf.mxu3 }
 0x27c   : > { %v1006_v46 = vadd.f32 %v1005_v3, %v5461_v41  ;;  %v1330_v20 = vadd.f32 %v1329_v34, %v5459_v40  ;;  %v843_v51 = vpop.f32.mrf.mxu0  ;;  %v1172_v4 = vpop.f32.mrf.mxu1 }
 0x27d   : > { %v1173_v23 = vadd.f32 %v1172_v4, %v5459_v40  ;;  %v844_v57 = vadd.f32 %v843_v51, %v5461_v41 }
 0x27e   : > { %v1592_v53 = vmax.f32 %v1006_v46, 0.0  ;;  %v1589_v22 = vmax.f32 %v1330_v20, 0.0 }
 0x27f   : > { %2615 = vmatmul.bf16.gmra.mxu0 %v5628_v49  ;;  %2949 = vmatmul.bf16.gmra.mxu1 %v5674_v63  ;;  %v1463_v9 = vmax.f32 %v1173_v23, 0.0  ;;  %v1462_v34 = vmax.f32 %v844_v57, 0.0 }
 0x280   : > { %1967 = vmatmul.bf16.gmra.mxu2 %v5697_v6  ;;  %2291 = vmatmul.bf16.gmra.mxu3 %v5674_v63  ;;  %v6293_v14 = vpack.c.bf16 %v1592_v53, %v1590_v35  ;;  %v6295_v56 = vpack.c.bf16 %v1589_v22, %v1587_v26 }
 0x282   : > { %7721 = vst [vmem:[#allocation71_spill] sm:$0xff] %v6293_v14 }
 0x283   : > { %7722 = vst [vmem:[#allocation72_spill] sm:$0xff] %v6295_v56  ;;  %v1008_v31 = vpop.f32.mrf.mxu2  ;;  %v1332_v50 = vpop.f32.mrf.mxu3 }
 0x284   : > { %v845_v46 = vpop.f32.mrf.mxu0  ;;  %v1174_v24 = vpop.f32.mrf.mxu1  ;;  %v1009_v4 = vadd.f32 %v1008_v31, %v5461_v41  ;;  %v1333_v51 = vadd.f32 %v1332_v50, %v5459_v40 }
 0x285   : > { %v846_v49 = vadd.f32 %v845_v46, %v5461_v41  ;;  %v1175_v3 = vadd.f32 %v1174_v24, %v5459_v40 }
 0x286   : > { %v1594_v24 = vmax.f32 %v1009_v4, 0.0  ;;  %v1591_v57 = vmax.f32 %v1333_v51, 0.0 }
 0x287   : > { %v1464_v20 = vmax.f32 %v846_v49, 0.0  ;;  %v1465_v63 = vmax.f32 %v1175_v3, 0.0 }
 0x289   : > { %v6301_v35 = vpack.c.bf16 %v1464_v20, %v1462_v34  ;;  %v6303_v26 = vpack.c.bf16 %v1465_v63, %v1463_v9 }
 0x28b   : > { %7723 = vst [vmem:[#allocation73_spill] sm:$0xff] %v6301_v35  ;;  %v1010_v53 = vpop.f32.mrf.mxu2  ;;  %v1334_v22 = vpop.f32.mrf.mxu3 }
 0x28c   : > { %7724 = vst [vmem:[#allocation74_spill] sm:$0xff] %v6303_v26  ;;  %v1011_v14 = vadd.f32 %v1010_v53, %v5461_v41  ;;  %v1335_v23 = vadd.f32 %v1334_v22, %v5459_v40  ;;  %v848_v46 = vpop.f32.mrf.mxu0  ;;  %v1177_v56 = vpop.f32.mrf.mxu1 }
 0x28d   : > { %v1178_v9 = vadd.f32 %v1177_v56, %v5459_v40  ;;  %v849_v34 = vadd.f32 %v848_v46, %v5461_v41 }
 0x28e   : > { %v1596_v49 = vmax.f32 %v1011_v14, 0.0  ;;  %v1593_v3 = vmax.f32 %v1335_v23, 0.0 }
 0x28f   : > { %2620 = vmatmul.bf16.gmra.mxu0 %v5672_v62  ;;  %2954 = vmatmul.bf16.gmra.mxu1 %v5699_v7  ;;  %v1467_v51 = vmax.f32 %v1178_v9, 0.0  ;;  %v1466_v22 = vmax.f32 %v849_v34, 0.0 }
 0x290   : > { %1972 = vmatmul.bf16.gmra.mxu2 %v5721_v30  ;;  %2296 = vmatmul.bf16.gmra.mxu3 %v5699_v7  ;;  %v6313_v31 = vpack.c.bf16 %v1596_v49, %v1594_v24  ;;  %v6315_v50 = vpack.c.bf16 %v1593_v3, %v1591_v57 }
 0x292   : > { %7725 = vst [vmem:[#allocation75_spill] sm:$0xff] %v6313_v31 }
 0x293   : > { %7726 = vst [vmem:[#allocation76_spill] sm:$0xff] %v6315_v50  ;;  %v1337_v20 = vpop.f32.mrf.mxu3  ;;  %v1933_v63 = vpop.f32.mrf.mxu2 }
 0x294   : > { %v850_v14 = vpop.f32.mrf.mxu0  ;;  %v1179_v4 = vpop.f32.mrf.mxu1  ;;  %v1338_v56 = vadd.f32 %v1337_v20, %v5459_v40  ;;  %v1758_v20 = vld [vmem:[%s7575_s4] sm:$0x3] }
 0x295   : > { %v851_v62 = vadd.f32 %v850_v14, %v5461_v41  ;;  %v1180_v53 = vadd.f32 %v1179_v4, %v5459_v40 }
 0x296   : > { %v1595_v9 = vmax.f32 %v1338_v56, 0.0 }
 0x297   : > { %v1468_v23 = vmax.f32 %v851_v62, 0.0  ;;  %v1469_v7 = vmax.f32 %v1180_v53, 0.0  ;;  %v6337_v53 = vperm.slane %v1758_v20, 0 }
 0x299   : > { %v6321_v24 = vpack.c.bf16 %v1468_v23, %v1466_v22  ;;  %v6323_v57 = vpack.c.bf16 %v1469_v7, %v1467_v51 }
 0x29b   : > { %7727 = vst [vmem:[#allocation77_spill] sm:$0xff] %v6321_v24  ;;  %v1339_v49 = vpop.f32.mrf.mxu3  ;;  %v1935_v46 = vpop.f32.mrf.mxu2 }
 0x29c   : > { %7728 = vst [vmem:[#allocation78_spill] sm:$0xff] %v6323_v57  ;;  %v1340_v3 = vadd.f32 %v1339_v49, %v5459_v40  ;;  %v853_v31 = vpop.f32.mrf.mxu0  ;;  %v2920_v50 = vpop.f32.mrf.mxu1 }
 0x29d   : > { %v854_v40 = vadd.f32 %v853_v31, %v5461_v41 }
 0x29e   : > { %v1597_v27 = vmax.f32 %v1340_v3, 0.0 }
 0x29f   : > { %2625 = vmatmul.bf16.gmra.mxu0 %v5697_v6  ;;  %2959 = vmatmul.bf16.gmra.mxu1 %v5723_v33  ;;  %v1470_v22 = vmax.f32 %v854_v40, 0.0 }
 0x2a0   : > { %1977 = vmatmul.bf16.gmra.mxu2 %v5751_v8  ;;  %2301 = vmatmul.bf16.gmra.mxu3 %v5723_v33  ;;  %v6331_v34 = vpack.c.bf16 %v1597_v27, %v1595_v9  ;;  %v1934_v33 = vadd.f32 %v1933_v63, %v6337_v53  ;;  %v6341_v27 = vperm.slane %v1758_v20, 1 }
 0x2a2   : > { %7729 = vst [vmem:[#allocation79_spill] sm:$0xff] %v6331_v34  ;;  %v3496_v34 = vld [vmem:[%s7576_s5] sm:$0x3] }
 0x2a3   : > { %v1938_v14 = vpop.f32.mrf.mxu2  ;;  %v2262_v4 = vpop.f32.mrf.mxu3  ;;  %v6351_v63 = vperm.slane %v3496_v34, 0  ;;  %v6353_v20 = vperm.slane %v3496_v34, 1 }
 0x2a4   : > { %v855_v51 = vpop.f32.mrf.mxu0  ;;  %v2922_v62 = vpop.f32.mrf.mxu1  ;;  %v2263_v56 = vadd.f32 %v2262_v4, %v1934_v33  ;;  %v1936_v4 = vadd.f32 %v1935_v46, %v6337_v53 }
 0x2a5   : > { %v856_v6 = vadd.f32 %v855_v51, %v5461_v41 }
 0x2a6   : > { %v3240_v41 = vmax.f32 %v2263_v56, 0.0 }
 0x2a7   : > { %v1472_v23 = vmax.f32 %v856_v6, 0.0 }
 0x2a9   : > { %v6343_v7 = vpack.c.bf16 %v1472_v23, %v1470_v22 }
 0x2ab   : > { %7730 = vst [vmem:[#allocation80_spill] sm:$0xff] %v6343_v7  ;;  %v1940_v49 = vpop.f32.mrf.mxu2  ;;  %v2264_v3 = vpop.f32.mrf.mxu3 }
 0x2ac   : > { %v2591_v31 = vpop.f32.mrf.mxu0  ;;  %v2925_v9 = vpop.f32.mrf.mxu1  ;;  %v2265_v6 = vadd.f32 %v2264_v3, %v1936_v4 }
 0x2ad   : > { %v2592_v57 = vadd.f32 %v2591_v31, %v6341_v27 }
 0x2ae   : > { %v3242_v31 = vmax.f32 %v2265_v6, 0.0 }
 0x2af   : > { %v2921_v40 = vadd.f32 %v2920_v50, %v2592_v57  ;;  %2630 = vmatmul.bf16.gmra.mxu0 %v5721_v30  ;;  %2964 = vmatmul.bf16.gmra.mxu1 %v5753_v61  ;;  %v3502_v50 = vmul.f32 %v6351_v63, %v3240_v41 }
 0x2b0   : > { %1982 = vmatmul.bf16.gmra.mxu2 %v5795_v0  ;;  %2306 = vmatmul.bf16.gmra.mxu3 %v5753_v61  ;;  %v1939_v61 = vadd.f32 %v1938_v14, %v6337_v53  ;;  %v3504_v4 = vmul.f32 %v6351_v63, %v3242_v31  ;;  %v1941_v14 = vadd.f32 %v1940_v49, %v6337_v53 }
 0x2b1   : > { %v3241_v51 = vmax.f32 %v2921_v40, 0.0 }
 0x2b3   : > { %v1943_v22 = vpop.f32.mrf.mxu2  ;;  %v2267_v23 = vpop.f32.mrf.mxu3  ;;  %v3503_v30 = vmul.f32 %v6353_v20, %v3241_v51 }
 0x2b4   : > { %v2593_v57 = vpop.f32.mrf.mxu0  ;;  %v2927_v33 = vpop.f32.mrf.mxu1  ;;  %v2268_v46 = vadd.f32 %v2267_v23, %v1939_v61 }
 0x2b5   : > { %v2594_v56 = vadd.f32 %v2593_v57, %v6341_v27  ;;  %v3758_v34 = vadd.f32 %v3503_v30, %v3502_v50 }
 0x2b6   : > { %v3244_v57 = vmax.f32 %v2268_v46, 0.0 }
 0x2b7   : > { %v2923_v7 = vadd.f32 %v2922_v62, %v2594_v56  ;;  %3759 = vadd.xlane.f32.xlu0 %v3758_v34 }
 0x2b9   : > { %v3243_v24 = vmax.f32 %v2923_v7, 0.0 }
 0x2bb   : > { %v1945_v40 = vpop.f32.mrf.mxu2  ;;  %v2269_v3 = vpop.f32.mrf.mxu3  ;;  %v3505_v41 = vmul.f32 %v6353_v20, %v3243_v24 }
 0x2bc   : > { %v2596_v26 = vpop.f32.mrf.mxu0  ;;  %v2930_v51 = vpop.f32.mrf.mxu1  ;;  %v2270_v24 = vadd.f32 %v2269_v3, %v1941_v14 }
 0x2bd   : > { %v2597_v35 = vadd.f32 %v2596_v26, %v6341_v27  ;;  %v3761_v36 = vadd.f32 %v3505_v41, %v3504_v4  ;;  %v3506_v26 = vmul.f32 %v6351_v63, %v3244_v57 }
 0x2be   : > { %v3246_v56 = vmax.f32 %v2270_v24, 0.0 }
 0x2bf   : > { %v2926_v50 = vadd.f32 %v2925_v9, %v2597_v35  ;;  %2635 = vmatmul.bf16.gmra.mxu0 %v5751_v8  ;;  %2969 = vmatmul.bf16.gmra.mxu1 %v5797_v29 }
 0x2c0   : > { %1987 = vmatmul.bf16.gmra.mxu2 %v5820_v1  ;;  %2311 = vmatmul.bf16.gmra.mxu3 %v5797_v29  ;;  %v1944_v29 = vadd.f32 %v1943_v22, %v6337_v53  ;;  %v3508_v46 = vmul.f32 %v6351_v63, %v3246_v56  ;;  %v1946_v22 = vadd.f32 %v1945_v40, %v6337_v53 }
 0x2c1   : > { %v3245_v62 = vmax.f32 %v2926_v50, 0.0  ;;  %3762 = vadd.xlane.f32.xlu0 %v3761_v36 }
 0x2c3   : > { %v1948_v7 = vpop.f32.mrf.mxu2  ;;  %v2272_v6 = vpop.f32.mrf.mxu3  ;;  %v3507_v23 = vmul.f32 %v6353_v20, %v3245_v62 }
 0x2c4   : > { %v2598_v35 = vpop.f32.mrf.mxu0  ;;  %v2932_v9 = vpop.f32.mrf.mxu1  ;;  %v2273_v31 = vadd.f32 %v2272_v6, %v1944_v29 }
 0x2c5   : > { %v2599_v8 = vadd.f32 %v2598_v35, %v6341_v27  ;;  %v3764_v30 = vadd.f32 %v3507_v23, %v3506_v26 }
 0x2c6   : > { %v3248_v14 = vmax.f32 %v2273_v31, 0.0 }
 0x2c7   : > { %v2928_v34 = vadd.f32 %v2927_v33, %v2599_v8  ;;  %3765 = vadd.xlane.f32.xlu1 %v3764_v30 }
 0x2c8   : > { %v3510_v23 = vmul.f32 %v6351_v63, %v3248_v14 }
 0x2c9   : > { %v3247_v49 = vmax.f32 %v2928_v34, 0.0 }
 0x2cb   : > { %v1950_v36 = vpop.f32.mrf.mxu2  ;;  %v2274_v61 = vpop.f32.mrf.mxu3  ;;  %v3509_v3 = vmul.f32 %v6353_v20, %v3247_v49 }
 0x2cc   : > { %v2601_v4 = vpop.f32.mrf.mxu0  ;;  %v2935_v41 = vpop.f32.mrf.mxu1  ;;  %v2275_v24 = vadd.f32 %v2274_v61, %v1946_v22 }
 0x2cd   : > { %v2602_v57 = vadd.f32 %v2601_v4, %v6341_v27  ;;  %v3767_v50 = vadd.f32 %v3509_v3, %v3508_v46 }
 0x2ce   : > { %v3250_v56 = vmax.f32 %v2275_v24, 0.0 }
 0x2cf   : > { %v2931_v62 = vadd.f32 %v2930_v51, %v2602_v57  ;;  %2640 = vmatmul.bf16.gmra.mxu0 %v5795_v0  ;;  %2974 = vmatmul.bf16.gmra.mxu1 %v5822_v38 }
 0x2d0   : > { %1992 = vmatmul.bf16.gmra.mxu2 %v5844_v2  ;;  %2316 = vmatmul.bf16.gmra.mxu3 %v5822_v38  ;;  %v1949_v38 = vadd.f32 %v1948_v7, %v6337_v53  ;;  %v3512_v61 = vmul.f32 %v6351_v63, %v3250_v56  ;;  %v1951_v7 = vadd.f32 %v1950_v36, %v6337_v53 }
 0x2d1   : > { %v3249_v33 = vmax.f32 %v2931_v62, 0.0  ;;  %3768 = vadd.xlane.f32.xlu1 %v3767_v50 }
 0x2d3   : > { %v1953_v6 = vpop.f32.mrf.mxu2  ;;  %v2277_v26 = vpop.f32.mrf.mxu3  ;;  %v3511_v35 = vmul.f32 %v6353_v20, %v3249_v33 }
 0x2d4   : > { %v2603_v51 = vpop.f32.mrf.mxu0  ;;  %v2937_v8 = vpop.f32.mrf.mxu1  ;;  %v2278_v29 = vadd.f32 %v2277_v26, %v1949_v38 }
 0x2d5   : > { %v2604_v0 = vadd.f32 %v2603_v51, %v6341_v27  ;;  %v3770_v30 = vadd.f32 %v3511_v35, %v3510_v23 }
 0x2d6   : > { %v3252_v14 = vmax.f32 %v2278_v29, 0.0 }
 0x2d7   : > { %v2933_v34 = vadd.f32 %v2932_v9, %v2604_v0  ;;  %3771 = vadd.xlane.f32.xlu2 %v3770_v30 }
 0x2d8   : > { %v3514_v22 = vmul.f32 %v6351_v63, %v3252_v14 }
 0x2d9   : > { %v3251_v40 = vmax.f32 %v2933_v34, 0.0 }
 0x2db   : > { %v1955_v49 = vpop.f32.mrf.mxu2  ;;  %v2279_v31 = vpop.f32.mrf.mxu3  ;;  %v3513_v46 = vmul.f32 %v6353_v20, %v3251_v40 }
 0x2dc   : > { %v2606_v3 = vpop.f32.mrf.mxu0  ;;  %v2940_v4 = vpop.f32.mrf.mxu1  ;;  %v2280_v33 = vadd.f32 %v2279_v31, %v1951_v7 }
 0x2dd   : > { %v2607_v57 = vadd.f32 %v2606_v3, %v6341_v27  ;;  %v3773_v50 = vadd.f32 %v3513_v46, %v3512_v61 }
 0x2de   : > { %v3254_v0 = vmax.f32 %v2280_v33, 0.0 }
 0x2df   : > { %v2936_v62 = vadd.f32 %v2935_v41, %v2607_v57  ;;  %2645 = vmatmul.bf16.gmra.mxu0 %v5820_v1  ;;  %2979 = vmatmul.bf16.gmra.mxu1 %v5846_v43 }
 0x2e0   : > { %1997 = vmatmul.bf16.gmra.mxu2 %v5874_v11  ;;  %2321 = vmatmul.bf16.gmra.mxu3 %v5846_v43  ;;  %v1954_v43 = vadd.f32 %v1953_v6, %v6337_v53  ;;  %v3516_v40 = vmul.f32 %v6351_v63, %v3254_v0  ;;  %v1956_v6 = vadd.f32 %v1955_v49, %v6337_v53 }
 0x2e1   : > { %v3253_v9 = vmax.f32 %v2936_v62, 0.0  ;;  %3774 = vadd.xlane.f32.xlu2 %v3773_v50 }
 0x2e3   : > { %v1958_v24 = vpop.f32.mrf.mxu2  ;;  %v2282_v26 = vpop.f32.mrf.mxu3  ;;  %v3515_v23 = vmul.f32 %v6353_v20, %v3253_v9 }
 0x2e4   : > { %v2608_v41 = vpop.f32.mrf.mxu0  ;;  %v2942_v35 = vpop.f32.mrf.mxu1  ;;  %v2283_v56 = vadd.f32 %v2282_v26, %v1954_v43 }
 0x2e5   : > { %v2609_v1 = vadd.f32 %v2608_v41, %v6341_v27  ;;  %v3776_v51 = vadd.f32 %v3515_v23, %v3514_v22 }
 0x2e6   : > { %v3256_v57 = vmax.f32 %v2283_v56, 0.0 }
 0x2e7   : > { %v2938_v30 = vadd.f32 %v2937_v8, %v2609_v1  ;;  %3777 = vadd.xlane.f32.xlu0 %v3776_v51 }
 0x2e8   : > { %v3518_v14 = vmul.f32 %v6351_v63, %v3256_v57 }
 0x2e9   : > { %v3255_v36 = vmax.f32 %v2938_v30, 0.0 }
 0x2eb   : > { %v1960_v34 = vpop.f32.mrf.mxu2  ;;  %v2284_v38 = vpop.f32.mrf.mxu3  ;;  %v3517_v29 = vmul.f32 %v6353_v20, %v3255_v36 }
 0x2ec   : > { %v2611_v31 = vpop.f32.mrf.mxu0  ;;  %v2945_v61 = vpop.f32.mrf.mxu1  ;;  %v2285_v62 = vadd.f32 %v2284_v38, %v1956_v6 }
 0x2ed   : > { %v2612_v46 = vadd.f32 %v2611_v31, %v6341_v27  ;;  %v3779_v3 = vadd.f32 %v3517_v29, %v3516_v40 }
 0x2ee   : > { %v3258_v23 = vmax.f32 %v2285_v62, 0.0 }
 0x2ef   : > { %v2941_v50 = vadd.f32 %v2940_v4, %v2612_v46  ;;  %2650 = vmatmul.bf16.gmra.mxu0 %v5844_v2  ;;  %2984 = vmatmul.bf16.gmra.mxu1 %v5876_v21  ;;  %v1961_v46 = vadd.f32 %v1960_v34, %v6337_v53 }
 0x2f0   : > { %2002 = vmatmul.bf16.gmra.mxu2 %v5912_v32  ;;  %2326 = vmatmul.bf16.gmra.mxu3 %v5876_v21  ;;  %v1959_v21 = vadd.f32 %v1958_v24, %v6337_v53  ;;  %v3520_v30 = vmul.f32 %v6351_v63, %v3258_v23  ;;  %v7732_v24 = vld [vmem:[#allocation37_spill] sm:$0xff] }
 0x2f1   : > { %v3257_v8 = vmax.f32 %v2941_v50, 0.0  ;;  %3780 = vadd.xlane.f32.xlu1 %v3779_v3 }
 0x2f3   : > { %v1963_v7 = vpop.f32.mrf.mxu2  ;;  %v2287_v9 = vpop.f32.mrf.mxu3  ;;  %v3519_v22 = vmul.f32 %v6353_v20, %v3257_v8 }
 0x2f4   : > { %v2613_v4 = vpop.f32.mrf.mxu0  ;;  %v2947_v33 = vpop.f32.mrf.mxu1  ;;  %v2288_v1 = vadd.f32 %v2287_v9, %v1959_v21 }
 0x2f5   : > { %v2614_v2 = vadd.f32 %v2613_v4, %v6341_v27  ;;  %v3782_v26 = vadd.f32 %v3519_v22, %v3518_v14 }
 0x2f6   : > { %v3260_v29 = vmax.f32 %v2288_v1, 0.0 }
 0x2f7   : > { %v2943_v41 = vadd.f32 %v2942_v35, %v2614_v2  ;;  %3783 = vadd.xlane.f32.xlu2 %v3782_v26  ;;  %v7731_v35 = vld [vmem:[#allocation34_spill] sm:$0xff]  ;;  %v1964_v2 = vadd.f32 %v1963_v7, %v6337_v53 }
 0x2f8   : > { %v3522_v57 = vmul.f32 %v6351_v63, %v3260_v29 }
 0x2f9   : > { %v3259_v49 = vmax.f32 %v2943_v41, 0.0 }
 0x2fb   : > { %v1965_v51 = vpop.f32.mrf.mxu2  ;;  %v2289_v0 = vpop.f32.mrf.mxu3  ;;  %v3521_v43 = vmul.f32 %v6353_v20, %v3259_v49 }
 0x2fc   : > { %v2616_v36 = vpop.f32.mrf.mxu0  ;;  %v2950_v56 = vpop.f32.mrf.mxu1  ;;  %v2290_v50 = vadd.f32 %v2289_v0, %v1961_v46  ;;  %v1966_v7 = vadd.f32 %v1965_v51, %v6337_v53 }
 0x2fd   : > { %v2617_v38 = vadd.f32 %v2616_v36, %v6341_v27  ;;  %v3785_v40 = vadd.f32 %v3521_v43, %v3520_v30 }
 0x2fe   : > { %v3262_v22 = vmax.f32 %v2290_v50, 0.0 }
 0x2ff   : > { %v2946_v31 = vadd.f32 %v2945_v61, %v2617_v38  ;;  %2655 = vmatmul.bf16.gmra.mxu0 %v5874_v11  ;;  %2989 = vmatmul.bf16.gmra.mxu1 %v7731_v35 }
 0x300   : > { %2007 = vmatmul.bf16.gmra.mxu2 %v7732_v24  ;;  %2331 = vmatmul.bf16.gmra.mxu3 %v7731_v35  ;;  %v3524_v21 = vmul.f32 %v6351_v63, %v3262_v22 }
 0x301   : > { %v3261_v3 = vmax.f32 %v2946_v31, 0.0  ;;  %3786 = vadd.xlane.f32.xlu0 %v3785_v40 }
 0x303   : > { %v1968_v6 = vpop.f32.mrf.mxu2  ;;  %v2292_v8 = vpop.f32.mrf.mxu3  ;;  %v3523_v14 = vmul.f32 %v6353_v20, %v3261_v3 }
 0x304   : > { %v2618_v61 = vpop.f32.mrf.mxu0  ;;  %v2952_v62 = vpop.f32.mrf.mxu1  ;;  %v2293_v26 = vadd.f32 %v2292_v8, %v1964_v2 }
 0x305   : > { %v2619_v11 = vadd.f32 %v2618_v61, %v6341_v27  ;;  %v3788_v9 = vadd.f32 %v3523_v14, %v3522_v57  ;;  %v1969_v61 = vadd.f32 %v1968_v6, %v6337_v53 }
 0x306   : > { %v3264_v36 = vmax.f32 %v2293_v26, 0.0 }
 0x307   : > { %v2948_v4 = vadd.f32 %v2947_v33, %v2619_v11  ;;  %3789 = vadd.xlane.f32.xlu1 %v3788_v9  ;;  %v7733_v33 = vld [vmem:[#allocation38_spill] sm:$0xff] }
 0x308   : > { %v3526_v29 = vmul.f32 %v6351_v63, %v3264_v36 }
 0x309   : > { %v3263_v34 = vmax.f32 %v2948_v4, 0.0 }
 0x30b   : > { %v1970_v23 = vpop.f32.mrf.mxu2  ;;  %v2294_v41 = vpop.f32.mrf.mxu3  ;;  %v3525_v49 = vmul.f32 %v6353_v20, %v3263_v34 }
 0x30c   : > { %v2621_v1 = vpop.f32.mrf.mxu0  ;;  %v2955_v0 = vpop.f32.mrf.mxu1  ;;  %v2295_v31 = vadd.f32 %v2294_v41, %v1966_v7  ;;  %v1971_v6 = vadd.f32 %v1970_v23, %v6337_v53 }
 0x30d   : > { %v2622_v30 = vadd.f32 %v2621_v1, %v6341_v27  ;;  %v3791_v43 = vadd.f32 %v3525_v49, %v3524_v21 }
 0x30e   : > { %v3266_v8 = vmax.f32 %v2295_v31, 0.0 }
 0x30f   : > { %v2951_v38 = vadd.f32 %v2950_v56, %v2622_v30  ;;  %2660 = vmatmul.bf16.gmra.mxu0 %v5912_v32  ;;  %2994 = vmatmul.bf16.gmra.mxu1 %v7733_v33 }
 0x310   : > { %2012 = vmatmul.bf16.gmra.mxu2 %v5967_v55  ;;  %2336 = vmatmul.bf16.gmra.mxu3 %v7733_v33  ;;  %v3528_v4 = vmul.f32 %v6351_v63, %v3266_v8 }
 0x311   : > { %v3265_v40 = vmax.f32 %v2951_v38, 0.0  ;;  %3792 = vadd.xlane.f32.xlu2 %v3791_v43 }
 0x313   : > { %v1973_v35 = vpop.f32.mrf.mxu2  ;;  %v2297_v46 = vpop.f32.mrf.mxu3  ;;  %v3527_v3 = vmul.f32 %v6353_v20, %v3265_v40 }
 0x314   : > { %v2623_v56 = vpop.f32.mrf.mxu0  ;;  %v2957_v57 = vpop.f32.mrf.mxu1  ;;  %v2298_v11 = vadd.f32 %v2297_v46, %v1969_v61 }
 0x315   : > { %v2624_v32 = vadd.f32 %v2623_v56, %v6341_v27  ;;  %v3794_v50 = vadd.f32 %v3527_v3, %v3526_v29 }
 0x316   : > { %v3268_v49 = vmax.f32 %v2298_v11, 0.0 }
 0x317   : > { %v2953_v14 = vadd.f32 %v2952_v62, %v2624_v32  ;;  %3795 = vadd.xlane.f32.xlu0 %v3794_v50 }
 0x318   : > { %v3530_v30 = vmul.f32 %v6351_v63, %v3268_v49 }
 0x319   : > { %v3267_v51 = vmax.f32 %v2953_v14, 0.0  ;;  %v4400_v14 = vlaneseq }
 0x31b   : > { %v1975_v9 = vpop.f32.mrf.mxu2  ;;  %v2299_v22 = vpop.f32.mrf.mxu3  ;;  %v3529_v2 = vmul.f32 %v6353_v20, %v3267_v51 }
 0x31c   : > { %v2626_v34 = vpop.f32.mrf.mxu0  ;;  %v2960_v26 = vpop.f32.mrf.mxu1  ;;  %v2300_v43 = vadd.f32 %v2299_v22, %v1971_v6 }
 0x31d   : > { %v2627_v41 = vadd.f32 %v2626_v34, %v6341_v27  ;;  %v3797_v21 = vadd.f32 %v3529_v2, %v3528_v4  ;;  %v6455_v2 = vand.u32 127, %v4400_v14  ;;  %v1976_v34 = vadd.f32 %v1975_v9, %v6337_v53 }
 0x31e   : > { %v3270_v29 = vmax.f32 %v2300_v43, 0.0 }
 0x31f   : > { %v2956_v1 = vadd.f32 %v2955_v0, %v2627_v41  ;;  %2665 = vmatmul.bf16.gmra.mxu0 %v7732_v24  ;;  %2999 = vmatmul.bf16.gmra.mxu1 %v5969_v12 }
 0x320   : > { %2017 = vmatmul.bf16.gmra.mxu2 %v5997_v42  ;;  %2341 = vmatmul.bf16.gmra.mxu3 %v5969_v12  ;;  %v1974_v12 = vadd.f32 %v1973_v35, %v6337_v53  ;;  %v3532_v50 = vmul.f32 %v6351_v63, %v3270_v29  ;;  %v6453_v35 = vstv %s4142_s18 }
 0x321   : > { %v3269_v62 = vmax.f32 %v2956_v1, 0.0  ;;  %3798 = vadd.xlane.f32.xlu1 %v3797_v21  ;;  %v6461_v21 = vadd.s32 4294967288, %v6455_v2 }
 0x323   : > { %v1978_v36 = vpop.f32.mrf.mxu2  ;;  %v2302_v38 = vpop.f32.mrf.mxu3  ;;  %v3531_v33 = vmul.f32 %v6353_v20, %v3269_v62 }
 0x324   : > { %v2628_v0 = vpop.f32.mrf.mxu0  ;;  %v2962_v7 = vpop.f32.mrf.mxu1  ;;  %v2303_v3 = vadd.f32 %v2302_v38, %v1974_v12 }
 0x325   : > { %v2629_v24 = vadd.f32 %v2628_v0, %v6341_v27  ;;  %v3800_v40 = vadd.f32 %v3531_v33, %v3530_v30 }
 0x326   : > { %v3272_v22 = vmax.f32 %v2303_v3, 0.0 }
 0x327   : > { %v2958_v31 = vadd.f32 %v2957_v57, %v2629_v24  ;;  %3801 = vadd.xlane.f32.xlu2 %v3800_v40 }
 0x329   : > { %v3271_v23 = vmax.f32 %v2958_v31, 0.0  ;;  %v1979_v31 = vadd.f32 %v1978_v36, %v6337_v53 }
 0x32a   : > { %v3760_v46 = vpop.xlane.xlu0 %3759 }
 0x32b   : > { %v6446_v56 = vpop.f32.mrf.mxu2  ;;  %v2304_v32 = vpop.f32.mrf.mxu3  ;;  %v3533_v8 = vmul.f32 %v6353_v20, %v3271_v23  ;;  %v4144_v49 = vadd.f32 %v6453_v35, %v3760_v46  ;;  %v6473_v46 = vadd.s32 4294967280, %v6455_v2 }
 0x32c   : > { %v2631_v61 = vpop.f32.mrf.mxu0  ;;  %v2965_v51 = vpop.f32.mrf.mxu1 }
 0x32d   : > { %v2632_v11 = vadd.f32 %v2631_v61, %v6341_v27  ;;  %v3803_v57 = vadd.f32 %v3533_v8, %v3532_v50  ;;  %v4402_v24 = vperm.slane %v4144_v49, %v6455_v2 }
 0x32f   : > { %v2961_v4 = vadd.f32 %v2960_v26, %v2632_v11  ;;  %2670 = vmatmul.bf16.gmra.mxu0 %v5967_v55  ;;  %3004 = vmatmul.bf16.gmra.mxu1 %v5999_v60  ;;  %v3534_v26 = vmul.f32 %v6351_v63, %v3272_v22  ;;  %v2305_v55 = vadd.f32 %v2304_v32, %v1976_v34 }
 0x330   : > { %2022 = vmatmul.bf16.gmra.mxu2 %v6037_v39  ;;  %2346 = vmatmul.bf16.gmra.mxu3 %v5999_v60 }
 0x331   : > { %v3273_v41 = vmax.f32 %v2961_v4, 0.0  ;;  %3804 = vadd.xlane.f32.xlu0 %v3803_v57  ;;  %v3274_v0 = vmax.f32 %v2305_v55, 0.0  ;;  %v1981_v55 = vadd.f32 %v6446_v56, %v6337_v53 }
 0x333   : > { %v1983_v1 = vpop.f32.mrf.mxu2  ;;  %v2307_v6 = vpop.f32.mrf.mxu3  ;;  %v3535_v62 = vmul.f32 %v6353_v20, %v3273_v41  ;;  %v3536_v61 = vmul.f32 %v6351_v63, %v3274_v0 }
 0x334   : > { %v3763_v30 = vpop.xlane.xlu0 %3762  ;;  %v2633_v43 = vpop.f32.mrf.mxu0  ;;  %v2308_v32 = vadd.f32 %v2307_v6, %v1979_v31  ;;  %v1984_v31 = vadd.f32 %v1983_v1, %v6337_v53 }
 0x335   : > { %v4145_v60 = vadd.f32 %v6453_v35, %v3763_v30  ;;  %v2634_v9 = vadd.f32 %v2633_v43, %v6341_v27  ;;  %v2967_v38 = vpop.f32.mrf.mxu1  ;;  %v3806_v33 = vadd.f32 %v3535_v62, %v3534_v26 }
 0x336   : > { %v3276_v34 = vmax.f32 %v2308_v32, 0.0 }
 0x337   : > { %v4404_v40 = vperm.slane %v4145_v60, %v6461_v21  ;;  %v2963_v29 = vadd.f32 %v2962_v7, %v2634_v9  ;;  %3807 = vadd.xlane.f32.xlu1 %v3806_v33 }
 0x338   : > { %v3538_v6 = vmul.f32 %v6351_v63, %v3276_v34 }
 0x339   : > { %v4406_v12 = vsel %vm4405_vm1, %v4404_v40, %v4402_v24  ;;  %v3275_v23 = vmax.f32 %v2963_v29, 0.0 }
 0x33a   : > { %v3766_v3 = vpop.xlane.xlu1 %3765 }
 0x33b   : > { %v1985_v50 = vpop.f32.mrf.mxu2  ;;  %v2309_v8 = vpop.f32.mrf.mxu3  ;;  %v4146_v14 = vadd.f32 %v6453_v35, %v3766_v3  ;;  %v3537_v11 = vmul.f32 %v6353_v20, %v3275_v23  ;;  %v6498_v3 = vadd.s32 4294967264, %v6455_v2 }
 0x33c   : > { %v2636_v7 = vpop.f32.mrf.mxu0  ;;  %v2310_v62 = vadd.f32 %v2309_v8, %v1981_v55 }
 0x33d   : > { %v4408_v36 = vperm.slane %v4146_v14, %v6473_v46  ;;  %v2637_v57 = vadd.f32 %v2636_v7, %v6341_v27  ;;  %v2970_v22 = vpop.f32.mrf.mxu1  ;;  %v3809_v4 = vadd.f32 %v3537_v11, %v3536_v61 }
 0x33e   : > { %v3278_v24 = vmax.f32 %v2310_v62, 0.0  ;;  %v1986_v62 = vadd.f32 %v1985_v50, %v6337_v53 }
 0x33f   : > { %v4410_v41 = vsel %vm4409_vm2, %v4408_v36, %v4406_v12  ;;  %v2966_v26 = vadd.f32 %v2965_v51, %v2637_v57  ;;  %2675 = vmatmul.bf16.gmra.mxu0 %v5997_v42  ;;  %3009 = vmatmul.bf16.gmra.mxu1 %v6039_v16  ;;  %v6489_v51 = vadd.s32 4294967272, %v6455_v2 }
 0x340   : > { %2027 = vmatmul.bf16.gmra.mxu2 %v6070_v19  ;;  %2351 = vmatmul.bf16.gmra.mxu3 %v6039_v16  ;;  %v3540_v7 = vmul.f32 %v6351_v63, %v3278_v24 }
 0x341   : > { %v3277_v49 = vmax.f32 %v2966_v26, 0.0  ;;  %3810 = vadd.xlane.f32.xlu2 %v3809_v4 }
 0x343   : > { %v1988_v30 = vpop.f32.mrf.mxu2  ;;  %v2312_v43 = vpop.f32.mrf.mxu3  ;;  %v3539_v42 = vmul.f32 %v6353_v20, %v3277_v49  ;;  %v7734_v49 = vld [vmem:[#allocation47_spill] sm:$0xff] }
 0x344   : > { %v3769_v60 = vpop.xlane.xlu1 %3768  ;;  %v2638_v9 = vpop.f32.mrf.mxu0  ;;  %v2313_v8 = vadd.f32 %v2312_v43, %v1984_v31 }
 0x345   : > { %v4147_v33 = vadd.f32 %v6453_v35, %v3769_v60  ;;  %v2639_v16 = vadd.f32 %v2638_v9, %v6341_v27  ;;  %v2972_v0 = vpop.f32.mrf.mxu1  ;;  %v3812_v56 = vadd.f32 %v3539_v42, %v3538_v6  ;;  %v7735_v6 = vld [vmem:[#allocation50_spill] sm:$0xff] }
 0x347   : > { %v4412_v40 = vperm.slane %v4147_v33, %v6489_v51  ;;  %v2968_v29 = vadd.f32 %v2967_v38, %v2639_v16  ;;  %3813 = vadd.xlane.f32.xlu0 %v3812_v56  ;;  %v6513_v16 = vadd.s32 4294967256, %v6455_v2 }
 0x349   : > { %v4414_v12 = vsel %vm4413_vm3, %v4412_v40, %v4410_v41  ;;  %v3279_v23 = vmax.f32 %v2968_v29, 0.0  ;;  %v3280_v41 = vmax.f32 %v2313_v8, 0.0 }
 0x34a   : > { %v3772_v32 = vpop.xlane.xlu2 %3771 }
 0x34b   : > { %v1990_v14 = vpop.f32.mrf.mxu2  ;;  %v2314_v61 = vpop.f32.mrf.mxu3  ;;  %v4148_v11 = vadd.f32 %v6453_v35, %v3772_v32  ;;  %v3541_v36 = vmul.f32 %v6353_v20, %v3279_v23  ;;  %v3542_v42 = vmul.f32 %v6351_v63, %v3280_v41  ;;  %v1989_v32 = vadd.f32 %v1988_v30, %v6337_v53 }
 0x34c   : > { %v2641_v38 = vpop.f32.mrf.mxu0  ;;  %v2315_v60 = vadd.f32 %v2314_v61, %v1986_v62 }
 0x34d   : > { %v4416_v1 = vperm.slane %v4148_v11, %v6498_v3  ;;  %v2642_v57 = vadd.f32 %v2641_v38, %v6341_v27  ;;  %v2975_v4 = vpop.f32.mrf.mxu1  ;;  %v3815_v34 = vadd.f32 %v3541_v36, %v3540_v7  ;;  %v6522_v11 = vadd.s32 4294967248, %v6455_v2 }
 0x34e   : > { %v3282_v31 = vmax.f32 %v2315_v60, 0.0  ;;  %v7736_v60 = vld [vmem:[#allocation51_spill] sm:$0xff] }
 0x34f   : > { %v4418_v26 = vsel %vm4417_vm4, %v4416_v1, %v4414_v12  ;;  %v2971_v55 = vadd.f32 %v2970_v22, %v2642_v57  ;;  %2680 = vmatmul.bf16.gmra.mxu0 %v6037_v39  ;;  %3014 = vmatmul.bf16.gmra.mxu1 %v7734_v49 }
 0x350   : > { %2032 = vmatmul.bf16.gmra.mxu2 %v7735_v6  ;;  %2356 = vmatmul.bf16.gmra.mxu3 %v7734_v49 }
 0x351   : > { %v3281_v43 = vmax.f32 %v2971_v55, 0.0  ;;  %3816 = vadd.xlane.f32.xlu1 %v3815_v34  ;;  %v3544_v34 = vmul.f32 %v6351_v63, %v3282_v31 }
 0x353   : > { %v1993_v9 = vpop.f32.mrf.mxu2  ;;  %v2317_v33 = vpop.f32.mrf.mxu3  ;;  %v3543_v39 = vmul.f32 %v6353_v20, %v3281_v43 }
 0x354   : > { %v3775_v22 = vpop.xlane.xlu2 %3774  ;;  %v2643_v56 = vpop.f32.mrf.mxu0  ;;  %v2318_v36 = vadd.f32 %v2317_v33, %v1989_v32  ;;  %v1991_v33 = vadd.f32 %v1990_v14, %v6337_v53 }
 0x355   : > { %v4149_v24 = vadd.f32 %v6453_v35, %v3775_v22  ;;  %v2644_v40 = vadd.f32 %v2643_v56, %v6341_v27  ;;  %v2977_v29 = vpop.f32.mrf.mxu1  ;;  %v3818_v50 = vadd.f32 %v3543_v39, %v3542_v42 }
 0x356   : > { %v3284_v62 = vmax.f32 %v2318_v36, 0.0  ;;  %v1994_v36 = vadd.f32 %v1993_v9, %v6337_v53 }
 0x357   : > { %v4420_v12 = vperm.slane %v4149_v24, %v6513_v16  ;;  %v2973_v23 = vadd.f32 %v2972_v0, %v2644_v40  ;;  %3819 = vadd.xlane.f32.xlu2 %v3818_v50  ;;  %v6537_v50 = vadd.s32 4294967240, %v6455_v2 }
 0x358   : > { %v3546_v22 = vmul.f32 %v6351_v63, %v3284_v62 }
 0x359   : > { %v4422_v8 = vsel %vm4421_vm5, %v4420_v12, %v4418_v26  ;;  %v3283_v61 = vmax.f32 %v2973_v23, 0.0 }
 0x35a   : > { %v3778_v7 = vpop.xlane.xlu0 %3777 }
 0x35b   : > { %v1995_v38 = vpop.f32.mrf.mxu2  ;;  %v2319_v1 = vpop.f32.mrf.mxu3  ;;  %v4150_v57 = vadd.f32 %v6453_v35, %v3778_v7  ;;  %v3545_v41 = vmul.f32 %v6353_v20, %v3283_v61 }
 0x35c   : > { %v2646_v0 = vpop.f32.mrf.mxu0  ;;  %v2320_v56 = vadd.f32 %v2319_v1, %v1991_v33 }
 0x35d   : > { %v4424_v30 = vperm.slane %v4150_v57, %v6522_v11  ;;  %v2647_v26 = vadd.f32 %v2646_v0, %v6341_v27  ;;  %v2980_v55 = vpop.f32.mrf.mxu1  ;;  %v3821_v49 = vadd.f32 %v3545_v41, %v3544_v34  ;;  %v6546_v34 = vadd.s32 4294967232, %v6455_v2 }
 0x35f   : > { %v4426_v43 = vsel %vm4425_vm6, %v4424_v30, %v4422_v8  ;;  %v2976_v42 = vadd.f32 %v2975_v4, %v2647_v26  ;;  %2685 = vmatmul.bf16.gmra.mxu0 %v6070_v19  ;;  %3019 = vmatmul.bf16.gmra.mxu1 %v7736_v60  ;;  %v3286_v8 = vmax.f32 %v2320_v56, 0.0 }
 0x360   : > { %2037 = vmatmul.bf16.gmra.mxu2 %v6118_v5  ;;  %2361 = vmatmul.bf16.gmra.mxu3 %v7736_v60 }
 0x361   : > { %v3285_v39 = vmax.f32 %v2976_v42, 0.0  ;;  %3822 = vadd.xlane.f32.xlu0 %v3821_v49  ;;  %v3548_v62 = vmul.f32 %v6351_v63, %v3286_v8 }
 0x363   : > { %v1998_v24 = vpop.f32.mrf.mxu2  ;;  %v2322_v40 = vpop.f32.mrf.mxu3  ;;  %v3547_v19 = vmul.f32 %v6353_v20, %v3285_v39 }
 0x364   : > { %v3781_v4 = vpop.xlane.xlu1 %3780  ;;  %v2648_v31 = vpop.f32.mrf.mxu0  ;;  %v2323_v0 = vadd.f32 %v2322_v40, %v1994_v36  ;;  %v1996_v40 = vadd.f32 %v1995_v38, %v6337_v53 }
 0x365   : > { %v4151_v12 = vadd.f32 %v6453_v35, %v3781_v4  ;;  %v2649_v23 = vadd.f32 %v2648_v31, %v6341_v27  ;;  %v2982_v32 = vpop.f32.mrf.mxu1  ;;  %v3824_v14 = vadd.f32 %v3547_v19, %v3546_v22 }
 0x366   : > { %v3288_v39 = vmax.f32 %v2323_v0, 0.0 }
 0x367   : > { %v4428_v61 = vperm.slane %v4151_v12, %v6537_v50  ;;  %v2978_v7 = vadd.f32 %v2977_v29, %v2649_v23  ;;  %3825 = vadd.xlane.f32.xlu1 %v3824_v14  ;;  %v6561_v14 = vadd.s32 4294967224, %v6455_v2 }
 0x368   : > { %v3550_v4 = vmul.f32 %v6351_v63, %v3288_v39 }
 0x369   : > { %v4430_v1 = vsel %vm4429_vm7, %v4428_v61, %v4426_v43  ;;  %v3287_v57 = vmax.f32 %v2978_v7, 0.0 }
 0x36a   : > { %v3784_v41 = vpop.xlane.xlu2 %3783 }
 0x36b   : > { %v2000_v30 = vpop.f32.mrf.mxu2  ;;  %v2324_v26 = vpop.f32.mrf.mxu3  ;;  %v4152_v49 = vadd.f32 %v6453_v35, %v3784_v41  ;;  %v3549_v42 = vmul.f32 %v6353_v20, %v3287_v57  ;;  %v1999_v41 = vadd.f32 %v1998_v24, %v6337_v53 }
 0x36c   : > { %v2651_v29 = vpop.f32.mrf.mxu0  ;;  %v2325_v31 = vadd.f32 %v2324_v26, %v1996_v40 }
 0x36d   : > { %v4432_v9 = vperm.slane %v4152_v49, %v6546_v34  ;;  %v2652_v43 = vadd.f32 %v2651_v29, %v6341_v27  ;;  %v2985_v60 = vpop.f32.mrf.mxu1  ;;  %v3827_v33 = vadd.f32 %v3549_v42, %v3548_v62  ;;  %v6570_v49 = vadd.s32 4294967216, %v6455_v2 }
 0x36e   : > { %v3290_v36 = vmax.f32 %v2325_v31, 0.0 }
 0x36f   : > { %v4434_v22 = vsel %vm4433_vm8, %v4432_v9, %v4430_v1  ;;  %v2981_v56 = vadd.f32 %v2980_v55, %v2652_v43  ;;  %2690 = vmatmul.bf16.gmra.mxu0 %v7735_v6  ;;  %3024 = vmatmul.bf16.gmra.mxu1 %v6120_v10 }
 0x370   : > { %2042 = vmatmul.bf16.gmra.mxu2 %v6140_v47  ;;  %2366 = vmatmul.bf16.gmra.mxu3 %v6120_v10 }
 0x371   : > { %v3289_v19 = vmax.f32 %v2981_v56, 0.0  ;;  %3828 = vadd.xlane.f32.xlu2 %v3827_v33  ;;  %v3552_v33 = vmul.f32 %v6351_v63, %v3290_v36 }
 0x373   : > { %v2003_v12 = vpop.f32.mrf.mxu2  ;;  %v2327_v23 = vpop.f32.mrf.mxu3  ;;  %v3551_v6 = vmul.f32 %v6353_v20, %v3289_v19 }
 0x374   : > { %v3787_v55 = vpop.xlane.xlu0 %3786  ;;  %v2653_v8 = vpop.f32.mrf.mxu0  ;;  %v2328_v42 = vadd.f32 %v2327_v23, %v1999_v41  ;;  %v2001_v23 = vadd.f32 %v2000_v30, %v6337_v53 }
 0x375   : > { %v4153_v61 = vadd.f32 %v6453_v35, %v3787_v55  ;;  %v2654_v10 = vadd.f32 %v2653_v8, %v6341_v27  ;;  %v2987_v7 = vpop.f32.mrf.mxu1  ;;  %v3830_v38 = vadd.f32 %v3551_v6, %v3550_v4 }
 0x376   : > { %v3292_v19 = vmax.f32 %v2328_v42, 0.0 }
 0x377   : > { %v4436_v1 = vperm.slane %v4153_v61, %v6561_v14  ;;  %v2983_v57 = vadd.f32 %v2982_v32, %v2654_v10  ;;  %3831 = vadd.xlane.f32.xlu0 %v3830_v38  ;;  %v6585_v38 = vadd.s32 4294967208, %v6455_v2 }
 0x378   : > { %v3554_v55 = vmul.f32 %v6351_v63, %v3292_v19 }
 0x379   : > { %v4438_v0 = vsel %vm4437_vm9, %v4436_v1, %v4434_v22  ;;  %v3291_v26 = vmax.f32 %v2983_v57, 0.0 }
 0x37a   : > { %v3790_v62 = vpop.xlane.xlu1 %3789 }
 0x37b   : > { %v2005_v29 = vpop.f32.mrf.mxu2  ;;  %v2329_v9 = vpop.f32.mrf.mxu3  ;;  %v4154_v43 = vadd.f32 %v6453_v35, %v3790_v62  ;;  %v3553_v39 = vmul.f32 %v6353_v20, %v3291_v26  ;;  %v2004_v62 = vadd.f32 %v2003_v12, %v6337_v53 }
 0x37c   : > { %v2656_v32 = vpop.f32.mrf.mxu0  ;;  %v2330_v8 = vadd.f32 %v2329_v9, %v2001_v23 }
 0x37d   : > { %v4440_v24 = vperm.slane %v4154_v43, %v6570_v49  ;;  %v2657_v22 = vadd.f32 %v2656_v32, %v6341_v27  ;;  %v2990_v56 = vpop.f32.mrf.mxu1  ;;  %v3833_v40 = vadd.f32 %v3553_v39, %v3552_v33  ;;  %v6594_v43 = vadd.s32 4294967200, %v6455_v2 }
 0x37e   : > { %v3294_v41 = vmax.f32 %v2330_v8, 0.0 }
 0x37f   : > { %v4442_v4 = vsel %vm4441_vm10, %v4440_v24, %v4438_v0  ;;  %v2986_v31 = vadd.f32 %v2985_v60, %v2657_v22  ;;  %2695 = vmatmul.bf16.gmra.mxu0 %v6118_v5  ;;  %3029 = vmatmul.bf16.gmra.mxu1 %v6142_v37 }
 0x380   : > { %2047 = vmatmul.bf16.gmra.mxu2 %v6160_v45  ;;  %2371 = vmatmul.bf16.gmra.mxu3 %v6142_v37 }
 0x381   : > { %v3293_v6 = vmax.f32 %v2986_v31, 0.0  ;;  %3834 = vadd.xlane.f32.xlu1 %v3833_v40  ;;  %v3556_v40 = vmul.f32 %v6351_v63, %v3294_v41 }
 0x383   : > { %v2008_v61 = vpop.f32.mrf.mxu2  ;;  %v2332_v10 = vpop.f32.mrf.mxu3  ;;  %v3555_v5 = vmul.f32 %v6353_v20, %v3293_v6 }
 0x384   : > { %v3793_v60 = vpop.xlane.xlu2 %3792  ;;  %v2658_v36 = vpop.f32.mrf.mxu0  ;;  %v2333_v39 = vadd.f32 %v2332_v10, %v2004_v62  ;;  %v2006_v10 = vadd.f32 %v2005_v29, %v6337_v53 }
 0x385   : > { %v4155_v1 = vadd.f32 %v6453_v35, %v3793_v60  ;;  %v2659_v37 = vadd.f32 %v2658_v36, %v6341_v27  ;;  %v2992_v57 = vpop.f32.mrf.mxu1  ;;  %v3836_v30 = vadd.f32 %v3555_v5, %v3554_v55 }
 0x386   : > { %v3296_v6 = vmax.f32 %v2333_v39, 0.0 }
 0x387   : > { %v4444_v0 = vperm.slane %v4155_v1, %v6585_v38  ;;  %v2988_v26 = vadd.f32 %v2987_v7, %v2659_v37  ;;  %3837 = vadd.xlane.f32.xlu2 %v3836_v30  ;;  %v6609_v30 = vadd.s32 4294967192, %v6455_v2 }
 0x388   : > { %v3558_v60 = vmul.f32 %v6351_v63, %v3296_v6 }
 0x389   : > { %v4446_v42 = vsel %vm4445_vm11, %v4444_v0, %v4442_v4  ;;  %v3295_v9 = vmax.f32 %v2988_v26, 0.0 }
 0x38a   : > { %v3796_v33 = vpop.xlane.xlu0 %3795 }
 0x38b   : > { %v2010_v32 = vpop.f32.mrf.mxu2  ;;  %v2334_v24 = vpop.f32.mrf.mxu3  ;;  %v4156_v22 = vadd.f32 %v6453_v35, %v3796_v33  ;;  %v3557_v19 = vmul.f32 %v6353_v20, %v3295_v9  ;;  %v2009_v33 = vadd.f32 %v2008_v61, %v6337_v53 }
 0x38c   : > { %v2661_v7 = vpop.f32.mrf.mxu0  ;;  %v2335_v36 = vadd.f32 %v2334_v24, %v2006_v10 }
 0x38d   : > { %v4448_v12 = vperm.slane %v4156_v22, %v6594_v43  ;;  %v2662_v4 = vadd.f32 %v2661_v7, %v6341_v27  ;;  %v2995_v31 = vpop.f32.mrf.mxu1  ;;  %v3839_v23 = vadd.f32 %v3557_v19, %v3556_v40  ;;  %v6618_v22 = vadd.s32 4294967184, %v6455_v2 }
 0x38e   : > { %v3298_v62 = vmax.f32 %v2335_v36, 0.0 }
 0x38f   : > { %v4450_v55 = vsel %vm4449_vm12, %v4448_v12, %v4446_v42  ;;  %v2991_v8 = vadd.f32 %v2990_v56, %v2662_v4  ;;  %2700 = vmatmul.bf16.gmra.mxu0 %v6140_v47  ;;  %3034 = vmatmul.bf16.gmra.mxu1 %v6162_v28 }
 0x390   : > { %2052 = vmatmul.bf16.gmra.mxu2 %v6181_v44  ;;  %2376 = vmatmul.bf16.gmra.mxu3 %v6162_v28 }
 0x391   : > { %v3297_v5 = vmax.f32 %v2991_v8, 0.0  ;;  %3840 = vadd.xlane.f32.xlu0 %v3839_v23  ;;  %v3560_v23 = vmul.f32 %v6351_v63, %v3298_v62 }
 0x393   : > { %v2013_v1 = vpop.f32.mrf.mxu2  ;;  %v2337_v37 = vpop.f32.mrf.mxu3  ;;  %v3559_v47 = vmul.f32 %v6353_v20, %v3297_v5 }
 0x394   : > { %v3799_v56 = vpop.xlane.xlu1 %3798  ;;  %v2663_v41 = vpop.f32.mrf.mxu0  ;;  %v2338_v19 = vadd.f32 %v2337_v37, %v2009_v33  ;;  %v2011_v37 = vadd.f32 %v2010_v32, %v6337_v53 }
 0x395   : > { %v4157_v0 = vadd.f32 %v6453_v35, %v3799_v56  ;;  %v2664_v28 = vadd.f32 %v2663_v41, %v6341_v27  ;;  %v2997_v26 = vpop.f32.mrf.mxu1  ;;  %v3842_v29 = vadd.f32 %v3559_v47, %v3558_v60 }
 0x396   : > { %v3300_v5 = vmax.f32 %v2338_v19, 0.0 }
 0x397   : > { %v4452_v42 = vperm.slane %v4157_v0, %v6609_v30  ;;  %v2993_v9 = vadd.f32 %v2992_v57, %v2664_v28  ;;  %3843 = vadd.xlane.f32.xlu1 %v3842_v29  ;;  %v6633_v29 = vadd.s32 4294967176, %v6455_v2 }
 0x398   : > { %v3562_v56 = vmul.f32 %v6351_v63, %v3300_v5 }
 0x399   : > { %v4454_v39 = vsel %vm4453_vm13, %v4452_v42, %v4450_v55  ;;  %v3299_v24 = vmax.f32 %v2993_v9, 0.0 }
 0x39a   : > { %v3802_v40 = vpop.xlane.xlu2 %3801 }
 0x39b   : > { %v2015_v7 = vpop.f32.mrf.mxu2  ;;  %v2339_v12 = vpop.f32.mrf.mxu3  ;;  %v4158_v4 = vadd.f32 %v6453_v35, %v3802_v40  ;;  %v3561_v6 = vmul.f32 %v6353_v20, %v3299_v24  ;;  %v2014_v40 = vadd.f32 %v2013_v1, %v6337_v53 }
 0x39c   : > { %v2666_v57 = vpop.f32.mrf.mxu0  ;;  %v2340_v41 = vadd.f32 %v2339_v12, %v2011_v37 }
 0x39d   : > { %v4456_v61 = vperm.slane %v4158_v4, %v6618_v22  ;;  %v2667_v55 = vadd.f32 %v2666_v57, %v6341_v27  ;;  %v3000_v8 = vpop.f32.mrf.mxu1  ;;  %v3845_v10 = vadd.f32 %v3561_v6, %v3560_v23 }
 0x39e   : > { %v3302_v33 = vmax.f32 %v2340_v41, 0.0 }
 0x39f   : > { %v4458_v60 = vsel %vm4457_vm14, %v4456_v61, %v4454_v39  ;;  %v2996_v36 = vadd.f32 %v2995_v31, %v2667_v55  ;;  %2705 = vmatmul.bf16.gmra.mxu0 %v6160_v45  ;;  %3039 = vmatmul.bf16.gmra.mxu1 %v6183_v25 }
 0x3a0   : > { %2057 = vmatmul.bf16.gmra.mxu2 %v6201_v52  ;;  %2381 = vmatmul.bf16.gmra.mxu3 %v6183_v25  ;;  %v3564_v57 = vmul.f32 %v6351_v63, %v3302_v33 }
 0x3a1   : > { %v3301_v47 = vmax.f32 %v2996_v36, 0.0  ;;  %3846 = vadd.xlane.f32.xlu2 %v3845_v10 }
 0x3a3   : > { %v2018_v0 = vpop.f32.mrf.mxu2  ;;  %v2342_v28 = vpop.f32.mrf.mxu3  ;;  %v3563_v45 = vmul.f32 %v6353_v20, %v3301_v47 }
 0x3a4   : > { %v3805_v31 = vpop.xlane.xlu0 %3804  ;;  %v2668_v62 = vpop.f32.mrf.mxu0  ;;  %v2343_v4 = vadd.f32 %v2342_v28, %v2014_v40  ;;  %v2019_v40 = vadd.f32 %v2018_v0, %v6337_v53 }
 0x3a5   : > { %v4159_v42 = vadd.f32 %v6453_v35, %v3805_v31  ;;  %v2669_v25 = vadd.f32 %v2668_v62, %v6341_v27  ;;  %v3002_v9 = vpop.f32.mrf.mxu1  ;;  %v3848_v32 = vadd.f32 %v3563_v45, %v3562_v56 }
 0x3a7   : > { %v4460_v39 = vperm.slane %v4159_v42, %v6633_v29  ;;  %v2998_v24 = vadd.f32 %v2997_v26, %v2669_v25  ;;  %3849 = vadd.xlane.f32.xlu0 %v3848_v32  ;;  %v3304_v26 = vmax.f32 %v2343_v4, 0.0 }
 0x3a9   : > { %v6641_v19 = vsel %vm4461_vm15, %v4460_v39, %v4458_v60  ;;  %v3303_v12 = vmax.f32 %v2998_v24, 0.0  ;;  %v2016_v60 = vadd.f32 %v2015_v7, %v6337_v53  ;;  %v3566_v56 = vmul.f32 %v6351_v63, %v3304_v26 }
 0x3aa   : > { %v3808_v1 = vpop.xlane.xlu1 %3807 }
 0x3ab   : > { %v2020_v23 = vpop.f32.mrf.mxu2  ;;  %v2344_v6 = vpop.f32.mrf.mxu3  ;;  %v3565_v61 = vmul.f32 %v6353_v20, %v3303_v12  ;;  %v4160_v28 = vadd.f32 %v6453_v35, %v3808_v1 }
 0x3ac   : > { %v2671_v55 = vpop.f32.mrf.mxu0  ;;  %v2345_v41 = vadd.f32 %v2344_v6, %v2016_v60 }
 0x3ad   : > { %v2672_v10 = vadd.f32 %v2671_v55, %v6341_v27  ;;  %v3005_v5 = vpop.f32.mrf.mxu1  ;;  %v3851_v36 = vadd.f32 %v3565_v61, %v3564_v57  ;;  %v4463_v33 = vperm.slane %v4160_v28, %v6455_v2  ;;  %v2021_v28 = vadd.f32 %v2020_v23, %v6337_v53 }
 0x3ae   : > { %v3306_v7 = vmax.f32 %v2345_v41, 0.0 }
 0x3af   : > { %v3001_v37 = vadd.f32 %v3000_v8, %v2672_v10  ;;  %2710 = vmatmul.bf16.gmra.mxu0 %v6181_v44  ;;  %3044 = vmatmul.bf16.gmra.mxu1 %v6203_v18 }
 0x3b0   : > { %2062 = vmatmul.bf16.gmra.mxu2 %v6221_v17  ;;  %2386 = vmatmul.bf16.gmra.mxu3 %v6203_v18 }
 0x3b1   : > { %v3305_v47 = vmax.f32 %v3001_v37, 0.0  ;;  %3852 = vadd.xlane.f32.xlu1 %v3851_v36  ;;  %v3568_v36 = vmul.f32 %v6351_v63, %v3306_v7 }
 0x3b3   : > { %v2023_v45 = vpop.f32.mrf.mxu2  ;;  %v2347_v8 = vpop.f32.mrf.mxu3  ;;  %v3567_v44 = vmul.f32 %v6353_v20, %v3305_v47 }
 0x3b4   : > { %v3811_v31 = vpop.xlane.xlu2 %3810  ;;  %v2673_v62 = vpop.f32.mrf.mxu0  ;;  %v2348_v57 = vadd.f32 %v2347_v8, %v2019_v40  ;;  %v2024_v40 = vadd.f32 %v2023_v45, %v6337_v53 }
 0x3b5   : > { %v4161_v42 = vadd.f32 %v6453_v35, %v3811_v31  ;;  %v2674_v25 = vadd.f32 %v2673_v62, %v6341_v27  ;;  %v3007_v18 = vpop.f32.mrf.mxu1  ;;  %v3854_v32 = vadd.f32 %v3567_v44, %v3566_v56 }
 0x3b6   : > { %v3308_v47 = vmax.f32 %v2348_v57, 0.0 }
 0x3b7   : > { %v4464_v39 = vperm.slane %v4161_v42, %v6461_v21  ;;  %v3003_v24 = vadd.f32 %v3002_v9, %v2674_v25  ;;  %3855 = vadd.xlane.f32.xlu2 %v3854_v32 }
 0x3b8   : > { %v3570_v44 = vmul.f32 %v6351_v63, %v3308_v47 }
 0x3b9   : > { %v4465_v12 = vsel %vm4405_vm1, %v4464_v39, %v4463_v33  ;;  %v3307_v4 = vmax.f32 %v3003_v24, 0.0 }
 0x3ba   : > { %v3814_v6 = vpop.xlane.xlu0 %3813 }
 0x3bb   : > { %v2025_v61 = vpop.f32.mrf.mxu2  ;;  %v2349_v55 = vpop.f32.mrf.mxu3  ;;  %v4162_v10 = vadd.f32 %v6453_v35, %v3814_v6  ;;  %v3569_v26 = vmul.f32 %v6353_v20, %v3307_v4 }
 0x3bc   : > { %v2676_v37 = vpop.f32.mrf.mxu0  ;;  %v2350_v31 = vadd.f32 %v2349_v55, %v2021_v28  ;;  %v2026_v28 = vadd.f32 %v2025_v61, %v6337_v53 }
 0x3bd   : > { %v4466_v1 = vperm.slane %v4162_v10, %v6473_v46  ;;  %v2677_v9 = vadd.f32 %v2676_v37, %v6341_v27  ;;  %v3010_v60 = vpop.f32.mrf.mxu1  ;;  %v3857_v0 = vadd.f32 %v3569_v26, %v3568_v36 }
 0x3bf   : > { %v4467_v56 = vsel %vm4409_vm2, %v4466_v1, %v4465_v12  ;;  %v3006_v41 = vadd.f32 %v3005_v5, %v2677_v9  ;;  %2715 = vmatmul.bf16.gmra.mxu0 %v6201_v52  ;;  %3049 = vmatmul.bf16.gmra.mxu1 %v6223_v54 }
 0x3c0   : > { %2067 = vmatmul.bf16.gmra.mxu2 %v6241_v15  ;;  %2391 = vmatmul.bf16.gmra.mxu3 %v6223_v54  ;;  %v3310_v54 = vmax.f32 %v2350_v31, 0.0 }
 0x3c1   : > { %v3309_v8 = vmax.f32 %v3006_v41, 0.0  ;;  %3858 = vadd.xlane.f32.xlu0 %v3857_v0 }
 0x3c2   : > { %v3572_v26 = vmul.f32 %v6351_v63, %v3310_v54 }
 0x3c3   : > { %v2028_v62 = vpop.f32.mrf.mxu2  ;;  %v2352_v42 = vpop.f32.mrf.mxu3  ;;  %v3571_v25 = vmul.f32 %v6353_v20, %v3309_v8 }
 0x3c4   : > { %v3817_v5 = vpop.xlane.xlu1 %3816  ;;  %v2678_v32 = vpop.f32.mrf.mxu0  ;;  %v2353_v57 = vadd.f32 %v2352_v42, %v2024_v40 }
 0x3c5   : > { %v4163_v52 = vadd.f32 %v6453_v35, %v3817_v5  ;;  %v2679_v7 = vadd.f32 %v2678_v32, %v6341_v27  ;;  %v3012_v33 = vpop.f32.mrf.mxu1  ;;  %v3860_v39 = vadd.f32 %v3571_v25, %v3570_v44 }
 0x3c6   : > { %v3312_v47 = vmax.f32 %v2353_v57, 0.0 }
 0x3c7   : > { %v4468_v23 = vperm.slane %v4163_v52, %v6489_v51  ;;  %v3008_v24 = vadd.f32 %v3007_v18, %v2679_v7  ;;  %3861 = vadd.xlane.f32.xlu1 %v3860_v39 }
 0x3c8   : > { %v3574_v44 = vmul.f32 %v6351_v63, %v3312_v47 }
 0x3c9   : > { %v4469_v12 = vsel %vm4413_vm3, %v4468_v23, %v4467_v56  ;;  %v3311_v4 = vmax.f32 %v3008_v24, 0.0  ;;  %v2029_v23 = vadd.f32 %v2028_v62, %v6337_v53 }
 0x3ca   : > { %v3820_v6 = vpop.xlane.xlu2 %3819 }
 0x3cb   : > { %v2030_v55 = vpop.f32.mrf.mxu2  ;;  %v2354_v10 = vpop.f32.mrf.mxu3  ;;  %v4164_v36 = vadd.f32 %v6453_v35, %v3820_v6  ;;  %v3573_v37 = vmul.f32 %v6353_v20, %v3311_v4 }
 0x3cc   : > { %v2681_v1 = vpop.f32.mrf.mxu0  ;;  %v2355_v31 = vadd.f32 %v2354_v10, %v2026_v28 }
 0x3cd   : > { %v4470_v9 = vperm.slane %v4164_v36, %v6498_v3  ;;  %v2682_v18 = vadd.f32 %v2681_v1, %v6341_v27  ;;  %v3015_v0 = vpop.f32.mrf.mxu1  ;;  %v3863_v45 = vadd.f32 %v3573_v37, %v3572_v26 }
 0x3cf   : > { %v4471_v56 = vsel %vm4417_vm4, %v4470_v9, %v4469_v12  ;;  %v3011_v41 = vadd.f32 %v3010_v60, %v2682_v18  ;;  %2720 = vmatmul.bf16.gmra.mxu0 %v6221_v17  ;;  %3054 = vmatmul.bf16.gmra.mxu1 %v6243_v48 }
 0x3d0   : > { %2072 = vmatmul.bf16.gmra.mxu2 %v6261_v59  ;;  %2396 = vmatmul.bf16.gmra.mxu3 %v6243_v48  ;;  %v3314_v48 = vmax.f32 %v2355_v31, 0.0 }
 0x3d1   : > { %v3313_v8 = vmax.f32 %v3011_v41, 0.0  ;;  %3864 = vadd.xlane.f32.xlu2 %v3863_v45 }
 0x3d2   : > { %v3576_v36 = vmul.f32 %v6351_v63, %v3314_v48 }
 0x3d3   : > { %v2033_v42 = vpop.f32.mrf.mxu2  ;;  %v2357_v25 = vpop.f32.mrf.mxu3  ;;  %v3575_v5 = vmul.f32 %v6353_v20, %v3313_v8 }
 0x3d4   : > { %v3823_v60 = vpop.xlane.xlu0 %3822  ;;  %v2683_v32 = vpop.f32.mrf.mxu0  ;;  %v2358_v4 = vadd.f32 %v2357_v25, %v2029_v23 }
 0x3d5   : > { %v4165_v17 = vadd.f32 %v6453_v35, %v3823_v60  ;;  %v2684_v52 = vadd.f32 %v2683_v32, %v6341_v27  ;;  %v3017_v7 = vpop.f32.mrf.mxu1  ;;  %v3866_v39 = vadd.f32 %v3575_v5, %v3574_v44 }
 0x3d6   : > { %v3316_v18 = vmax.f32 %v2358_v4, 0.0 }
 0x3d7   : > { %v4472_v61 = vperm.slane %v4165_v17, %v6513_v16  ;;  %v3013_v54 = vadd.f32 %v3012_v33, %v2684_v52  ;;  %3867 = vadd.xlane.f32.xlu0 %v3866_v39  ;;  %v2034_v39 = vadd.f32 %v2033_v42, %v6337_v53 }
 0x3d8   : > { %v3578_v28 = vmul.f32 %v6351_v63, %v3316_v18  ;;  %v7738_v18 = vld [vmem:[#allocation73_spill] sm:$0xff] }
 0x3d9   : > { %v4473_v24 = vsel %vm4421_vm5, %v4472_v61, %v4471_v56  ;;  %v3315_v40 = vmax.f32 %v3013_v54, 0.0  ;;  %v2031_v56 = vadd.f32 %v2030_v55, %v6337_v53 }
 0x3da   : > { %v3826_v12 = vpop.xlane.xlu1 %3825 }
 0x3db   : > { %v2035_v6 = vpop.f32.mrf.mxu2  ;;  %v2359_v57 = vpop.f32.mrf.mxu3  ;;  %v4166_v10 = vadd.f32 %v6453_v35, %v3826_v12  ;;  %v3577_v26 = vmul.f32 %v6353_v20, %v3315_v40 }
 0x3dc   : > { %v2686_v37 = vpop.f32.mrf.mxu0  ;;  %v2360_v8 = vadd.f32 %v2359_v57, %v2031_v56 }
 0x3dd   : > { %v4474_v1 = vperm.slane %v4166_v10, %v6522_v11  ;;  %v2687_v33 = vadd.f32 %v2686_v37, %v6341_v27  ;;  %v3020_v9 = vpop.f32.mrf.mxu1  ;;  %v3869_v62 = vadd.f32 %v3577_v26, %v3576_v36 }
 0x3df   : > { %v4475_v45 = vsel %vm4425_vm6, %v4474_v1, %v4473_v24  ;;  %v3016_v47 = vadd.f32 %v3015_v0, %v2687_v33  ;;  %2725 = vmatmul.bf16.gmra.mxu0 %v6241_v15  ;;  %3059 = vmatmul.bf16.gmra.mxu1 %v6263_v13 }
 0x3e0   : > { %2077 = vmatmul.bf16.gmra.mxu2 %v6281_v58  ;;  %2401 = vmatmul.bf16.gmra.mxu3 %v6263_v13  ;;  %v3318_v13 = vmax.f32 %v2360_v8, 0.0 }
 0x3e1   : > { %v3317_v41 = vmax.f32 %v3016_v47, 0.0  ;;  %3870 = vadd.xlane.f32.xlu1 %v3869_v62  ;;  %v7737_v62 = vld [vmem:[#allocation70_spill] sm:$0xff] }
 0x3e2   : > { %v3580_v4 = vmul.f32 %v6351_v63, %v3318_v13 }
 0x3e3   : > { %v2038_v44 = vpop.f32.mrf.mxu2  ;;  %v2362_v31 = vpop.f32.mrf.mxu3  ;;  %v3579_v25 = vmul.f32 %v6353_v20, %v3317_v41 }
 0x3e4   : > { %v3829_v0 = vpop.xlane.xlu2 %3828  ;;  %v2688_v5 = vpop.f32.mrf.mxu0  ;;  %v2363_v23 = vadd.f32 %v2362_v31, %v2034_v39  ;;  %v2039_v13 = vadd.f32 %v2038_v44, %v6337_v53 }
 0x3e5   : > { %v4167_v15 = vadd.f32 %v6453_v35, %v3829_v0  ;;  %v2689_v60 = vadd.f32 %v2688_v5, %v6341_v27  ;;  %v3022_v32 = vpop.f32.mrf.mxu1  ;;  %v3872_v17 = vadd.f32 %v3579_v25, %v3578_v28 }
 0x3e6   : > { %v3320_v37 = vmax.f32 %v2363_v23, 0.0 }
 0x3e7   : > { %v4476_v55 = vperm.slane %v4167_v15, %v6537_v50  ;;  %v3018_v52 = vadd.f32 %v3017_v7, %v2689_v60  ;;  %3873 = vadd.xlane.f32.xlu2 %v3872_v17 }
 0x3e8   : > { %v3582_v56 = vmul.f32 %v6351_v63, %v3320_v37  ;;  %v7739_v37 = vld [vmem:[#allocation74_spill] sm:$0xff] }
 0x3e9   : > { %v4477_v48 = vsel %vm4429_vm7, %v4476_v55, %v4475_v45  ;;  %v3319_v61 = vmax.f32 %v3018_v52, 0.0  ;;  %v2036_v45 = vadd.f32 %v2035_v6, %v6337_v53 }
 0x3ea   : > { %v3832_v54 = vpop.xlane.xlu0 %3831 }
 0x3eb   : > { %v2040_v24 = vpop.f32.mrf.mxu2  ;;  %v2364_v40 = vpop.f32.mrf.mxu3  ;;  %v4168_v12 = vadd.f32 %v6453_v35, %v3832_v54  ;;  %v3581_v57 = vmul.f32 %v6353_v20, %v3319_v61 }
 0x3ec   : > { %v2691_v10 = vpop.f32.mrf.mxu0  ;;  %v2365_v41 = vadd.f32 %v2364_v40, %v2036_v45 }
 0x3ed   : > { %v4478_v36 = vperm.slane %v4168_v12, %v6546_v34  ;;  %v2692_v7 = vadd.f32 %v2691_v10, %v6341_v27  ;;  %v3025_v26 = vpop.f32.mrf.mxu1  ;;  %v3875_v42 = vadd.f32 %v3581_v57, %v3580_v4 }
 0x3ee   : > { %v3322_v60 = vmax.f32 %v2365_v41, 0.0 }
 0x3ef   : > { %v4479_v1 = vsel %vm4433_vm8, %v4478_v36, %v4477_v48  ;;  %v3021_v33 = vadd.f32 %v3020_v9, %v2692_v7  ;;  %2730 = vmatmul.bf16.gmra.mxu0 %v6261_v59  ;;  %3064 = vmatmul.bf16.gmra.mxu1 %v7737_v62 }
 0x3f0   : > { %2082 = vmatmul.bf16.gmra.mxu2 %v7738_v18  ;;  %2406 = vmatmul.bf16.gmra.mxu3 %v7737_v62  ;;  %v3584_v40 = vmul.f32 %v6351_v63, %v3322_v60 }
 0x3f1   : > { %v3321_v47 = vmax.f32 %v3021_v33, 0.0  ;;  %3876 = vadd.xlane.f32.xlu0 %v3875_v42  ;;  %v2041_v33 = vadd.f32 %v2040_v24, %v6337_v53 }
 0x3f3   : > { %v2043_v28 = vpop.f32.mrf.mxu2  ;;  %v2367_v8 = vpop.f32.mrf.mxu3  ;;  %v3583_v31 = vmul.f32 %v6353_v20, %v3321_v47 }
 0x3f4   : > { %v3835_v9 = vpop.xlane.xlu1 %3834  ;;  %v2693_v25 = vpop.f32.mrf.mxu0  ;;  %v2368_v48 = vadd.f32 %v2367_v8, %v2039_v13  ;;  %v2044_v60 = vadd.f32 %v2043_v28, %v6337_v53 }
 0x3f5   : > { %v4169_v59 = vadd.f32 %v6453_v35, %v3835_v9  ;;  %v2694_v0 = vadd.f32 %v2693_v25, %v6341_v27  ;;  %v3027_v5 = vpop.f32.mrf.mxu1  ;;  %v3878_v15 = vadd.f32 %v3583_v31, %v3582_v56 }
 0x3f6   : > { %v3324_v36 = vmax.f32 %v2368_v48, 0.0 }
 0x3f7   : > { %v4480_v6 = vperm.slane %v4169_v59, %v6561_v14  ;;  %v3023_v17 = vadd.f32 %v3022_v32, %v2694_v0  ;;  %3879 = vadd.xlane.f32.xlu1 %v3878_v15 }
 0x3f8   : > { %v3586_v45 = vmul.f32 %v6351_v63, %v3324_v36  ;;  %v7741_v36 = vld [vmem:[#allocation78_spill] sm:$0xff] }
 0x3f9   : > { %v4481_v55 = vsel %vm4437_vm9, %v4480_v6, %v4479_v1  ;;  %v3323_v52 = vmax.f32 %v3023_v17, 0.0  ;;  %v7740_v1 = vld [vmem:[#allocation77_spill] sm:$0xff] }
 0x3fa   : > { %v3838_v39 = vpop.xlane.xlu2 %3837 }
 0x3fb   : > { %v2045_v61 = vpop.f32.mrf.mxu2  ;;  %v2369_v54 = vpop.f32.mrf.mxu3  ;;  %v4170_v23 = vadd.f32 %v6453_v35, %v3838_v39  ;;  %v3585_v12 = vmul.f32 %v6353_v20, %v3323_v52 }
 0x3fc   : > { %v2696_v4 = vpop.f32.mrf.mxu0  ;;  %v2370_v47 = vadd.f32 %v2369_v54, %v2041_v33 }
 0x3fd   : > { %v4482_v57 = vperm.slane %v4170_v23, %v6570_v49  ;;  %v2697_v32 = vadd.f32 %v2696_v4, %v6341_v27  ;;  %v3030_v10 = vpop.f32.mrf.mxu1  ;;  %v3881_v44 = vadd.f32 %v3585_v12, %v3584_v40 }
 0x3fe   : > { %v3326_v0 = vmax.f32 %v2370_v47, 0.0 }
 0x3ff   : > { %v4483_v7 = vsel %vm4441_vm10, %v4482_v57, %v4481_v55  ;;  %v3026_v42 = vadd.f32 %v3025_v26, %v2697_v32  ;;  %2735 = vmatmul.bf16.gmra.mxu0 %v6281_v58  ;;  %3069 = vmatmul.bf16.gmra.mxu1 %v7739_v37 }
 0x400   : > { %2087 = vmatmul.bf16.gmra.mxu2 %v7740_v1  ;;  %2411 = vmatmul.bf16.gmra.mxu3 %v7739_v37  ;;  %v3588_v54 = vmul.f32 %v6351_v63, %v3326_v0 }
 0x401   : > { %v3325_v62 = vmax.f32 %v3026_v42, 0.0  ;;  %3882 = vadd.xlane.f32.xlu2 %v3881_v44  ;;  %v2046_v42 = vadd.f32 %v2045_v61, %v6337_v53 }
 0x403   : > { %v2048_v56 = vpop.f32.mrf.mxu2  ;;  %v2372_v41 = vpop.f32.mrf.mxu3  ;;  %v3587_v8 = vmul.f32 %v6353_v20, %v3325_v62 }
 0x404   : > { %v3841_v26 = vpop.xlane.xlu0 %3840  ;;  %v2698_v31 = vpop.f32.mrf.mxu0  ;;  %v2373_v55 = vadd.f32 %v2372_v41, %v2044_v60  ;;  %v2049_v0 = vadd.f32 %v2048_v56, %v6337_v53 }
 0x405   : > { %v4171_v58 = vadd.f32 %v6453_v35, %v3841_v26  ;;  %v2699_v9 = vadd.f32 %v2698_v31, %v6341_v27  ;;  %v3032_v25 = vpop.f32.mrf.mxu1  ;;  %v3884_v59 = vadd.f32 %v3587_v8, %v3586_v45 }
 0x406   : > { %v3328_v57 = vmax.f32 %v2373_v55, 0.0 }
 0x407   : > { %v4484_v24 = vperm.slane %v4171_v58, %v6585_v38  ;;  %v3028_v15 = vadd.f32 %v3027_v5, %v2699_v9  ;;  %3885 = vadd.xlane.f32.xlu0 %v3884_v59 }
 0x408   : > { %v3590_v33 = vmul.f32 %v6351_v63, %v3328_v57  ;;  %v7743_v57 = vld [vmem:[#allocation7_spill] sm:$0xff] }
 0x409   : > { %v4485_v6 = vsel %vm4445_vm11, %v4484_v24, %v4483_v7  ;;  %v3327_v17 = vmax.f32 %v3028_v15, 0.0  ;;  %v7742_v7 = vld [vmem:[#allocation80_spill] sm:$0xff] }
 0x40a   : > { %v3844_v13 = vpop.xlane.xlu1 %3843 }
 0x40b   : > { %v2050_v52 = vpop.f32.mrf.mxu2  ;;  %v2374_v39 = vpop.f32.mrf.mxu3  ;;  %v4172_v48 = vadd.f32 %v6453_v35, %v3844_v13  ;;  %v3589_v23 = vmul.f32 %v6353_v20, %v3327_v17 }
 0x40c   : > { %v2701_v40 = vpop.f32.mrf.mxu0  ;;  %v2375_v62 = vadd.f32 %v2374_v39, %v2046_v42 }
 0x40d   : > { %v4486_v12 = vperm.slane %v4172_v48, %v6594_v43  ;;  %v2702_v5 = vadd.f32 %v2701_v40, %v6341_v27  ;;  %v3035_v4 = vpop.f32.mrf.mxu1  ;;  %v3887_v28 = vadd.f32 %v3589_v23, %v3588_v54 }
 0x40e   : > { %v3330_v9 = vmax.f32 %v2375_v62, 0.0 }
 0x40f   : > { %v4487_v32 = vsel %vm4449_vm12, %v4486_v12, %v4485_v6  ;;  %v3031_v44 = vadd.f32 %v3030_v10, %v2702_v5  ;;  %2740 = vmatmul.bf16.gmra.mxu0 %v7738_v18  ;;  %3074 = vmatmul.bf16.gmra.mxu1 %v7741_v36 }
 0x410   : > { %2092 = vmatmul.bf16.gmra.mxu2 %v7742_v7  ;;  %2416 = vmatmul.bf16.gmra.mxu3 %v7741_v36  ;;  %v3592_v39 = vmul.f32 %v6351_v63, %v3330_v9 }
 0x411   : > { %v3329_v37 = vmax.f32 %v3031_v44, 0.0  ;;  %3888 = vadd.xlane.f32.xlu1 %v3887_v28  ;;  %v2051_v44 = vadd.f32 %v2050_v52, %v6337_v53 }
 0x413   : > { %v2053_v45 = vpop.f32.mrf.mxu2  ;;  %v2377_v47 = vpop.f32.mrf.mxu3  ;;  %v3591_v41 = vmul.f32 %v6353_v20, %v3329_v37 }
 0x414   : > { %v3847_v10 = vpop.xlane.xlu2 %3846  ;;  %v2703_v8 = vpop.f32.mrf.mxu0  ;;  %v2378_v6 = vadd.f32 %v2377_v47, %v2049_v0  ;;  %v2054_v9 = vadd.f32 %v2053_v45, %v6337_v53 }
 0x415   : > { %v4173_v18 = vadd.f32 %v6453_v35, %v3847_v10  ;;  %v2704_v26 = vadd.f32 %v2703_v8, %v6341_v27  ;;  %v3037_v31 = vpop.f32.mrf.mxu1  ;;  %v3890_v58 = vadd.f32 %v3591_v41, %v3590_v33 }
 0x416   : > { %v3332_v12 = vmax.f32 %v2378_v6, 0.0 }
 0x417   : > { %v4488_v61 = vperm.slane %v4173_v18, %v6609_v30  ;;  %v3033_v59 = vadd.f32 %v3032_v25, %v2704_v26  ;;  %3891 = vadd.xlane.f32.xlu2 %v3890_v58 }
 0x418   : > { %v3594_v42 = vmul.f32 %v6351_v63, %v3332_v12 }
 0x419   : > { %v4489_v24 = vsel %vm4453_vm13, %v4488_v61, %v4487_v32  ;;  %v3331_v15 = vmax.f32 %v3033_v59, 0.0  ;;  %v7744_v32 = vld [vmem:[#allocation6_spill] sm:$0xff] }
 0x41a   : > { %v3850_v60 = vpop.xlane.xlu0 %3849 }
 0x41b   : > { %v2055_v17 = vpop.f32.mrf.mxu2  ;;  %v2379_v13 = vpop.f32.mrf.mxu3  ;;  %v4174_v55 = vadd.f32 %v6453_v35, %v3850_v60  ;;  %v3593_v48 = vmul.f32 %v6353_v20, %v3331_v15 }
 0x41c   : > { %v2706_v54 = vpop.f32.mrf.mxu0  ;;  %v2380_v37 = vadd.f32 %v2379_v13, %v2051_v44 }
 0x41d   : > { %v4490_v23 = vperm.slane %v4174_v55, %v6618_v22  ;;  %v2707_v25 = vadd.f32 %v2706_v54, %v6341_v27  ;;  %v3040_v40 = vpop.f32.mrf.mxu1  ;;  %v3893_v56 = vadd.f32 %v3593_v48, %v3592_v39 }
 0x41e   : > { %v3334_v26 = vmax.f32 %v2380_v37, 0.0 }
 0x41f   : > { %v4491_v5 = vsel %vm4457_vm14, %v4490_v23, %v4489_v24  ;;  %v3036_v28 = vadd.f32 %v3035_v4, %v2707_v25  ;;  %2745 = vmatmul.bf16.gmra.mxu0 %v7740_v1  ;;  %3079 = vmatmul.bf16.gmra.mxu1 %v7743_v57  ;;  %v7745_v23 = vld [vmem:[#allocation9_spill] sm:$0xff]  ;;  %v7746_v25 = vld [vmem:[#allocation8_spill] sm:$0xff] }
 0x420   : > { %2097 = vmatmul.bf16.gmra.mxu2 %v7744_v32  ;;  %2421 = vmatmul.bf16.gmra.mxu3 %v7743_v57  ;;  %v3596_v6 = vmul.f32 %v6351_v63, %v3334_v26 }
 0x421   : > { %v3333_v36 = vmax.f32 %v3036_v28, 0.0  ;;  %3894 = vadd.xlane.f32.xlu0 %v3893_v56  ;;  %v2056_v56 = vadd.f32 %v2055_v17, %v6337_v53 }
 0x423   : > { %v2058_v33 = vpop.f32.mrf.mxu2  ;;  %v2382_v62 = vpop.f32.mrf.mxu3  ;;  %v3595_v47 = vmul.f32 %v6353_v20, %v3333_v36 }
 0x424   : > { %v3853_v4 = vpop.xlane.xlu1 %3852  ;;  %v2708_v41 = vpop.f32.mrf.mxu0  ;;  %v2383_v24 = vadd.f32 %v2382_v62, %v2054_v9 }
 0x425   : > { %v4175_v1 = vadd.f32 %v6453_v35, %v3853_v4  ;;  %v2709_v10 = vadd.f32 %v2708_v41, %v6341_v27  ;;  %v3042_v8 = vpop.f32.mrf.mxu1  ;;  %v3896_v18 = vadd.f32 %v3595_v47, %v3594_v42 }
 0x426   : > { %v3336_v54 = vmax.f32 %v2383_v24, 0.0 }
 0x427   : > { %v4492_v52 = vperm.slane %v4175_v1, %v6633_v29  ;;  %v3038_v58 = vadd.f32 %v3037_v31, %v2709_v10  ;;  %3897 = vadd.xlane.f32.xlu1 %v3896_v18  ;;  %v2059_v18 = vadd.f32 %v2058_v33, %v6337_v53 }
 0x429   : > { %v4493_v61 = vsel %vm4461_vm15, %v4492_v52, %v4491_v5  ;;  %v3335_v59 = vmax.f32 %v3038_v58, 0.0  ;;  %v3598_v5 = vmul.f32 %v6351_v63, %v3336_v54 }
 0x42a   : > { %v6787_v0 = vsel %vm4680_vm0, %v4493_v61, %v6641_v19  ;;  %v3856_v19 = vpop.xlane.xlu2 %3855  ;;  %vm4682_vm0 = vcmask 1042434  }
 0x42b   : > { %v2060_v15 = vpop.f32.mrf.mxu2  ;;  %v2384_v60 = vpop.f32.mrf.mxu3  ;;  %v3597_v13 = vmul.f32 %v6353_v20, %v3335_v59  ;;  %v4176_v57 = vadd.f32 %v6453_v35, %v3856_v19  ;;  %v7748_v19 = vld [vmem:[#allocation10_spill] sm:$0xff] }
 0x42c   : > { %v2711_v55 = vpop.f32.mrf.mxu0  ;;  %v2385_v28 = vadd.f32 %v2384_v60, %v2056_v56  ;;  %v2061_v56 = vadd.f32 %v2060_v15, %v6337_v53 }
 0x42d   : > { %v2712_v39 = vadd.f32 %v2711_v55, %v6341_v27  ;;  %v3045_v31 = vpop.f32.mrf.mxu1  ;;  %v3899_v48 = vadd.f32 %v3597_v13, %v3596_v6  ;;  %v4494_v41 = vperm.slane %v4176_v57, %v6455_v2 }
 0x42e   : > { %v3338_v17 = vmax.f32 %v2385_v28, 0.0 }
 0x42f   : > { %v3041_v45 = vadd.f32 %v3040_v40, %v2712_v39  ;;  %2750 = vmatmul.bf16.gmra.mxu0 %v7742_v7  ;;  %3084 = vmatmul.bf16.gmra.mxu1 %v7745_v23 }
 0x430   : > { %2102 = vmatmul.bf16.gmra.mxu2 %v7746_v25  ;;  %2426 = vmatmul.bf16.gmra.mxu3 %v7745_v23  ;;  %v3600_v60 = vmul.f32 %v6351_v63, %v3338_v17  ;;  %v7747_v23 = vld [vmem:[#allocation11_spill] sm:$0xff] }
 0x431   : > { %v3337_v12 = vmax.f32 %v3041_v45, 0.0  ;;  %3900 = vadd.xlane.f32.xlu2 %v3899_v48 }
 0x433   : > { %v2063_v44 = vpop.f32.mrf.mxu2  ;;  %v2387_v40 = vpop.f32.mrf.mxu3  ;;  %v3599_v7 = vmul.f32 %v6353_v20, %v3337_v12 }
 0x434   : > { %v3859_v36 = vpop.xlane.xlu0 %3858  ;;  %v2713_v42 = vpop.f32.mrf.mxu0  ;;  %v2388_v9 = vadd.f32 %v2387_v40, %v2059_v18 }
 0x435   : > { %v4177_v37 = vadd.f32 %v6453_v35, %v3859_v36  ;;  %v2714_v62 = vadd.f32 %v2713_v42, %v6341_v27  ;;  %v3047_v47 = vpop.f32.mrf.mxu1  ;;  %v3902_v4 = vadd.f32 %v3599_v7, %v3598_v5 }
 0x436   : > { %v3340_v48 = vmax.f32 %v2388_v9, 0.0 }
 0x437   : > { %v4495_v1 = vperm.slane %v4177_v37, %v6461_v21  ;;  %v3043_v10 = vadd.f32 %v3042_v8, %v2714_v62  ;;  %3903 = vadd.xlane.f32.xlu0 %v3902_v4 }
 0x438   : > { %v3602_v5 = vmul.f32 %v6351_v63, %v3340_v48  ;;  %v7749_v48 = vld [vmem:[#allocation13_spill] sm:$0xff] }
 0x439   : > { %v4496_v26 = vsel %vm4405_vm1, %v4495_v1, %v4494_v41  ;;  %v3339_v52 = vmax.f32 %v3043_v10, 0.0  ;;  %v2064_v41 = vadd.f32 %v2063_v44, %v6337_v53 }
 0x43a   : > { %v3862_v58 = vpop.xlane.xlu1 %3861 }
 0x43b   : > { %v2065_v61 = vpop.f32.mrf.mxu2  ;;  %v2389_v59 = vpop.f32.mrf.mxu3  ;;  %v4178_v24 = vadd.f32 %v6453_v35, %v3862_v58  ;;  %v3601_v6 = vmul.f32 %v6353_v20, %v3339_v52 }
 0x43c   : > { %v2716_v13 = vpop.f32.mrf.mxu0  ;;  %v2390_v28 = vadd.f32 %v2389_v59, %v2061_v56 }
 0x43d   : > { %v4497_v55 = vperm.slane %v4178_v24, %v6473_v46  ;;  %v2717_v8 = vadd.f32 %v2716_v13, %v6341_v27  ;;  %v3050_v39 = vpop.f32.mrf.mxu1  ;;  %v3905_v33 = vadd.f32 %v3601_v6, %v3600_v60 }
 0x43e   : > { %v3342_v4 = vmax.f32 %v2390_v28, 0.0 }
 0x43f   : > { %v4498_v54 = vsel %vm4409_vm2, %v4497_v55, %v4496_v26  ;;  %v3046_v45 = vadd.f32 %v3045_v31, %v2717_v8  ;;  %2755 = vmatmul.bf16.gmra.mxu0 %v7744_v32  ;;  %3089 = vmatmul.bf16.gmra.mxu1 %v7747_v23 }
 0x440   : > { %2107 = vmatmul.bf16.gmra.mxu2 %v7748_v19  ;;  %2431 = vmatmul.bf16.gmra.mxu3 %v7747_v23  ;;  %v3604_v59 = vmul.f32 %v6351_v63, %v3342_v4 }
 0x441   : > { %v3341_v12 = vmax.f32 %v3046_v45, 0.0  ;;  %3906 = vadd.xlane.f32.xlu1 %v3905_v33  ;;  %v2066_v45 = vadd.f32 %v2065_v61, %v6337_v53 }
 0x443   : > { %v2068_v57 = vpop.f32.mrf.mxu2  ;;  %v2392_v40 = vpop.f32.mrf.mxu3  ;;  %v3603_v7 = vmul.f32 %v6353_v20, %v3341_v12 }
 0x444   : > { %v3865_v31 = vpop.xlane.xlu2 %3864  ;;  %v2718_v36 = vpop.f32.mrf.mxu0  ;;  %v2393_v26 = vadd.f32 %v2392_v40, %v2064_v41  ;;  %v2069_v4 = vadd.f32 %v2068_v57, %v6337_v53 }
 0x445   : > { %v4179_v32 = vadd.f32 %v6453_v35, %v3865_v31  ;;  %v2719_v42 = vadd.f32 %v2718_v36, %v6341_v27  ;;  %v3052_v37 = vpop.f32.mrf.mxu1  ;;  %v3908_v62 = vadd.f32 %v3603_v7, %v3602_v5 }
 0x446   : > { %v3344_v55 = vmax.f32 %v2393_v26, 0.0 }
 0x447   : > { %v4499_v15 = vperm.slane %v4179_v32, %v6489_v51  ;;  %v3048_v17 = vadd.f32 %v3047_v47, %v2719_v42  ;;  %3909 = vadd.xlane.f32.xlu2 %v3908_v62 }
 0x448   : > { %v3606_v56 = vmul.f32 %v6351_v63, %v3344_v55  ;;  %v7751_v55 = vld [vmem:[#allocation15_spill] sm:$0xff] }
 0x449   : > { %v4500_v1 = vsel %vm4413_vm3, %v4499_v15, %v4498_v54  ;;  %v3343_v10 = vmax.f32 %v3048_v17, 0.0  ;;  %v7750_v54 = vld [vmem:[#allocation12_spill] sm:$0xff] }
 0x44a   : > { %v3868_v18 = vpop.xlane.xlu0 %3867 }
 0x44b   : > { %v2070_v52 = vpop.f32.mrf.mxu2  ;;  %v2394_v58 = vpop.f32.mrf.mxu3  ;;  %v4180_v9 = vadd.f32 %v6453_v35, %v3868_v18  ;;  %v3605_v24 = vmul.f32 %v6353_v20, %v3343_v10 }
 0x44c   : > { %v2721_v60 = vpop.f32.mrf.mxu0  ;;  %v2395_v12 = vadd.f32 %v2394_v58, %v2066_v45 }
 0x44d   : > { %v4501_v6 = vperm.slane %v4180_v9, %v6498_v3  ;;  %v2722_v47 = vadd.f32 %v2721_v60, %v6341_v27  ;;  %v3055_v13 = vpop.f32.mrf.mxu1  ;;  %v3911_v44 = vadd.f32 %v3605_v24, %v3604_v59 }
 0x44e   : > { %v3346_v42 = vmax.f32 %v2395_v12, 0.0 }
 0x44f   : > { %v4502_v8 = vsel %vm4417_vm4, %v4501_v6, %v4500_v1  ;;  %v3051_v33 = vadd.f32 %v3050_v39, %v2722_v47  ;;  %2760 = vmatmul.bf16.gmra.mxu0 %v7746_v25  ;;  %3094 = vmatmul.bf16.gmra.mxu1 %v7749_v48 }
 0x450   : > { %2112 = vmatmul.bf16.gmra.mxu2 %v7750_v54  ;;  %2436 = vmatmul.bf16.gmra.mxu3 %v7749_v48  ;;  %v3608_v58 = vmul.f32 %v6351_v63, %v3346_v42 }
 0x451   : > { %v3345_v23 = vmax.f32 %v3051_v33, 0.0  ;;  %3912 = vadd.xlane.f32.xlu0 %v3911_v44  ;;  %v2071_v33 = vadd.f32 %v2070_v52, %v6337_v53 }
 0x453   : > { %v2073_v5 = vpop.f32.mrf.mxu2  ;;  %v2397_v28 = vpop.f32.mrf.mxu3  ;;  %v3607_v40 = vmul.f32 %v6353_v20, %v3345_v23 }
 0x454   : > { %v3871_v39 = vpop.xlane.xlu1 %3870  ;;  %v2723_v7 = vpop.f32.mrf.mxu0  ;;  %v2398_v1 = vadd.f32 %v2397_v28, %v2069_v4  ;;  %v2074_v42 = vadd.f32 %v2073_v5, %v6337_v53 }
 0x455   : > { %v4181_v25 = vadd.f32 %v6453_v35, %v3871_v39  ;;  %v2724_v31 = vadd.f32 %v2723_v7, %v6341_v27  ;;  %v3057_v36 = vpop.f32.mrf.mxu1  ;;  %v3914_v32 = vadd.f32 %v3607_v40, %v3606_v56 }
 0x456   : > { %v3348_v6 = vmax.f32 %v2398_v1, 0.0 }
 0x457   : > { %v4503_v61 = vperm.slane %v4181_v25, %v6513_v16  ;;  %v3053_v62 = vadd.f32 %v3052_v37, %v2724_v31  ;;  %3915 = vadd.xlane.f32.xlu1 %v3914_v32 }
 0x458   : > { %v3610_v45 = vmul.f32 %v6351_v63, %v3348_v6  ;;  %v7753_v6 = vld [vmem:[#allocation17_spill] sm:$0xff] }
 0x459   : > { %v4504_v15 = vsel %vm4421_vm5, %v4503_v61, %v4502_v8  ;;  %v3347_v17 = vmax.f32 %v3053_v62, 0.0  ;;  %v7752_v8 = vld [vmem:[#allocation14_spill] sm:$0xff] }
 0x45a   : > { %v3874_v41 = vpop.xlane.xlu2 %3873 }
 0x45b   : > { %v2075_v10 = vpop.f32.mrf.mxu2  ;;  %v2399_v18 = vpop.f32.mrf.mxu3  ;;  %v4182_v26 = vadd.f32 %v6453_v35, %v3874_v41  ;;  %v3609_v9 = vmul.f32 %v6353_v20, %v3347_v17 }
 0x45c   : > { %v2726_v59 = vpop.f32.mrf.mxu0  ;;  %v2400_v23 = vadd.f32 %v2399_v18, %v2071_v33 }
 0x45d   : > { %v4505_v24 = vperm.slane %v4182_v26, %v6522_v11  ;;  %v2727_v37 = vadd.f32 %v2726_v59, %v6341_v27  ;;  %v3060_v60 = vpop.f32.mrf.mxu1  ;;  %v3917_v57 = vadd.f32 %v3609_v9, %v3608_v58 }
 0x45e   : > { %v3350_v31 = vmax.f32 %v2400_v23, 0.0 }
 0x45f   : > { %v4506_v47 = vsel %vm4425_vm6, %v4505_v24, %v4504_v15  ;;  %v3056_v44 = vadd.f32 %v3055_v13, %v2727_v37  ;;  %2765 = vmatmul.bf16.gmra.mxu0 %v7748_v19  ;;  %3099 = vmatmul.bf16.gmra.mxu1 %v7751_v55 }
 0x460   : > { %2117 = vmatmul.bf16.gmra.mxu2 %v7752_v8  ;;  %2441 = vmatmul.bf16.gmra.mxu3 %v7751_v55  ;;  %v3612_v18 = vmul.f32 %v6351_v63, %v3350_v31 }
 0x461   : > { %v3349_v48 = vmax.f32 %v3056_v44, 0.0  ;;  %3918 = vadd.xlane.f32.xlu2 %v3917_v57  ;;  %v2076_v44 = vadd.f32 %v2075_v10, %v6337_v53 }
 0x463   : > { %v2078_v56 = vpop.f32.mrf.mxu2  ;;  %v2402_v12 = vpop.f32.mrf.mxu3  ;;  %v3611_v28 = vmul.f32 %v6353_v20, %v3349_v48 }
 0x464   : > { %v3877_v13 = vpop.xlane.xlu0 %3876  ;;  %v2728_v40 = vpop.f32.mrf.mxu0  ;;  %v2403_v15 = vadd.f32 %v2402_v12, %v2074_v42  ;;  %v2079_v31 = vadd.f32 %v2078_v56, %v6337_v53 }
 0x465   : > { %v4183_v19 = vadd.f32 %v6453_v35, %v3877_v13  ;;  %v2729_v39 = vadd.f32 %v2728_v40, %v6341_v27  ;;  %v3062_v7 = vpop.f32.mrf.mxu1  ;;  %v3920_v25 = vadd.f32 %v3611_v28, %v3610_v45 }
 0x466   : > { %v3352_v24 = vmax.f32 %v2403_v15, 0.0 }
 0x467   : > { %v4507_v52 = vperm.slane %v4183_v19, %v6537_v50  ;;  %v3058_v32 = vadd.f32 %v3057_v36, %v2729_v39  ;;  %3921 = vadd.xlane.f32.xlu0 %v3920_v25 }
 0x468   : > { %v3614_v33 = vmul.f32 %v6351_v63, %v3352_v24  ;;  %v7755_v24 = vld [vmem:[#allocation19_spill] sm:$0xff] }
 0x469   : > { %v4508_v61 = vsel %vm4429_vm7, %v4507_v52, %v4506_v47  ;;  %v3351_v62 = vmax.f32 %v3058_v32, 0.0  ;;  %v7754_v47 = vld [vmem:[#allocation16_spill] sm:$0xff] }
 0x46a   : > { %v3880_v4 = vpop.xlane.xlu1 %3879 }
 0x46b   : > { %v2080_v17 = vpop.f32.mrf.mxu2  ;;  %v2404_v41 = vpop.f32.mrf.mxu3  ;;  %v4184_v1 = vadd.f32 %v6453_v35, %v3880_v4  ;;  %v3613_v26 = vmul.f32 %v6353_v20, %v3351_v62 }
 0x46c   : > { %v2731_v58 = vpop.f32.mrf.mxu0  ;;  %v2405_v48 = vadd.f32 %v2404_v41, %v2076_v44 }
 0x46d   : > { %v4509_v9 = vperm.slane %v4184_v1, %v6546_v34  ;;  %v2732_v36 = vadd.f32 %v2731_v58, %v6341_v27  ;;  %v3065_v59 = vpop.f32.mrf.mxu1  ;;  %v3923_v5 = vadd.f32 %v3613_v26, %v3612_v18 }
 0x46e   : > { %v3354_v39 = vmax.f32 %v2405_v48, 0.0 }
 0x46f   : > { %v4510_v37 = vsel %vm4433_vm8, %v4509_v9, %v4508_v61  ;;  %v3061_v57 = vadd.f32 %v3060_v60, %v2732_v36  ;;  %2770 = vmatmul.bf16.gmra.mxu0 %v7750_v54  ;;  %3104 = vmatmul.bf16.gmra.mxu1 %v7753_v6 }
 0x470   : > { %2122 = vmatmul.bf16.gmra.mxu2 %v7754_v47  ;;  %2446 = vmatmul.bf16.gmra.mxu3 %v7753_v6  ;;  %v3616_v41 = vmul.f32 %v6351_v63, %v3354_v39 }
 0x471   : > { %v3353_v55 = vmax.f32 %v3061_v57, 0.0  ;;  %3924 = vadd.xlane.f32.xlu1 %v3923_v5  ;;  %v2081_v57 = vadd.f32 %v2080_v17, %v6337_v53 }
 0x473   : > { %v2083_v45 = vpop.f32.mrf.mxu2  ;;  %v2407_v23 = vpop.f32.mrf.mxu3  ;;  %v3615_v12 = vmul.f32 %v6353_v20, %v3353_v55 }
 0x474   : > { %v3883_v60 = vpop.xlane.xlu2 %3882  ;;  %v2733_v28 = vpop.f32.mrf.mxu0  ;;  %v2408_v61 = vadd.f32 %v2407_v23, %v2079_v31  ;;  %v2084_v39 = vadd.f32 %v2083_v45, %v6337_v53 }
 0x475   : > { %v4185_v54 = vadd.f32 %v6453_v35, %v3883_v60  ;;  %v2734_v13 = vadd.f32 %v2733_v28, %v6341_v27  ;;  %v3067_v40 = vpop.f32.mrf.mxu1  ;;  %v3926_v19 = vadd.f32 %v3615_v12, %v3614_v33 }
 0x476   : > { %v3356_v9 = vmax.f32 %v2408_v61, 0.0 }
 0x477   : > { %v4511_v10 = vperm.slane %v4185_v54, %v6561_v14  ;;  %v3063_v25 = vadd.f32 %v3062_v7, %v2734_v13  ;;  %3927 = vadd.xlane.f32.xlu2 %v3926_v19 }
 0x478   : > { %v3618_v44 = vmul.f32 %v6351_v63, %v3356_v9  ;;  %v7757_v9 = vld [vmem:[#allocation21_spill] sm:$0xff] }
 0x479   : > { %v4512_v52 = vsel %vm4437_vm9, %v4511_v10, %v4510_v37  ;;  %v3355_v32 = vmax.f32 %v3063_v25, 0.0  ;;  %v7756_v37 = vld [vmem:[#allocation18_spill] sm:$0xff] }
 0x47a   : > { %v3886_v42 = vpop.xlane.xlu0 %3885 }
 0x47b   : > { %v2085_v62 = vpop.f32.mrf.mxu2  ;;  %v2409_v4 = vpop.f32.mrf.mxu3  ;;  %v4186_v15 = vadd.f32 %v6453_v35, %v3886_v42  ;;  %v3617_v1 = vmul.f32 %v6353_v20, %v3355_v32 }
 0x47c   : > { %v2736_v18 = vpop.f32.mrf.mxu0  ;;  %v2410_v55 = vadd.f32 %v2409_v4, %v2081_v57 }
 0x47d   : > { %v4513_v26 = vperm.slane %v4186_v15, %v6570_v49  ;;  %v2737_v7 = vadd.f32 %v2736_v18, %v6341_v27  ;;  %v3070_v58 = vpop.f32.mrf.mxu1  ;;  %v3929_v56 = vadd.f32 %v3617_v1, %v3616_v41 }
 0x47e   : > { %v3358_v13 = vmax.f32 %v2410_v55, 0.0 }
 0x47f   : > { %v4514_v36 = vsel %vm4441_vm10, %v4513_v26, %v4512_v52  ;;  %v3066_v5 = vadd.f32 %v3065_v59, %v2737_v7  ;;  %2775 = vmatmul.bf16.gmra.mxu0 %v7752_v8  ;;  %3109 = vmatmul.bf16.gmra.mxu1 %v7755_v24 }
 0x480   : > { %2127 = vmatmul.bf16.gmra.mxu2 %v7756_v37  ;;  %2451 = vmatmul.bf16.gmra.mxu3 %v7755_v24  ;;  %v3620_v4 = vmul.f32 %v6351_v63, %v3358_v13 }
 0x481   : > { %v3357_v6 = vmax.f32 %v3066_v5, 0.0  ;;  %3930 = vadd.xlane.f32.xlu0 %v3929_v56  ;;  %v2086_v5 = vadd.f32 %v2085_v62, %v6337_v53 }
 0x483   : > { %v2088_v33 = vpop.f32.mrf.mxu2  ;;  %v2412_v48 = vpop.f32.mrf.mxu3  ;;  %v3619_v23 = vmul.f32 %v6353_v20, %v3357_v6 }
 0x484   : > { %v3889_v59 = vpop.xlane.xlu1 %3888  ;;  %v2738_v12 = vpop.f32.mrf.mxu0  ;;  %v2413_v52 = vadd.f32 %v2412_v48, %v2084_v39  ;;  %v2089_v13 = vadd.f32 %v2088_v33, %v6337_v53 }
 0x485   : > { %v4187_v8 = vadd.f32 %v6453_v35, %v3889_v59  ;;  %v2739_v60 = vadd.f32 %v2738_v12, %v6341_v27  ;;  %v3072_v28 = vpop.f32.mrf.mxu1  ;;  %v3932_v54 = vadd.f32 %v3619_v23, %v3618_v44 }
 0x486   : > { %v3360_v26 = vmax.f32 %v2413_v52, 0.0 }
 0x487   : > { %v4515_v17 = vperm.slane %v4187_v8, %v6585_v38  ;;  %v3068_v19 = vadd.f32 %v3067_v40, %v2739_v60  ;;  %3933 = vadd.xlane.f32.xlu1 %v3932_v54 }
 0x488   : > { %v3622_v57 = vmul.f32 %v6351_v63, %v3360_v26  ;;  %v7759_v26 = vld [vmem:[#allocation23_spill] sm:$0xff] }
 0x489   : > { %v4516_v10 = vsel %vm4445_vm11, %v4515_v17, %v4514_v36  ;;  %v3359_v25 = vmax.f32 %v3068_v19, 0.0  ;;  %v7758_v36 = vld [vmem:[#allocation20_spill] sm:$0xff] }
 0x48a   : > { %v3892_v31 = vpop.xlane.xlu2 %3891 }
 0x48b   : > { %v2090_v32 = vpop.f32.mrf.mxu2  ;;  %v2414_v42 = vpop.f32.mrf.mxu3  ;;  %v4188_v61 = vadd.f32 %v6453_v35, %v3892_v31  ;;  %v3621_v15 = vmul.f32 %v6353_v20, %v3359_v25 }
 0x48c   : > { %v2741_v41 = vpop.f32.mrf.mxu0  ;;  %v2415_v6 = vadd.f32 %v2414_v42, %v2086_v5 }
 0x48d   : > { %v4517_v1 = vperm.slane %v4188_v61, %v6594_v43  ;;  %v2742_v40 = vadd.f32 %v2741_v41, %v6341_v27  ;;  %v3075_v18 = vpop.f32.mrf.mxu1  ;;  %v3935_v45 = vadd.f32 %v3621_v15, %v3620_v4 }
 0x48e   : > { %v3362_v60 = vmax.f32 %v2415_v6, 0.0 }
 0x48f   : > { %v4518_v7 = vsel %vm4449_vm12, %v4517_v1, %v4516_v10  ;;  %v3071_v56 = vadd.f32 %v3070_v58, %v2742_v40  ;;  %2780 = vmatmul.bf16.gmra.mxu0 %v7754_v47  ;;  %3114 = vmatmul.bf16.gmra.mxu1 %v7757_v9 }
 0x490   : > { %2132 = vmatmul.bf16.gmra.mxu2 %v7758_v36  ;;  %2456 = vmatmul.bf16.gmra.mxu3 %v7757_v9  ;;  %v3624_v42 = vmul.f32 %v6351_v63, %v3362_v60 }
 0x491   : > { %v3361_v24 = vmax.f32 %v3071_v56, 0.0  ;;  %3936 = vadd.xlane.f32.xlu2 %v3935_v45  ;;  %v2091_v56 = vadd.f32 %v2090_v32, %v6337_v53 }
 0x493   : > { %v2093_v44 = vpop.f32.mrf.mxu2  ;;  %v2417_v55 = vpop.f32.mrf.mxu3  ;;  %v3623_v48 = vmul.f32 %v6353_v20, %v3361_v24 }
 0x494   : > { %v3895_v58 = vpop.xlane.xlu0 %3894  ;;  %v2743_v23 = vpop.f32.mrf.mxu0  ;;  %v2418_v10 = vadd.f32 %v2417_v55, %v2089_v13  ;;  %v2094_v60 = vadd.f32 %v2093_v44, %v6337_v53 }
 0x495   : > { %v4189_v47 = vadd.f32 %v6453_v35, %v3895_v58  ;;  %v2744_v59 = vadd.f32 %v2743_v23, %v6341_v27  ;;  %v3077_v12 = vpop.f32.mrf.mxu1  ;;  %v3938_v8 = vadd.f32 %v3623_v48, %v3622_v57 }
 0x496   : > { %v3364_v1 = vmax.f32 %v2418_v10, 0.0 }
 0x497   : > { %v4519_v62 = vperm.slane %v4189_v47, %v6609_v30  ;;  %v3073_v54 = vadd.f32 %v3072_v28, %v2744_v59  ;;  %3939 = vadd.xlane.f32.xlu0 %v3938_v8 }
 0x498   : > { %v3626_v5 = vmul.f32 %v6351_v63, %v3364_v1 }
 0x499   : > { %v4520_v17 = vsel %vm4453_vm13, %v4519_v62, %v4518_v7  ;;  %v3363_v19 = vmax.f32 %v3073_v54, 0.0  ;;  %v7760_v7 = vld [vmem:[#allocation22_spill] sm:$0xff] }
 0x49a   : > { %v3898_v39 = vpop.xlane.xlu1 %3897 }
 0x49b   : > { %v2095_v25 = vpop.f32.mrf.mxu2  ;;  %v2419_v31 = vpop.f32.mrf.mxu3  ;;  %v4190_v52 = vadd.f32 %v6453_v35, %v3898_v39  ;;  %v3625_v61 = vmul.f32 %v6353_v20, %v3363_v19 }
 0x49c   : > { %v2746_v4 = vpop.f32.mrf.mxu0  ;;  %v2420_v24 = vadd.f32 %v2419_v31, %v2091_v56 }
 0x49d   : > { %v4521_v15 = vperm.slane %v4190_v52, %v6618_v22  ;;  %v2747_v28 = vadd.f32 %v2746_v4, %v6341_v27  ;;  %v3080_v41 = vpop.f32.mrf.mxu1  ;;  %v3941_v33 = vadd.f32 %v3625_v61, %v3624_v42 }
 0x49e   : > { %v3366_v59 = vmax.f32 %v2420_v24, 0.0 }
 0x49f   : > { %v4522_v40 = vsel %vm4457_vm14, %v4521_v15, %v4520_v17  ;;  %v3076_v45 = vadd.f32 %v3075_v18, %v2747_v28  ;;  %2785 = vmatmul.bf16.gmra.mxu0 %v7756_v37  ;;  %3119 = vmatmul.bf16.gmra.mxu1 %v7759_v26  ;;  %v7761_v15 = vld [vmem:[#allocation25_spill] sm:$0xff]  ;;  %v7762_v28 = vld [vmem:[#allocation24_spill] sm:$0xff] }
 0x4a0   : > { %2137 = vmatmul.bf16.gmra.mxu2 %v7760_v7  ;;  %2461 = vmatmul.bf16.gmra.mxu3 %v7759_v26  ;;  %v3628_v10 = vmul.f32 %v6351_v63, %v3366_v59 }
 0x4a1   : > { %v3365_v9 = vmax.f32 %v3076_v45, 0.0  ;;  %3942 = vadd.xlane.f32.xlu1 %v3941_v33  ;;  %v2096_v33 = vadd.f32 %v2095_v25, %v6337_v53 }
 0x4a3   : > { %v2098_v57 = vpop.f32.mrf.mxu2  ;;  %v2422_v6 = vpop.f32.mrf.mxu3  ;;  %v3627_v55 = vmul.f32 %v6353_v20, %v3365_v9 }
 0x4a4   : > { %v3901_v18 = vpop.xlane.xlu2 %3900  ;;  %v2748_v48 = vpop.f32.mrf.mxu0  ;;  %v2423_v17 = vadd.f32 %v2422_v6, %v2094_v60 }
 0x4a5   : > { %v4191_v37 = vadd.f32 %v6453_v35, %v3901_v18  ;;  %v2749_v58 = vadd.f32 %v2748_v48, %v6341_v27  ;;  %v3082_v23 = vpop.f32.mrf.mxu1  ;;  %v3944_v47 = vadd.f32 %v3627_v55, %v3626_v5 }
 0x4a6   : > { %v3368_v4 = vmax.f32 %v2423_v17, 0.0 }
 0x4a7   : > { %v4523_v32 = vperm.slane %v4191_v37, %v6633_v29  ;;  %v3078_v8 = vadd.f32 %v3077_v12, %v2749_v58  ;;  %3945 = vadd.xlane.f32.xlu2 %v3944_v47  ;;  %v2099_v47 = vadd.f32 %v2098_v57, %v6337_v53 }
 0x4a9   : > { %v4524_v62 = vsel %vm4461_vm15, %v4523_v32, %v4522_v40  ;;  %v3367_v54 = vmax.f32 %v3078_v8, 0.0  ;;  %v3630_v40 = vmul.f32 %v6351_v63, %v3368_v4 }
 0x4aa   : > { %v6933_v13 = vsel %vm4682_vm0, %v4524_v62, %v6787_v0  ;;  %v3904_v0 = vpop.xlane.xlu0 %3903  ;;  %vm4684_vm0 = vcmask 1043459  }
 0x4ab   : > { %v2100_v19 = vpop.f32.mrf.mxu2  ;;  %v2424_v39 = vpop.f32.mrf.mxu3  ;;  %v3629_v31 = vmul.f32 %v6353_v20, %v3367_v54  ;;  %v4192_v26 = vadd.f32 %v6453_v35, %v3904_v0  ;;  %v7764_v0 = vld [vmem:[#allocation26_spill] sm:$0xff] }
 0x4ac   : > { %v2751_v52 = vpop.f32.mrf.mxu0  ;;  %v2425_v45 = vadd.f32 %v2424_v39, %v2096_v33  ;;  %v2101_v33 = vadd.f32 %v2100_v19, %v6337_v53 }
 0x4ad   : > { %v2752_v42 = vadd.f32 %v2751_v52, %v6341_v27  ;;  %v3085_v12 = vpop.f32.mrf.mxu1  ;;  %v3947_v61 = vadd.f32 %v3629_v31, %v3628_v10  ;;  %v4525_v48 = vperm.slane %v4192_v26, %v6455_v2 }
 0x4ae   : > { %v3370_v25 = vmax.f32 %v2425_v45, 0.0 }
 0x4af   : > { %v3081_v44 = vadd.f32 %v3080_v41, %v2752_v42  ;;  %2790 = vmatmul.bf16.gmra.mxu0 %v7758_v36  ;;  %3124 = vmatmul.bf16.gmra.mxu1 %v7761_v15 }
 0x4b0   : > { %2142 = vmatmul.bf16.gmra.mxu2 %v7762_v28  ;;  %2466 = vmatmul.bf16.gmra.mxu3 %v7761_v15  ;;  %v3632_v39 = vmul.f32 %v6351_v63, %v3370_v25  ;;  %v7763_v15 = vld [vmem:[#allocation27_spill] sm:$0xff] }
 0x4b1   : > { %v3369_v1 = vmax.f32 %v3081_v44, 0.0  ;;  %3948 = vadd.xlane.f32.xlu0 %v3947_v61 }
 0x4b3   : > { %v2103_v56 = vpop.f32.mrf.mxu2  ;;  %v2427_v41 = vpop.f32.mrf.mxu3  ;;  %v3631_v36 = vmul.f32 %v6353_v20, %v3369_v1 }
 0x4b4   : > { %v3907_v9 = vpop.xlane.xlu1 %3906  ;;  %v2753_v5 = vpop.f32.mrf.mxu0  ;;  %v2428_v60 = vadd.f32 %v2427_v41, %v2099_v47 }
 0x4b5   : > { %v4193_v24 = vadd.f32 %v6453_v35, %v3907_v9  ;;  %v2754_v6 = vadd.f32 %v2753_v5, %v6341_v27  ;;  %v3087_v55 = vpop.f32.mrf.mxu1  ;;  %v3950_v18 = vadd.f32 %v3631_v36, %v3630_v40 }
 0x4b6   : > { %v3372_v61 = vmax.f32 %v2428_v60, 0.0 }
 0x4b7   : > { %v4526_v37 = vperm.slane %v4193_v24, %v6461_v21  ;;  %v3083_v58 = vadd.f32 %v3082_v23, %v2754_v6  ;;  %3951 = vadd.xlane.f32.xlu1 %v3950_v18 }
 0x4b8   : > { %v3634_v40 = vmul.f32 %v6351_v63, %v3372_v61  ;;  %v7765_v61 = vld [vmem:[#allocation29_spill] sm:$0xff] }
 0x4b9   : > { %v4527_v59 = vsel %vm4405_vm1, %v4526_v37, %v4525_v48  ;;  %v3371_v32 = vmax.f32 %v3083_v58, 0.0  ;;  %v2104_v48 = vadd.f32 %v2103_v56, %v6337_v53 }
 0x4ba   : > { %v3910_v8 = vpop.xlane.xlu2 %3909 }
 0x4bb   : > { %v2105_v62 = vpop.f32.mrf.mxu2  ;;  %v2429_v54 = vpop.f32.mrf.mxu3  ;;  %v4194_v17 = vadd.f32 %v6453_v35, %v3910_v8  ;;  %v3633_v10 = vmul.f32 %v6353_v20, %v3371_v32 }
 0x4bc   : > { %v2756_v31 = vpop.f32.mrf.mxu0  ;;  %v2430_v45 = vadd.f32 %v2429_v54, %v2101_v33 }
 0x4bd   : > { %v4528_v52 = vperm.slane %v4194_v17, %v6473_v46  ;;  %v2757_v23 = vadd.f32 %v2756_v31, %v6341_v27  ;;  %v3090_v42 = vpop.f32.mrf.mxu1  ;;  %v3953_v57 = vadd.f32 %v3633_v10, %v3632_v39 }
 0x4be   : > { %v3374_v18 = vmax.f32 %v2430_v45, 0.0 }
 0x4bf   : > { %v4529_v4 = vsel %vm4409_vm2, %v4528_v52, %v4527_v59  ;;  %v3086_v44 = vadd.f32 %v3085_v12, %v2757_v23  ;;  %2795 = vmatmul.bf16.gmra.mxu0 %v7760_v7  ;;  %3129 = vmatmul.bf16.gmra.mxu1 %v7763_v15 }
 0x4c0   : > { %2147 = vmatmul.bf16.gmra.mxu2 %v7764_v0  ;;  %2471 = vmatmul.bf16.gmra.mxu3 %v7763_v15  ;;  %v3636_v54 = vmul.f32 %v6351_v63, %v3374_v18 }
 0x4c1   : > { %v3373_v1 = vmax.f32 %v3086_v44, 0.0  ;;  %3954 = vadd.xlane.f32.xlu2 %v3953_v57  ;;  %v2106_v44 = vadd.f32 %v2105_v62, %v6337_v53 }
 0x4c3   : > { %v2108_v26 = vpop.f32.mrf.mxu2  ;;  %v2432_v41 = vpop.f32.mrf.mxu3  ;;  %v3635_v36 = vmul.f32 %v6353_v20, %v3373_v1 }
 0x4c4   : > { %v3913_v12 = vpop.xlane.xlu0 %3912  ;;  %v2758_v9 = vpop.f32.mrf.mxu0  ;;  %v2433_v59 = vadd.f32 %v2432_v41, %v2104_v48  ;;  %v2109_v18 = vadd.f32 %v2108_v26, %v6337_v53 }
 0x4c5   : > { %v4195_v7 = vadd.f32 %v6453_v35, %v3913_v12  ;;  %v2759_v5 = vadd.f32 %v2758_v9, %v6341_v27  ;;  %v3092_v24 = vpop.f32.mrf.mxu1  ;;  %v3956_v6 = vadd.f32 %v3635_v36, %v3634_v40 }
 0x4c6   : > { %v3376_v52 = vmax.f32 %v2433_v59, 0.0 }
 0x4c7   : > { %v4530_v19 = vperm.slane %v4195_v7, %v6489_v51  ;;  %v3088_v25 = vadd.f32 %v3087_v55, %v2759_v5  ;;  %3957 = vadd.xlane.f32.xlu0 %v3956_v6 }
 0x4c8   : > { %v3638_v33 = vmul.f32 %v6351_v63, %v3376_v52  ;;  %v7767_v52 = vld [vmem:[#allocation31_spill] sm:$0xff] }
 0x4c9   : > { %v4531_v37 = vsel %vm4413_vm3, %v4530_v19, %v4529_v4  ;;  %v3375_v58 = vmax.f32 %v3088_v25, 0.0  ;;  %v7766_v4 = vld [vmem:[#allocation28_spill] sm:$0xff] }
 0x4ca   : > { %v3916_v47 = vpop.xlane.xlu1 %3915 }
 0x4cb   : > { %v2110_v32 = vpop.f32.mrf.mxu2  ;;  %v2434_v8 = vpop.f32.mrf.mxu3  ;;  %v4196_v60 = vadd.f32 %v6453_v35, %v3916_v47  ;;  %v3637_v17 = vmul.f32 %v6353_v20, %v3375_v58 }
 0x4cc   : > { %v2761_v39 = vpop.f32.mrf.mxu0  ;;  %v2435_v1 = vadd.f32 %v2434_v8, %v2106_v44 }
 0x4cd   : > { %v4532_v10 = vperm.slane %v4196_v60, %v6498_v3  ;;  %v2762_v55 = vadd.f32 %v2761_v39, %v6341_v27  ;;  %v3095_v31 = vpop.f32.mrf.mxu1  ;;  %v3959_v56 = vadd.f32 %v3637_v17, %v3636_v54 }
 0x4ce   : > { %v3378_v5 = vmax.f32 %v2435_v1, 0.0 }
 0x4cf   : > { %v4533_v23 = vsel %vm4417_vm4, %v4532_v10, %v4531_v37  ;;  %v3091_v57 = vadd.f32 %v3090_v42, %v2762_v55  ;;  %2800 = vmatmul.bf16.gmra.mxu0 %v7762_v28  ;;  %3134 = vmatmul.bf16.gmra.mxu1 %v7765_v61 }
 0x4d0   : > { %2152 = vmatmul.bf16.gmra.mxu2 %v7766_v4  ;;  %2476 = vmatmul.bf16.gmra.mxu3 %v7765_v61  ;;  %v3640_v8 = vmul.f32 %v6351_v63, %v3378_v5 }
 0x4d1   : > { %v3377_v15 = vmax.f32 %v3091_v57, 0.0  ;;  %3960 = vadd.xlane.f32.xlu1 %v3959_v56  ;;  %v2111_v57 = vadd.f32 %v2110_v32, %v6337_v53 }
 0x4d3   : > { %v2113_v40 = vpop.f32.mrf.mxu2  ;;  %v2437_v45 = vpop.f32.mrf.mxu3  ;;  %v3639_v41 = vmul.f32 %v6353_v20, %v3377_v15 }
 0x4d4   : > { %v3919_v42 = vpop.xlane.xlu2 %3918  ;;  %v2763_v36 = vpop.f32.mrf.mxu0  ;;  %v2438_v37 = vadd.f32 %v2437_v45, %v2109_v18  ;;  %v2114_v5 = vadd.f32 %v2113_v40, %v6337_v53 }
 0x4d5   : > { %v4197_v28 = vadd.f32 %v6453_v35, %v3919_v42  ;;  %v2764_v12 = vadd.f32 %v2763_v36, %v6341_v27  ;;  %v3097_v9 = vpop.f32.mrf.mxu1  ;;  %v3962_v7 = vadd.f32 %v3639_v41, %v3638_v33 }
 0x4d6   : > { %v3380_v10 = vmax.f32 %v2438_v37, 0.0 }
 0x4d7   : > { %v4534_v62 = vperm.slane %v4197_v28, %v6513_v16  ;;  %v3093_v6 = vadd.f32 %v3092_v24, %v2764_v12  ;;  %3963 = vadd.xlane.f32.xlu2 %v3962_v7 }
 0x4d8   : > { %v3642_v44 = vmul.f32 %v6351_v63, %v3380_v10  ;;  %v7769_v10 = vld [vmem:[#allocation33_spill] sm:$0xff] }
 0x4d9   : > { %v4535_v19 = vsel %vm4421_vm5, %v4534_v62, %v4533_v23  ;;  %v3379_v25 = vmax.f32 %v3093_v6, 0.0  ;;  %v7768_v23 = vld [vmem:[#allocation30_spill] sm:$0xff] }
 0x4da   : > { %v3922_v48 = vpop.xlane.xlu0 %3921 }
 0x4db   : > { %v2115_v58 = vpop.f32.mrf.mxu2  ;;  %v2439_v47 = vpop.f32.mrf.mxu3  ;;  %v4198_v59 = vadd.f32 %v6453_v35, %v3922_v48  ;;  %v3641_v60 = vmul.f32 %v6353_v20, %v3379_v25 }
 0x4dc   : > { %v2766_v54 = vpop.f32.mrf.mxu0  ;;  %v2440_v15 = vadd.f32 %v2439_v47, %v2111_v57 }
 0x4dd   : > { %v4536_v17 = vperm.slane %v4198_v59, %v6522_v11  ;;  %v2767_v24 = vadd.f32 %v2766_v54, %v6341_v27  ;;  %v3100_v39 = vpop.f32.mrf.mxu1  ;;  %v3965_v26 = vadd.f32 %v3641_v60, %v3640_v8 }
 0x4de   : > { %v3382_v12 = vmax.f32 %v2440_v15, 0.0 }
 0x4df   : > { %v4537_v55 = vsel %vm4425_vm6, %v4536_v17, %v4535_v19  ;;  %v3096_v56 = vadd.f32 %v3095_v31, %v2767_v24  ;;  %2805 = vmatmul.bf16.gmra.mxu0 %v7764_v0  ;;  %3139 = vmatmul.bf16.gmra.mxu1 %v7767_v52 }
 0x4e0   : > { %2157 = vmatmul.bf16.gmra.mxu2 %v7768_v23  ;;  %2481 = vmatmul.bf16.gmra.mxu3 %v7767_v52  ;;  %v3644_v47 = vmul.f32 %v6351_v63, %v3382_v12 }
 0x4e1   : > { %v3381_v61 = vmax.f32 %v3096_v56, 0.0  ;;  %3966 = vadd.xlane.f32.xlu0 %v3965_v26  ;;  %v2116_v56 = vadd.f32 %v2115_v58, %v6337_v53 }
 0x4e3   : > { %v2118_v33 = vpop.f32.mrf.mxu2  ;;  %v2442_v1 = vpop.f32.mrf.mxu3  ;;  %v3643_v45 = vmul.f32 %v6353_v20, %v3381_v61 }
 0x4e4   : > { %v3925_v31 = vpop.xlane.xlu1 %3924  ;;  %v2768_v41 = vpop.f32.mrf.mxu0  ;;  %v2443_v19 = vadd.f32 %v2442_v1, %v2114_v5  ;;  %v2119_v12 = vadd.f32 %v2118_v33, %v6337_v53 }
 0x4e5   : > { %v4199_v0 = vadd.f32 %v6453_v35, %v3925_v31  ;;  %v2769_v42 = vadd.f32 %v2768_v41, %v6341_v27  ;;  %v3102_v36 = vpop.f32.mrf.mxu1  ;;  %v3968_v28 = vadd.f32 %v3643_v45, %v3642_v44 }
 0x4e6   : > { %v3384_v17 = vmax.f32 %v2443_v19, 0.0 }
 0x4e7   : > { %v4538_v32 = vperm.slane %v4199_v0, %v6537_v50  ;;  %v3098_v7 = vadd.f32 %v3097_v9, %v2769_v42  ;;  %3969 = vadd.xlane.f32.xlu1 %v3968_v28 }
 0x4e8   : > { %v3646_v57 = vmul.f32 %v6351_v63, %v3384_v17  ;;  %v7771_v17 = vld [vmem:[#allocation36_spill] sm:$0xff] }
 0x4e9   : > { %v4539_v62 = vsel %vm4429_vm7, %v4538_v32, %v4537_v55  ;;  %v3383_v6 = vmax.f32 %v3098_v7, 0.0  ;;  %v7770_v55 = vld [vmem:[#allocation32_spill] sm:$0xff] }
 0x4ea   : > { %v3928_v18 = vpop.xlane.xlu2 %3927 }
 0x4eb   : > { %v2120_v25 = vpop.f32.mrf.mxu2  ;;  %v2444_v48 = vpop.f32.mrf.mxu3  ;;  %v4200_v37 = vadd.f32 %v6453_v35, %v3928_v18  ;;  %v3645_v59 = vmul.f32 %v6353_v20, %v3383_v6 }
 0x4ec   : > { %v2771_v8 = vpop.f32.mrf.mxu0  ;;  %v2445_v61 = vadd.f32 %v2444_v48, %v2116_v56 }
 0x4ed   : > { %v4540_v60 = vperm.slane %v4200_v37, %v6546_v34  ;;  %v2772_v9 = vadd.f32 %v2771_v8, %v6341_v27  ;;  %v3105_v54 = vpop.f32.mrf.mxu1  ;;  %v3971_v40 = vadd.f32 %v3645_v59, %v3644_v47 }
 0x4ee   : > { %v3386_v42 = vmax.f32 %v2445_v61, 0.0 }
 0x4ef   : > { %v4541_v24 = vsel %vm4433_vm8, %v4540_v60, %v4539_v62  ;;  %v3101_v26 = vadd.f32 %v3100_v39, %v2772_v9  ;;  %2810 = vmatmul.bf16.gmra.mxu0 %v7766_v4  ;;  %3144 = vmatmul.bf16.gmra.mxu1 %v7769_v10 }
 0x4f0   : > { %2162 = vmatmul.bf16.gmra.mxu2 %v7770_v55  ;;  %2486 = vmatmul.bf16.gmra.mxu3 %v7769_v10  ;;  %v3648_v48 = vmul.f32 %v6351_v63, %v3386_v42 }
 0x4f1   : > { %v3385_v52 = vmax.f32 %v3101_v26, 0.0  ;;  %3972 = vadd.xlane.f32.xlu2 %v3971_v40  ;;  %v2121_v26 = vadd.f32 %v2120_v25, %v6337_v53 }
 0x4f3   : > { %v2123_v44 = vpop.f32.mrf.mxu2  ;;  %v2447_v15 = vpop.f32.mrf.mxu3  ;;  %v3647_v1 = vmul.f32 %v6353_v20, %v3385_v52 }
 0x4f4   : > { %v3931_v39 = vpop.xlane.xlu0 %3930  ;;  %v2773_v45 = vpop.f32.mrf.mxu0  ;;  %v2448_v62 = vadd.f32 %v2447_v15, %v2119_v12  ;;  %v2124_v42 = vadd.f32 %v2123_v44, %v6337_v53 }
 0x4f5   : > { %v4201_v4 = vadd.f32 %v6453_v35, %v3931_v39  ;;  %v2774_v31 = vadd.f32 %v2773_v45, %v6341_v27  ;;  %v3107_v41 = vpop.f32.mrf.mxu1  ;;  %v3974_v0 = vadd.f32 %v3647_v1, %v3646_v57 }
 0x4f6   : > { %v3388_v60 = vmax.f32 %v2448_v62, 0.0 }
 0x4f7   : > { %v4542_v58 = vperm.slane %v4201_v4, %v6561_v14  ;;  %v3103_v28 = vadd.f32 %v3102_v36, %v2774_v31  ;;  %3975 = vadd.xlane.f32.xlu0 %v3974_v0 }
 0x4f8   : > { %v3650_v56 = vmul.f32 %v6351_v63, %v3388_v60  ;;  %v7773_v60 = vld [vmem:[#allocation40_spill] sm:$0xff] }
 0x4f9   : > { %v4543_v32 = vsel %vm4437_vm9, %v4542_v58, %v4541_v24  ;;  %v3387_v7 = vmax.f32 %v3103_v28, 0.0  ;;  %v7772_v24 = vld [vmem:[#allocation35_spill] sm:$0xff] }
 0x4fa   : > { %v3934_v5 = vpop.xlane.xlu1 %3933 }
 0x4fb   : > { %v2125_v6 = vpop.f32.mrf.mxu2  ;;  %v2449_v18 = vpop.f32.mrf.mxu3  ;;  %v4202_v19 = vadd.f32 %v6453_v35, %v3934_v5  ;;  %v3649_v37 = vmul.f32 %v6353_v20, %v3387_v7 }
 0x4fc   : > { %v2776_v47 = vpop.f32.mrf.mxu0  ;;  %v2450_v52 = vadd.f32 %v2449_v18, %v2121_v26 }
 0x4fd   : > { %v4544_v59 = vperm.slane %v4202_v19, %v6570_v49  ;;  %v2777_v36 = vadd.f32 %v2776_v47, %v6341_v27  ;;  %v3110_v8 = vpop.f32.mrf.mxu1  ;;  %v3977_v33 = vadd.f32 %v3649_v37, %v3648_v48 }
 0x4fe   : > { %v3390_v31 = vmax.f32 %v2450_v52, 0.0 }
 0x4ff   : > { %v4545_v9 = vsel %vm4441_vm10, %v4544_v59, %v4543_v32  ;;  %v3106_v40 = vadd.f32 %v3105_v54, %v2777_v36  ;;  %2815 = vmatmul.bf16.gmra.mxu0 %v7768_v23  ;;  %3149 = vmatmul.bf16.gmra.mxu1 %v7771_v17 }
 0x500   : > { %2167 = vmatmul.bf16.gmra.mxu2 %v7772_v24  ;;  %2491 = vmatmul.bf16.gmra.mxu3 %v7771_v17  ;;  %v3652_v18 = vmul.f32 %v6351_v63, %v3390_v31 }
 0x501   : > { %v3389_v10 = vmax.f32 %v3106_v40, 0.0  ;;  %3978 = vadd.xlane.f32.xlu1 %v3977_v33  ;;  %v2126_v40 = vadd.f32 %v2125_v6, %v6337_v53 }
 0x503   : > { %v2128_v57 = vpop.f32.mrf.mxu2  ;;  %v2452_v61 = vpop.f32.mrf.mxu3  ;;  %v3651_v15 = vmul.f32 %v6353_v20, %v3389_v10 }
 0x504   : > { %v3937_v54 = vpop.xlane.xlu2 %3936  ;;  %v2778_v1 = vpop.f32.mrf.mxu0  ;;  %v2453_v32 = vadd.f32 %v2452_v61, %v2124_v42  ;;  %v2129_v31 = vadd.f32 %v2128_v57, %v6337_v53 }
 0x505   : > { %v4203_v23 = vadd.f32 %v6453_v35, %v3937_v54  ;;  %v2779_v39 = vadd.f32 %v2778_v1, %v6341_v27  ;;  %v3112_v45 = vpop.f32.mrf.mxu1  ;;  %v3980_v4 = vadd.f32 %v3651_v15, %v3650_v56 }
 0x506   : > { %v3392_v59 = vmax.f32 %v2453_v32, 0.0 }
 0x507   : > { %v4546_v25 = vperm.slane %v4203_v23, %v6585_v38  ;;  %v3108_v0 = vadd.f32 %v3107_v41, %v2779_v39  ;;  %3981 = vadd.xlane.f32.xlu2 %v3980_v4 }
 0x508   : > { %v3654_v26 = vmul.f32 %v6351_v63, %v3392_v59  ;;  %v7775_v59 = vld [vmem:[#allocation42_spill] sm:$0xff] }
 0x509   : > { %v4547_v58 = vsel %vm4445_vm11, %v4546_v25, %v4545_v9  ;;  %v3391_v28 = vmax.f32 %v3108_v0, 0.0  ;;  %v7774_v9 = vld [vmem:[#allocation39_spill] sm:$0xff] }
 0x50a   : > { %v3940_v12 = vpop.xlane.xlu0 %3939 }
 0x50b   : > { %v2130_v7 = vpop.f32.mrf.mxu2  ;;  %v2454_v5 = vpop.f32.mrf.mxu3  ;;  %v4204_v62 = vadd.f32 %v6453_v35, %v3940_v12  ;;  %v3653_v19 = vmul.f32 %v6353_v20, %v3391_v28 }
 0x50c   : > { %v2781_v48 = vpop.f32.mrf.mxu0  ;;  %v2455_v10 = vadd.f32 %v2454_v5, %v2126_v40 }
 0x50d   : > { %v4548_v37 = vperm.slane %v4204_v62, %v6594_v43  ;;  %v2782_v41 = vadd.f32 %v2781_v48, %v6341_v27  ;;  %v3115_v47 = vpop.f32.mrf.mxu1  ;;  %v3983_v44 = vadd.f32 %v3653_v19, %v3652_v18 }
 0x50e   : > { %v3394_v39 = vmax.f32 %v2455_v10, 0.0 }
 0x50f   : > { %v4549_v36 = vsel %vm4449_vm12, %v4548_v37, %v4547_v58  ;;  %v3111_v33 = vadd.f32 %v3110_v8, %v2782_v41  ;;  %2820 = vmatmul.bf16.gmra.mxu0 %v7770_v55  ;;  %3154 = vmatmul.bf16.gmra.mxu1 %v7773_v60 }
 0x510   : > { %2172 = vmatmul.bf16.gmra.mxu2 %v7774_v9  ;;  %2496 = vmatmul.bf16.gmra.mxu3 %v7773_v60  ;;  %v3656_v5 = vmul.f32 %v6351_v63, %v3394_v39 }
 0x511   : > { %v3393_v17 = vmax.f32 %v3111_v33, 0.0  ;;  %3984 = vadd.xlane.f32.xlu0 %v3983_v44  ;;  %v2131_v33 = vadd.f32 %v2130_v7, %v6337_v53 }
 0x513   : > { %v2133_v56 = vpop.f32.mrf.mxu2  ;;  %v2457_v52 = vpop.f32.mrf.mxu3  ;;  %v3655_v61 = vmul.f32 %v6353_v20, %v3393_v17 }
 0x514   : > { %v3943_v8 = vpop.xlane.xlu1 %3942  ;;  %v2783_v15 = vpop.f32.mrf.mxu0  ;;  %v2458_v58 = vadd.f32 %v2457_v52, %v2129_v31  ;;  %v2134_v39 = vadd.f32 %v2133_v56, %v6337_v53 }
 0x515   : > { %v4205_v55 = vadd.f32 %v6453_v35, %v3943_v8  ;;  %v2784_v54 = vadd.f32 %v2783_v15, %v6341_v27  ;;  %v3117_v1 = vpop.f32.mrf.mxu1  ;;  %v3986_v23 = vadd.f32 %v3655_v61, %v3654_v26 }
 0x516   : > { %v3396_v37 = vmax.f32 %v2458_v58, 0.0 }
 0x517   : > { %v4550_v6 = vperm.slane %v4205_v55, %v6609_v30  ;;  %v3113_v4 = vadd.f32 %v3112_v45, %v2784_v54  ;;  %3987 = vadd.xlane.f32.xlu1 %v3986_v23 }
 0x518   : > { %v3658_v40 = vmul.f32 %v6351_v63, %v3396_v37 }
 0x519   : > { %v4551_v25 = vsel %vm4453_vm13, %v4550_v6, %v4549_v36  ;;  %v3395_v0 = vmax.f32 %v3113_v4, 0.0  ;;  %v7776_v36 = vld [vmem:[#allocation41_spill] sm:$0xff] }
 0x51a   : > { %v3946_v42 = vpop.xlane.xlu2 %3945 }
 0x51b   : > { %v2135_v28 = vpop.f32.mrf.mxu2  ;;  %v2459_v12 = vpop.f32.mrf.mxu3  ;;  %v4206_v32 = vadd.f32 %v6453_v35, %v3946_v42  ;;  %v3657_v62 = vmul.f32 %v6353_v20, %v3395_v0 }
 0x51c   : > { %v2786_v18 = vpop.f32.mrf.mxu0  ;;  %v2460_v17 = vadd.f32 %v2459_v12, %v2131_v33 }
 0x51d   : > { %v4552_v19 = vperm.slane %v4206_v32, %v6618_v22  ;;  %v2787_v45 = vadd.f32 %v2786_v18, %v6341_v27  ;;  %v3120_v48 = vpop.f32.mrf.mxu1  ;;  %v3989_v57 = vadd.f32 %v3657_v62, %v3656_v5 }
 0x51e   : > { %v3398_v54 = vmax.f32 %v2460_v17, 0.0 }
 0x51f   : > { %v4553_v41 = vsel %vm4457_vm14, %v4552_v19, %v4551_v25  ;;  %v3116_v44 = vadd.f32 %v3115_v47, %v2787_v45  ;;  %2825 = vmatmul.bf16.gmra.mxu0 %v7772_v24  ;;  %3159 = vmatmul.bf16.gmra.mxu1 %v7775_v59  ;;  %v7777_v19 = vld [vmem:[#allocation44_spill] sm:$0xff]  ;;  %v7778_v45 = vld [vmem:[#allocation43_spill] sm:$0xff] }
 0x520   : > { %2177 = vmatmul.bf16.gmra.mxu2 %v7776_v36  ;;  %2501 = vmatmul.bf16.gmra.mxu3 %v7775_v59  ;;  %v3660_v58 = vmul.f32 %v6351_v63, %v3398_v54 }
 0x521   : > { %v3397_v60 = vmax.f32 %v3116_v44, 0.0  ;;  %3990 = vadd.xlane.f32.xlu2 %v3989_v57  ;;  %v2136_v57 = vadd.f32 %v2135_v28, %v6337_v53 }
 0x523   : > { %v2138_v26 = vpop.f32.mrf.mxu2  ;;  %v2462_v10 = vpop.f32.mrf.mxu3  ;;  %v3659_v52 = vmul.f32 %v6353_v20, %v3397_v60 }
 0x524   : > { %v3949_v47 = vpop.xlane.xlu0 %3948  ;;  %v2788_v61 = vpop.f32.mrf.mxu0  ;;  %v2463_v25 = vadd.f32 %v2462_v10, %v2134_v39 }
 0x525   : > { %v4207_v24 = vadd.f32 %v6453_v35, %v3949_v47  ;;  %v2789_v8 = vadd.f32 %v2788_v61, %v6341_v27  ;;  %v3122_v15 = vpop.f32.mrf.mxu1  ;;  %v3992_v55 = vadd.f32 %v3659_v52, %v3658_v40 }
 0x526   : > { %v3400_v18 = vmax.f32 %v2463_v25, 0.0 }
 0x527   : > { %v4554_v7 = vperm.slane %v4207_v24, %v6633_v29  ;;  %v3118_v23 = vadd.f32 %v3117_v1, %v2789_v8  ;;  %3993 = vadd.xlane.f32.xlu0 %v3992_v55  ;;  %v2139_v55 = vadd.f32 %v2138_v26, %v6337_v53 }
 0x529   : > { %v4555_v6 = vsel %vm4461_vm15, %v4554_v7, %v4553_v41  ;;  %v3399_v4 = vmax.f32 %v3118_v23, 0.0  ;;  %v3662_v41 = vmul.f32 %v6351_v63, %v3400_v18 }
 0x52a   : > { %v7079_v31 = vsel %vm4684_vm0, %v4555_v6, %v6933_v13  ;;  %v3952_v13 = vpop.xlane.xlu1 %3951  ;;  %vm4686_vm0 = vcmask 1044484  }
 0x52b   : > { %v2140_v0 = vpop.f32.mrf.mxu2  ;;  %v2464_v42 = vpop.f32.mrf.mxu3  ;;  %v3661_v12 = vmul.f32 %v6353_v20, %v3399_v4  ;;  %v4208_v59 = vadd.f32 %v6453_v35, %v3952_v13  ;;  %v7780_v13 = vld [vmem:[#allocation45_spill] sm:$0xff] }
 0x52c   : > { %v2791_v32 = vpop.f32.mrf.mxu0  ;;  %v2465_v44 = vadd.f32 %v2464_v42, %v2136_v57  ;;  %v2141_v57 = vadd.f32 %v2140_v0, %v6337_v53 }
 0x52d   : > { %v2792_v5 = vadd.f32 %v2791_v32, %v6341_v27  ;;  %v3125_v1 = vpop.f32.mrf.mxu1  ;;  %v3995_v62 = vadd.f32 %v3661_v12, %v3660_v58  ;;  %v4556_v61 = vperm.slane %v4208_v59, %v6455_v2 }
 0x52e   : > { %v3402_v28 = vmax.f32 %v2465_v44, 0.0 }
 0x52f   : > { %v3121_v56 = vadd.f32 %v3120_v48, %v2792_v5  ;;  %2830 = vmatmul.bf16.gmra.mxu0 %v7774_v9  ;;  %3164 = vmatmul.bf16.gmra.mxu1 %v7777_v19 }
 0x530   : > { %2182 = vmatmul.bf16.gmra.mxu2 %v7778_v45  ;;  %2506 = vmatmul.bf16.gmra.mxu3 %v7777_v19  ;;  %v3664_v42 = vmul.f32 %v6351_v63, %v3402_v28  ;;  %v7779_v19 = vld [vmem:[#allocation46_spill] sm:$0xff] }
 0x531   : > { %v3401_v37 = vmax.f32 %v3121_v56, 0.0  ;;  %3996 = vadd.xlane.f32.xlu1 %v3995_v62 }
 0x533   : > { %v2143_v33 = vpop.f32.mrf.mxu2  ;;  %v2467_v48 = vpop.f32.mrf.mxu3  ;;  %v3663_v9 = vmul.f32 %v6353_v20, %v3401_v37 }
 0x534   : > { %v3955_v60 = vpop.xlane.xlu2 %3954  ;;  %v2793_v40 = vpop.f32.mrf.mxu0  ;;  %v2468_v39 = vadd.f32 %v2467_v48, %v2139_v55 }
 0x535   : > { %v4209_v17 = vadd.f32 %v6453_v35, %v3955_v60  ;;  %v2794_v10 = vadd.f32 %v2793_v40, %v6341_v27  ;;  %v3127_v52 = vpop.f32.mrf.mxu1  ;;  %v3998_v47 = vadd.f32 %v3663_v9, %v3662_v41 }
 0x536   : > { %v3404_v62 = vmax.f32 %v2468_v39, 0.0 }
 0x537   : > { %v4557_v24 = vperm.slane %v4209_v17, %v6461_v21  ;;  %v3123_v8 = vadd.f32 %v3122_v15, %v2794_v10  ;;  %3999 = vadd.xlane.f32.xlu2 %v3998_v47 }
 0x538   : > { %v3666_v41 = vmul.f32 %v6351_v63, %v3404_v62  ;;  %v7781_v62 = vld [vmem:[#allocation49_spill] sm:$0xff] }
 0x539   : > { %v4558_v54 = vsel %vm4405_vm1, %v4557_v24, %v4556_v61  ;;  %v3403_v7 = vmax.f32 %v3123_v8, 0.0  ;;  %v2144_v61 = vadd.f32 %v2143_v33, %v6337_v53 }
 0x53a   : > { %v3958_v23 = vpop.xlane.xlu0 %3957 }
 0x53b   : > { %v2145_v6 = vpop.f32.mrf.mxu2  ;;  %v2469_v4 = vpop.f32.mrf.mxu3  ;;  %v4210_v25 = vadd.f32 %v6453_v35, %v3958_v23  ;;  %v3665_v58 = vmul.f32 %v6353_v20, %v3403_v7 }
 0x53c   : > { %v2796_v12 = vpop.f32.mrf.mxu0  ;;  %v2470_v44 = vadd.f32 %v2469_v4, %v2141_v57 }
 0x53d   : > { %v4559_v32 = vperm.slane %v4210_v25, %v6473_v46  ;;  %v2797_v15 = vadd.f32 %v2796_v12, %v6341_v27  ;;  %v3130_v5 = vpop.f32.mrf.mxu1  ;;  %v4001_v26 = vadd.f32 %v3665_v58, %v3664_v42 }
 0x53e   : > { %v3406_v47 = vmax.f32 %v2470_v44, 0.0 }
 0x53f   : > { %v4560_v18 = vsel %vm4409_vm2, %v4559_v32, %v4558_v54  ;;  %v3126_v56 = vadd.f32 %v3125_v1, %v2797_v15  ;;  %2835 = vmatmul.bf16.gmra.mxu0 %v7776_v36  ;;  %3169 = vmatmul.bf16.gmra.mxu1 %v7779_v19 }
 0x540   : > { %2187 = vmatmul.bf16.gmra.mxu2 %v7780_v13  ;;  %2511 = vmatmul.bf16.gmra.mxu3 %v7779_v19  ;;  %v3668_v4 = vmul.f32 %v6351_v63, %v3406_v47 }
 0x541   : > { %v3405_v37 = vmax.f32 %v3126_v56, 0.0  ;;  %4002 = vadd.xlane.f32.xlu0 %v4001_v26  ;;  %v2146_v56 = vadd.f32 %v2145_v6, %v6337_v53 }
 0x543   : > { %v2148_v59 = vpop.f32.mrf.mxu2  ;;  %v2472_v48 = vpop.f32.mrf.mxu3  ;;  %v3667_v9 = vmul.f32 %v6353_v20, %v3405_v37 }
 0x544   : > { %v3961_v1 = vpop.xlane.xlu1 %3960  ;;  %v2798_v60 = vpop.f32.mrf.mxu0  ;;  %v2473_v54 = vadd.f32 %v2472_v48, %v2144_v61  ;;  %v2149_v47 = vadd.f32 %v2148_v59, %v6337_v53 }
 0x545   : > { %v4211_v36 = vadd.f32 %v6453_v35, %v3961_v1  ;;  %v2799_v40 = vadd.f32 %v2798_v60, %v6341_v27  ;;  %v3132_v17 = vpop.f32.mrf.mxu1  ;;  %v4004_v10 = vadd.f32 %v3667_v9, %v3666_v41 }
 0x546   : > { %v3408_v32 = vmax.f32 %v2473_v54, 0.0 }
 0x547   : > { %v4561_v0 = vperm.slane %v4211_v36, %v6489_v51  ;;  %v3128_v28 = vadd.f32 %v3127_v52, %v2799_v40  ;;  %4005 = vadd.xlane.f32.xlu1 %v4004_v10 }
 0x548   : > { %v3670_v57 = vmul.f32 %v6351_v63, %v3408_v32  ;;  %v7783_v32 = vld [vmem:[#allocation53_spill] sm:$0xff] }
 0x549   : > { %v4562_v24 = vsel %vm4413_vm3, %v4561_v0, %v4560_v18  ;;  %v3407_v8 = vmax.f32 %v3128_v28, 0.0  ;;  %v7782_v18 = vld [vmem:[#allocation48_spill] sm:$0xff] }
 0x54a   : > { %v3964_v55 = vpop.xlane.xlu2 %3963 }
 0x54b   : > { %v2150_v7 = vpop.f32.mrf.mxu2  ;;  %v2474_v23 = vpop.f32.mrf.mxu3  ;;  %v4212_v39 = vadd.f32 %v6453_v35, %v3964_v55  ;;  %v3669_v25 = vmul.f32 %v6353_v20, %v3407_v8 }
 0x54c   : > { %v2801_v42 = vpop.f32.mrf.mxu0  ;;  %v2475_v37 = vadd.f32 %v2474_v23, %v2146_v56 }
 0x54d   : > { %v4563_v58 = vperm.slane %v4212_v39, %v6498_v3  ;;  %v2802_v52 = vadd.f32 %v2801_v42, %v6341_v27  ;;  %v3135_v12 = vpop.f32.mrf.mxu1  ;;  %v4007_v33 = vadd.f32 %v3669_v25, %v3668_v4 }
 0x54e   : > { %v3410_v40 = vmax.f32 %v2475_v37, 0.0 }
 0x54f   : > { %v4564_v15 = vsel %vm4417_vm4, %v4563_v58, %v4562_v24  ;;  %v3131_v26 = vadd.f32 %v3130_v5, %v2802_v52  ;;  %2840 = vmatmul.bf16.gmra.mxu0 %v7778_v45  ;;  %3174 = vmatmul.bf16.gmra.mxu1 %v7781_v62 }
 0x550   : > { %2192 = vmatmul.bf16.gmra.mxu2 %v7782_v18  ;;  %2516 = vmatmul.bf16.gmra.mxu3 %v7781_v62  ;;  %v3672_v23 = vmul.f32 %v6351_v63, %v3410_v40 }
 0x551   : > { %v3409_v19 = vmax.f32 %v3131_v26, 0.0  ;;  %4008 = vadd.xlane.f32.xlu2 %v4007_v33  ;;  %v2151_v26 = vadd.f32 %v2150_v7, %v6337_v53 }
 0x553   : > { %v2153_v41 = vpop.f32.mrf.mxu2  ;;  %v2477_v44 = vpop.f32.mrf.mxu3  ;;  %v3671_v48 = vmul.f32 %v6353_v20, %v3409_v19 }
 0x554   : > { %v3967_v5 = vpop.xlane.xlu0 %3966  ;;  %v2803_v9 = vpop.f32.mrf.mxu0  ;;  %v2478_v24 = vadd.f32 %v2477_v44, %v2149_v47  ;;  %v2154_v40 = vadd.f32 %v2153_v41, %v6337_v53 }
 0x555   : > { %v4213_v45 = vadd.f32 %v6453_v35, %v3967_v5  ;;  %v2804_v1 = vadd.f32 %v2803_v9, %v6341_v27  ;;  %v3137_v60 = vpop.f32.mrf.mxu1  ;;  %v4010_v36 = vadd.f32 %v3671_v48, %v3670_v57 }
 0x556   : > { %v3412_v58 = vmax.f32 %v2478_v24, 0.0 }
 0x557   : > { %v4565_v6 = vperm.slane %v4213_v45, %v6513_v16  ;;  %v3133_v10 = vadd.f32 %v3132_v17, %v2804_v1  ;;  %4011 = vadd.xlane.f32.xlu0 %v4010_v36 }
 0x558   : > { %v3674_v56 = vmul.f32 %v6351_v63, %v3412_v58  ;;  %v7785_v58 = vld [vmem:[#allocation55_spill] sm:$0xff] }
 0x559   : > { %v4566_v0 = vsel %vm4421_vm5, %v4565_v6, %v4564_v15  ;;  %v3411_v28 = vmax.f32 %v3133_v10, 0.0  ;;  %v7784_v15 = vld [vmem:[#allocation52_spill] sm:$0xff] }
 0x55a   : > { %v3970_v61 = vpop.xlane.xlu1 %3969 }
 0x55b   : > { %v2155_v8 = vpop.f32.mrf.mxu2  ;;  %v2479_v55 = vpop.f32.mrf.mxu3  ;;  %v4214_v54 = vadd.f32 %v6453_v35, %v3970_v61  ;;  %v3673_v39 = vmul.f32 %v6353_v20, %v3411_v28 }
 0x55c   : > { %v2806_v4 = vpop.f32.mrf.mxu0  ;;  %v2480_v19 = vadd.f32 %v2479_v55, %v2151_v26 }
 0x55d   : > { %v4567_v25 = vperm.slane %v4214_v54, %v6522_v11  ;;  %v2807_v17 = vadd.f32 %v2806_v4, %v6341_v27  ;;  %v3140_v42 = vpop.f32.mrf.mxu1  ;;  %v4013_v59 = vadd.f32 %v3673_v39, %v3672_v23 }
 0x55e   : > { %v3414_v1 = vmax.f32 %v2480_v19, 0.0 }
 0x55f   : > { %v4568_v52 = vsel %vm4425_vm6, %v4567_v25, %v4566_v0  ;;  %v3136_v33 = vadd.f32 %v3135_v12, %v2807_v17  ;;  %2845 = vmatmul.bf16.gmra.mxu0 %v7780_v13  ;;  %3179 = vmatmul.bf16.gmra.mxu1 %v7783_v32 }
 0x560   : > { %2197 = vmatmul.bf16.gmra.mxu2 %v7784_v15  ;;  %2521 = vmatmul.bf16.gmra.mxu3 %v7783_v32  ;;  %v3676_v55 = vmul.f32 %v6351_v63, %v3414_v1 }
 0x561   : > { %v3413_v62 = vmax.f32 %v3136_v33, 0.0  ;;  %4014 = vadd.xlane.f32.xlu1 %v4013_v59  ;;  %v2156_v33 = vadd.f32 %v2155_v8, %v6337_v53 }
 0x563   : > { %v2158_v57 = vpop.f32.mrf.mxu2  ;;  %v2482_v37 = vpop.f32.mrf.mxu3  ;;  %v3675_v44 = vmul.f32 %v6353_v20, %v3413_v62 }
 0x564   : > { %v3973_v12 = vpop.xlane.xlu2 %3972  ;;  %v2808_v48 = vpop.f32.mrf.mxu0  ;;  %v2483_v0 = vadd.f32 %v2482_v37, %v2154_v40  ;;  %v2159_v1 = vadd.f32 %v2158_v57, %v6337_v53 }
 0x565   : > { %v4215_v13 = vadd.f32 %v6453_v35, %v3973_v12  ;;  %v2809_v5 = vadd.f32 %v2808_v48, %v6341_v27  ;;  %v3142_v9 = vpop.f32.mrf.mxu1  ;;  %v4016_v45 = vadd.f32 %v3675_v44, %v3674_v56 }
 0x566   : > { %v3416_v25 = vmax.f32 %v2483_v0, 0.0 }
 0x567   : > { %v4569_v7 = vperm.slane %v4215_v13, %v6537_v50  ;;  %v3138_v36 = vadd.f32 %v3137_v60, %v2809_v5  ;;  %4017 = vadd.xlane.f32.xlu2 %v4016_v45 }
 0x568   : > { %v3678_v26 = vmul.f32 %v6351_v63, %v3416_v25  ;;  %v7787_v25 = vld [vmem:[#allocation57_spill] sm:$0xff] }
 0x569   : > { %v4570_v6 = vsel %vm4429_vm7, %v4569_v7, %v4568_v52  ;;  %v3415_v10 = vmax.f32 %v3138_v36, 0.0  ;;  %v7786_v52 = vld [vmem:[#allocation54_spill] sm:$0xff] }
 0x56a   : > { %v3976_v47 = vpop.xlane.xlu0 %3975 }
 0x56b   : > { %v2160_v28 = vpop.f32.mrf.mxu2  ;;  %v2484_v61 = vpop.f32.mrf.mxu3  ;;  %v4216_v24 = vadd.f32 %v6453_v35, %v3976_v47  ;;  %v3677_v54 = vmul.f32 %v6353_v20, %v3415_v10 }
 0x56c   : > { %v2811_v23 = vpop.f32.mrf.mxu0  ;;  %v2485_v62 = vadd.f32 %v2484_v61, %v2156_v33 }
 0x56d   : > { %v4571_v39 = vperm.slane %v4216_v24, %v6546_v34  ;;  %v2812_v60 = vadd.f32 %v2811_v23, %v6341_v27  ;;  %v3145_v4 = vpop.f32.mrf.mxu1  ;;  %v4019_v41 = vadd.f32 %v3677_v54, %v3676_v55 }
 0x56e   : > { %v3418_v5 = vmax.f32 %v2485_v62, 0.0 }
 0x56f   : > { %v4572_v17 = vsel %vm4433_vm8, %v4571_v39, %v4570_v6  ;;  %v3141_v59 = vadd.f32 %v3140_v42, %v2812_v60  ;;  %2850 = vmatmul.bf16.gmra.mxu0 %v7782_v18  ;;  %3184 = vmatmul.bf16.gmra.mxu1 %v7785_v58 }
 0x570   : > { %2202 = vmatmul.bf16.gmra.mxu2 %v7786_v52  ;;  %2526 = vmatmul.bf16.gmra.mxu3 %v7785_v58  ;;  %v3680_v61 = vmul.f32 %v6351_v63, %v3418_v5 }
 0x571   : > { %v3417_v32 = vmax.f32 %v3141_v59, 0.0  ;;  %4020 = vadd.xlane.f32.xlu0 %v4019_v41  ;;  %v2161_v59 = vadd.f32 %v2160_v28, %v6337_v53 }
 0x573   : > { %v2163_v56 = vpop.f32.mrf.mxu2  ;;  %v2487_v19 = vpop.f32.mrf.mxu3  ;;  %v3679_v37 = vmul.f32 %v6353_v20, %v3417_v32 }
 0x574   : > { %v3979_v42 = vpop.xlane.xlu1 %3978  ;;  %v2813_v44 = vpop.f32.mrf.mxu0  ;;  %v2488_v6 = vadd.f32 %v2487_v19, %v2159_v1  ;;  %v2164_v5 = vadd.f32 %v2163_v56, %v6337_v53 }
 0x575   : > { %v4217_v18 = vadd.f32 %v6453_v35, %v3979_v42  ;;  %v2814_v12 = vadd.f32 %v2813_v44, %v6341_v27  ;;  %v3147_v48 = vpop.f32.mrf.mxu1  ;;  %v4022_v13 = vadd.f32 %v3679_v37, %v3678_v26 }
 0x576   : > { %v3420_v39 = vmax.f32 %v2488_v6, 0.0 }
 0x577   : > { %v4573_v8 = vperm.slane %v4217_v18, %v6561_v14  ;;  %v3143_v45 = vadd.f32 %v3142_v9, %v2814_v12  ;;  %4023 = vadd.xlane.f32.xlu1 %v4022_v13 }
 0x578   : > { %v3682_v33 = vmul.f32 %v6351_v63, %v3420_v39  ;;  %v7789_v39 = vld [vmem:[#allocation59_spill] sm:$0xff] }
 0x579   : > { %v4574_v7 = vsel %vm4437_vm9, %v4573_v8, %v4572_v17  ;;  %v3419_v36 = vmax.f32 %v3143_v45, 0.0  ;;  %v7788_v17 = vld [vmem:[#allocation56_spill] sm:$0xff] }
 0x57a   : > { %v3982_v40 = vpop.xlane.xlu2 %3981 }
 0x57b   : > { %v2165_v10 = vpop.f32.mrf.mxu2  ;;  %v2489_v47 = vpop.f32.mrf.mxu3  ;;  %v4218_v0 = vadd.f32 %v6453_v35, %v3982_v40  ;;  %v3681_v24 = vmul.f32 %v6353_v20, %v3419_v36 }
 0x57c   : > { %v2816_v55 = vpop.f32.mrf.mxu0  ;;  %v2490_v32 = vadd.f32 %v2489_v47, %v2161_v59 }
 0x57d   : > { %v4575_v54 = vperm.slane %v4218_v0, %v6570_v49  ;;  %v2817_v9 = vadd.f32 %v2816_v55, %v6341_v27  ;;  %v3150_v23 = vpop.f32.mrf.mxu1  ;;  %v4025_v57 = vadd.f32 %v3681_v24, %v3680_v61 }
 0x57e   : > { %v3422_v12 = vmax.f32 %v2490_v32, 0.0 }
 0x57f   : > { %v4576_v60 = vsel %vm4441_vm10, %v4575_v54, %v4574_v7  ;;  %v3146_v41 = vadd.f32 %v3145_v4, %v2817_v9  ;;  %2855 = vmatmul.bf16.gmra.mxu0 %v7784_v15  ;;  %3189 = vmatmul.bf16.gmra.mxu1 %v7787_v25 }
 0x580   : > { %2207 = vmatmul.bf16.gmra.mxu2 %v7788_v17  ;;  %2531 = vmatmul.bf16.gmra.mxu3 %v7787_v25  ;;  %v3684_v47 = vmul.f32 %v6351_v63, %v3422_v12 }
 0x581   : > { %v3421_v58 = vmax.f32 %v3146_v41, 0.0  ;;  %4026 = vadd.xlane.f32.xlu2 %v4025_v57  ;;  %v2166_v41 = vadd.f32 %v2165_v10, %v6337_v53 }
 0x583   : > { %v2168_v26 = vpop.f32.mrf.mxu2  ;;  %v2492_v62 = vpop.f32.mrf.mxu3  ;;  %v3683_v19 = vmul.f32 %v6353_v20, %v3421_v58 }
 0x584   : > { %v3985_v4 = vpop.xlane.xlu0 %3984  ;;  %v2818_v37 = vpop.f32.mrf.mxu0  ;;  %v2493_v7 = vadd.f32 %v2492_v62, %v2164_v5  ;;  %v2169_v12 = vadd.f32 %v2168_v26, %v6337_v53 }
 0x585   : > { %v4219_v15 = vadd.f32 %v6453_v35, %v3985_v4  ;;  %v2819_v42 = vadd.f32 %v2818_v37, %v6341_v27  ;;  %v3152_v44 = vpop.f32.mrf.mxu1  ;;  %v4028_v18 = vadd.f32 %v3683_v19, %v3682_v33 }
 0x586   : > { %v3424_v54 = vmax.f32 %v2493_v7, 0.0 }
 0x587   : > { %v4577_v28 = vperm.slane %v4219_v15, %v6585_v38  ;;  %v3148_v13 = vadd.f32 %v3147_v48, %v2819_v42  ;;  %4029 = vadd.xlane.f32.xlu0 %v4028_v18 }
 0x588   : > { %v3686_v59 = vmul.f32 %v6351_v63, %v3424_v54  ;;  %v7791_v54 = vld [vmem:[#allocation61_spill] sm:$0xff] }
 0x589   : > { %v4578_v8 = vsel %vm4445_vm11, %v4577_v28, %v4576_v60  ;;  %v3423_v45 = vmax.f32 %v3148_v13, 0.0  ;;  %v7790_v60 = vld [vmem:[#allocation58_spill] sm:$0xff] }
 0x58a   : > { %v3988_v1 = vpop.xlane.xlu1 %3987 }
 0x58b   : > { %v2170_v36 = vpop.f32.mrf.mxu2  ;;  %v2494_v40 = vpop.f32.mrf.mxu3  ;;  %v4220_v6 = vadd.f32 %v6453_v35, %v3988_v1  ;;  %v3685_v0 = vmul.f32 %v6353_v20, %v3423_v45 }
 0x58c   : > { %v2821_v61 = vpop.f32.mrf.mxu0  ;;  %v2495_v58 = vadd.f32 %v2494_v40, %v2166_v41 }
 0x58d   : > { %v4579_v24 = vperm.slane %v4220_v6, %v6594_v43  ;;  %v2822_v48 = vadd.f32 %v2821_v61, %v6341_v27  ;;  %v3155_v55 = vpop.f32.mrf.mxu1  ;;  %v4031_v56 = vadd.f32 %v3685_v0, %v3684_v47 }
 0x58e   : > { %v3426_v42 = vmax.f32 %v2495_v58, 0.0 }
 0x58f   : > { %v4580_v9 = vsel %vm4449_vm12, %v4579_v24, %v4578_v8  ;;  %v3151_v57 = vadd.f32 %v3150_v23, %v2822_v48  ;;  %2860 = vmatmul.bf16.gmra.mxu0 %v7786_v52  ;;  %3194 = vmatmul.bf16.gmra.mxu1 %v7789_v39 }
 0x590   : > { %2212 = vmatmul.bf16.gmra.mxu2 %v7790_v60  ;;  %2536 = vmatmul.bf16.gmra.mxu3 %v7789_v39  ;;  %v3688_v40 = vmul.f32 %v6351_v63, %v3426_v42 }
 0x591   : > { %v3425_v25 = vmax.f32 %v3151_v57, 0.0  ;;  %4032 = vadd.xlane.f32.xlu1 %v4031_v56  ;;  %v2171_v57 = vadd.f32 %v2170_v36, %v6337_v53 }
 0x593   : > { %v2173_v33 = vpop.f32.mrf.mxu2  ;;  %v2497_v32 = vpop.f32.mrf.mxu3  ;;  %v3687_v62 = vmul.f32 %v6353_v20, %v3425_v25 }
 0x594   : > { %v3991_v23 = vpop.xlane.xlu2 %3990  ;;  %v2823_v19 = vpop.f32.mrf.mxu0  ;;  %v2498_v8 = vadd.f32 %v2497_v32, %v2169_v12  ;;  %v2174_v42 = vadd.f32 %v2173_v33, %v6337_v53 }
 0x595   : > { %v4221_v52 = vadd.f32 %v6453_v35, %v3991_v23  ;;  %v2824_v4 = vadd.f32 %v2823_v19, %v6341_v27  ;;  %v3157_v37 = vpop.f32.mrf.mxu1  ;;  %v4034_v15 = vadd.f32 %v3687_v62, %v3686_v59 }
 0x596   : > { %v3428_v24 = vmax.f32 %v2498_v8, 0.0 }
 0x597   : > { %v4581_v10 = vperm.slane %v4221_v52, %v6609_v30  ;;  %v3153_v18 = vadd.f32 %v3152_v44, %v2824_v4  ;;  %4035 = vadd.xlane.f32.xlu2 %v4034_v15 }
 0x598   : > { %v3690_v41 = vmul.f32 %v6351_v63, %v3428_v24 }
 0x599   : > { %v4582_v28 = vsel %vm4453_vm13, %v4581_v10, %v4580_v9  ;;  %v3427_v13 = vmax.f32 %v3153_v18, 0.0  ;;  %v7792_v9 = vld [vmem:[#allocation60_spill] sm:$0xff] }
 0x59a   : > { %v3994_v5 = vpop.xlane.xlu0 %3993 }
 0x59b   : > { %v2175_v45 = vpop.f32.mrf.mxu2  ;;  %v2499_v1 = vpop.f32.mrf.mxu3  ;;  %v4222_v7 = vadd.f32 %v6453_v35, %v3994_v5  ;;  %v3689_v6 = vmul.f32 %v6353_v20, %v3427_v13 }
 0x59c   : > { %v2826_v47 = vpop.f32.mrf.mxu0  ;;  %v2500_v25 = vadd.f32 %v2499_v1, %v2171_v57 }
 0x59d   : > { %v4583_v0 = vperm.slane %v4222_v7, %v6618_v22  ;;  %v2827_v44 = vadd.f32 %v2826_v47, %v6341_v27  ;;  %v3160_v61 = vpop.f32.mrf.mxu1  ;;  %v4037_v26 = vadd.f32 %v3689_v6, %v3688_v40 }
 0x59e   : > { %v3430_v4 = vmax.f32 %v2500_v25, 0.0 }
 0x59f   : > { %v4584_v48 = vsel %vm4457_vm14, %v4583_v0, %v4582_v28  ;;  %v3156_v56 = vadd.f32 %v3155_v55, %v2827_v44  ;;  %2865 = vmatmul.bf16.gmra.mxu0 %v7788_v17  ;;  %3199 = vmatmul.bf16.gmra.mxu1 %v7791_v54  ;;  %v7793_v0 = vld [vmem:[#allocation63_spill] sm:$0xff]  ;;  %v7794_v44 = vld [vmem:[#allocation62_spill] sm:$0xff] }
 0x5a0   : > { %2217 = vmatmul.bf16.gmra.mxu2 %v7792_v9  ;;  %2541 = vmatmul.bf16.gmra.mxu3 %v7791_v54  ;;  %v3692_v8 = vmul.f32 %v6351_v63, %v3430_v4 }
 0x5a1   : > { %v3429_v39 = vmax.f32 %v3156_v56, 0.0  ;;  %4038 = vadd.xlane.f32.xlu0 %v4037_v26  ;;  %v2176_v26 = vadd.f32 %v2175_v45, %v6337_v53 }
 0x5a3   : > { %v2178_v59 = vpop.f32.mrf.mxu2  ;;  %v2502_v58 = vpop.f32.mrf.mxu3  ;;  %v3691_v32 = vmul.f32 %v6353_v20, %v3429_v39 }
 0x5a4   : > { %v3997_v55 = vpop.xlane.xlu1 %3996  ;;  %v2828_v62 = vpop.f32.mrf.mxu0  ;;  %v2503_v28 = vadd.f32 %v2502_v58, %v2174_v42 }
 0x5a5   : > { %v4223_v17 = vadd.f32 %v6453_v35, %v3997_v55  ;;  %v2829_v23 = vadd.f32 %v2828_v62, %v6341_v27  ;;  %v3162_v19 = vpop.f32.mrf.mxu1  ;;  %v4040_v52 = vadd.f32 %v3691_v32, %v3690_v41 }
 0x5a6   : > { %v3432_v47 = vmax.f32 %v2503_v28, 0.0 }
 0x5a7   : > { %v4585_v36 = vperm.slane %v4223_v17, %v6633_v29  ;;  %v3158_v15 = vadd.f32 %v3157_v37, %v2829_v23  ;;  %4041 = vadd.xlane.f32.xlu1 %v4040_v52  ;;  %v2179_v52 = vadd.f32 %v2178_v59, %v6337_v53 }
 0x5a9   : > { %v4586_v10 = vsel %vm4461_vm15, %v4585_v36, %v4584_v48  ;;  %v3431_v18 = vmax.f32 %v3158_v15, 0.0  ;;  %v3694_v48 = vmul.f32 %v6351_v63, %v3432_v47 }
 0x5aa   : > { %v7225_v12 = vsel %vm4686_vm0, %v4586_v10, %v7079_v31  ;;  %v4000_v31 = vpop.xlane.xlu2 %3999  ;;  %vm4688_vm0 = vcmask 1045509  }
 0x5ab   : > { %v2180_v13 = vpop.f32.mrf.mxu2  ;;  %v2504_v5 = vpop.f32.mrf.mxu3  ;;  %v3693_v1 = vmul.f32 %v6353_v20, %v3431_v18  ;;  %v4224_v54 = vadd.f32 %v6453_v35, %v4000_v31  ;;  %v7796_v31 = vld [vmem:[#allocation64_spill] sm:$0xff] }
 0x5ac   : > { %v2831_v7 = vpop.f32.mrf.mxu0  ;;  %v2505_v56 = vadd.f32 %v2504_v5, %v2176_v26  ;;  %v2181_v26 = vadd.f32 %v2180_v13, %v6337_v53 }
 0x5ad   : > { %v2832_v40 = vadd.f32 %v2831_v7, %v6341_v27  ;;  %v3165_v37 = vpop.f32.mrf.mxu1  ;;  %v4043_v6 = vadd.f32 %v3693_v1, %v3692_v8  ;;  %v4587_v62 = vperm.slane %v4224_v54, %v6455_v2 }
 0x5ae   : > { %v3434_v45 = vmax.f32 %v2505_v56, 0.0 }
 0x5af   : > { %v3161_v33 = vadd.f32 %v3160_v61, %v2832_v40  ;;  %2870 = vmatmul.bf16.gmra.mxu0 %v7790_v60  ;;  %3204 = vmatmul.bf16.gmra.mxu1 %v7793_v0 }
 0x5b0   : > { %2222 = vmatmul.bf16.gmra.mxu2 %v7794_v44  ;;  %2546 = vmatmul.bf16.gmra.mxu3 %v7793_v0  ;;  %v3696_v5 = vmul.f32 %v6351_v63, %v3434_v45  ;;  %v7795_v0 = vld [vmem:[#allocation65_spill] sm:$0xff] }
 0x5b1   : > { %v3433_v24 = vmax.f32 %v3161_v33, 0.0  ;;  %4044 = vadd.xlane.f32.xlu2 %v4043_v6 }
 0x5b3   : > { %v2183_v57 = vpop.f32.mrf.mxu2  ;;  %v2507_v61 = vpop.f32.mrf.mxu3  ;;  %v3695_v60 = vmul.f32 %v6353_v20, %v3433_v24 }
 0x5b4   : > { %v4003_v39 = vpop.xlane.xlu0 %4002  ;;  %v2833_v41 = vpop.f32.mrf.mxu0  ;;  %v2508_v42 = vadd.f32 %v2507_v61, %v2179_v52 }
 0x5b5   : > { %v4225_v25 = vadd.f32 %v6453_v35, %v4003_v39  ;;  %v2834_v58 = vadd.f32 %v2833_v41, %v6341_v27  ;;  %v3167_v32 = vpop.f32.mrf.mxu1  ;;  %v4046_v55 = vadd.f32 %v3695_v60, %v3694_v48 }
 0x5b6   : > { %v3436_v6 = vmax.f32 %v2508_v42, 0.0 }
 0x5b7   : > { %v4588_v17 = vperm.slane %v4225_v25, %v6461_v21  ;;  %v3163_v23 = vadd.f32 %v3162_v19, %v2834_v58  ;;  %4047 = vadd.xlane.f32.xlu0 %v4046_v55 }
 0x5b8   : > { %v3698_v48 = vmul.f32 %v6351_v63, %v3436_v6  ;;  %v7797_v6 = vld [vmem:[#allocation67_spill] sm:$0xff] }
 0x5b9   : > { %v4589_v4 = vsel %vm4405_vm1, %v4588_v17, %v4587_v62  ;;  %v3435_v36 = vmax.f32 %v3163_v23, 0.0  ;;  %v2184_v62 = vadd.f32 %v2183_v57, %v6337_v53 }
 0x5ba   : > { %v4006_v15 = vpop.xlane.xlu1 %4005 }
 0x5bb   : > { %v2185_v10 = vpop.f32.mrf.mxu2  ;;  %v2509_v18 = vpop.f32.mrf.mxu3  ;;  %v4226_v28 = vadd.f32 %v6453_v35, %v4006_v15  ;;  %v3697_v8 = vmul.f32 %v6353_v20, %v3435_v36 }
 0x5bc   : > { %v2836_v1 = vpop.f32.mrf.mxu0  ;;  %v2510_v56 = vadd.f32 %v2509_v18, %v2181_v26 }
 0x5bd   : > { %v4590_v7 = vperm.slane %v4226_v28, %v6473_v46  ;;  %v2837_v19 = vadd.f32 %v2836_v1, %v6341_v27  ;;  %v3170_v40 = vpop.f32.mrf.mxu1  ;;  %v4049_v59 = vadd.f32 %v3697_v8, %v3696_v5 }
 0x5be   : > { %v3438_v55 = vmax.f32 %v2510_v56, 0.0 }
 0x5bf   : > { %v4591_v47 = vsel %vm4409_vm2, %v4590_v7, %v4589_v4  ;;  %v3166_v33 = vadd.f32 %v3165_v37, %v2837_v19  ;;  %2875 = vmatmul.bf16.gmra.mxu0 %v7792_v9  ;;  %3209 = vmatmul.bf16.gmra.mxu1 %v7795_v0 }
 0x5c0   : > { %2227 = vmatmul.bf16.gmra.mxu2 %v7796_v31  ;;  %2551 = vmatmul.bf16.gmra.mxu3 %v7795_v0  ;;  %v3700_v18 = vmul.f32 %v6351_v63, %v3438_v55 }
 0x5c1   : > { %v3437_v24 = vmax.f32 %v3166_v33, 0.0  ;;  %4050 = vadd.xlane.f32.xlu1 %v4049_v59  ;;  %v2186_v33 = vadd.f32 %v2185_v10, %v6337_v53 }
 0x5c3   : > { %v2188_v54 = vpop.f32.mrf.mxu2  ;;  %v2512_v61 = vpop.f32.mrf.mxu3  ;;  %v3699_v60 = vmul.f32 %v6353_v20, %v3437_v24 }
 0x5c4   : > { %v4009_v37 = vpop.xlane.xlu2 %4008  ;;  %v2838_v39 = vpop.f32.mrf.mxu0  ;;  %v2513_v4 = vadd.f32 %v2512_v61, %v2184_v62  ;;  %v2189_v55 = vadd.f32 %v2188_v54, %v6337_v53 }
 0x5c5   : > { %v4227_v9 = vadd.f32 %v6453_v35, %v4009_v37  ;;  %v2839_v41 = vadd.f32 %v2838_v39, %v6341_v27  ;;  %v3172_v25 = vpop.f32.mrf.mxu1  ;;  %v4052_v58 = vadd.f32 %v3699_v60, %v3698_v48 }
 0x5c6   : > { %v3440_v7 = vmax.f32 %v2513_v4, 0.0 }
 0x5c7   : > { %v4592_v13 = vperm.slane %v4227_v9, %v6489_v51  ;;  %v3168_v45 = vadd.f32 %v3167_v32, %v2839_v41  ;;  %4053 = vadd.xlane.f32.xlu2 %v4052_v58 }
 0x5c8   : > { %v3702_v26 = vmul.f32 %v6351_v63, %v3440_v7  ;;  %v7799_v7 = vld [vmem:[#allocation69_spill] sm:$0xff] }
 0x5c9   : > { %v4593_v17 = vsel %vm4413_vm3, %v4592_v13, %v4591_v47  ;;  %v3439_v23 = vmax.f32 %v3168_v45, 0.0  ;;  %v7798_v47 = vld [vmem:[#allocation66_spill] sm:$0xff] }
 0x5ca   : > { %v4012_v52 = vpop.xlane.xlu0 %4011 }
 0x5cb   : > { %v2190_v36 = vpop.f32.mrf.mxu2  ;;  %v2514_v15 = vpop.f32.mrf.mxu3  ;;  %v4228_v42 = vadd.f32 %v6453_v35, %v4012_v52  ;;  %v3701_v28 = vmul.f32 %v6353_v20, %v3439_v23 }
 0x5cc   : > { %v2841_v5 = vpop.f32.mrf.mxu0  ;;  %v2515_v24 = vadd.f32 %v2514_v15, %v2186_v33 }
 0x5cd   : > { %v4594_v8 = vperm.slane %v4228_v42, %v6498_v3  ;;  %v2842_v32 = vadd.f32 %v2841_v5, %v6341_v27  ;;  %v3175_v1 = vpop.f32.mrf.mxu1  ;;  %v4055_v57 = vadd.f32 %v3701_v28, %v3700_v18 }
 0x5ce   : > { %v3442_v41 = vmax.f32 %v2515_v24, 0.0 }
 0x5cf   : > { %v4595_v19 = vsel %vm4417_vm4, %v4594_v8, %v4593_v17  ;;  %v3171_v59 = vadd.f32 %v3170_v40, %v2842_v32  ;;  %2880 = vmatmul.bf16.gmra.mxu0 %v7794_v44  ;;  %3214 = vmatmul.bf16.gmra.mxu1 %v7797_v6 }
 0x5d0   : > { %2232 = vmatmul.bf16.gmra.mxu2 %v7798_v47  ;;  %2556 = vmatmul.bf16.gmra.mxu3 %v7797_v6  ;;  %v3704_v15 = vmul.f32 %v6351_v63, %v3442_v41 }
 0x5d1   : > { %v3441_v0 = vmax.f32 %v3171_v59, 0.0  ;;  %4056 = vadd.xlane.f32.xlu0 %v4055_v57  ;;  %v2191_v59 = vadd.f32 %v2190_v36, %v6337_v53 }
 0x5d3   : > { %v2193_v48 = vpop.f32.mrf.mxu2  ;;  %v2517_v56 = vpop.f32.mrf.mxu3  ;;  %v3703_v61 = vmul.f32 %v6353_v20, %v3441_v0 }
 0x5d4   : > { %v4015_v40 = vpop.xlane.xlu1 %4014  ;;  %v2843_v60 = vpop.f32.mrf.mxu0  ;;  %v2518_v17 = vadd.f32 %v2517_v56, %v2189_v55  ;;  %v2194_v41 = vadd.f32 %v2193_v48, %v6337_v53 }
 0x5d5   : > { %v4229_v44 = vadd.f32 %v6453_v35, %v4015_v40  ;;  %v2844_v37 = vadd.f32 %v2843_v60, %v6341_v27  ;;  %v3177_v39 = vpop.f32.mrf.mxu1  ;;  %v4058_v9 = vadd.f32 %v3703_v61, %v3702_v26 }
 0x5d6   : > { %v3444_v8 = vmax.f32 %v2518_v17, 0.0 }
 0x5d7   : > { %v4596_v10 = vperm.slane %v4229_v44, %v6513_v16  ;;  %v3173_v58 = vadd.f32 %v3172_v25, %v2844_v37  ;;  %4059 = vadd.xlane.f32.xlu1 %v4058_v9 }
 0x5d8   : > { %v3706_v33 = vmul.f32 %v6351_v63, %v3444_v8  ;;  %v7801_v8 = vld [vmem:[#allocation72_spill] sm:$0xff] }
 0x5d9   : > { %v4597_v13 = vsel %vm4421_vm5, %v4596_v10, %v4595_v19  ;;  %v3443_v45 = vmax.f32 %v3173_v58, 0.0  ;;  %v7800_v19 = vld [vmem:[#allocation68_spill] sm:$0xff] }
 0x5da   : > { %v4018_v62 = vpop.xlane.xlu2 %4017 }
 0x5db   : > { %v2195_v23 = vpop.f32.mrf.mxu2  ;;  %v2519_v52 = vpop.f32.mrf.mxu3  ;;  %v4230_v4 = vadd.f32 %v6453_v35, %v4018_v62  ;;  %v3705_v42 = vmul.f32 %v6353_v20, %v3443_v45 }
 0x5dc   : > { %v2846_v18 = vpop.f32.mrf.mxu0  ;;  %v2520_v0 = vadd.f32 %v2519_v52, %v2191_v59 }
 0x5dd   : > { %v4598_v28 = vperm.slane %v4230_v4, %v6522_v11  ;;  %v2847_v25 = vadd.f32 %v2846_v18, %v6341_v27  ;;  %v3180_v5 = vpop.f32.mrf.mxu1  ;;  %v4061_v54 = vadd.f32 %v3705_v42, %v3704_v15 }
 0x5de   : > { %v3446_v37 = vmax.f32 %v2520_v0, 0.0 }
 0x5df   : > { %v4599_v32 = vsel %vm4425_vm6, %v4598_v28, %v4597_v13  ;;  %v3176_v57 = vadd.f32 %v3175_v1, %v2847_v25  ;;  %2885 = vmatmul.bf16.gmra.mxu0 %v7796_v31  ;;  %3219 = vmatmul.bf16.gmra.mxu1 %v7799_v7 }
 0x5e0   : > { %2237 = vmatmul.bf16.gmra.mxu2 %v7800_v19  ;;  %2561 = vmatmul.bf16.gmra.mxu3 %v7799_v7  ;;  %v3708_v52 = vmul.f32 %v6351_v63, %v3446_v37 }
 0x5e1   : > { %v3445_v6 = vmax.f32 %v3176_v57, 0.0  ;;  %4062 = vadd.xlane.f32.xlu2 %v4061_v54  ;;  %v2196_v57 = vadd.f32 %v2195_v23, %v6337_v53 }
 0x5e3   : > { %v2198_v26 = vpop.f32.mrf.mxu2  ;;  %v2522_v24 = vpop.f32.mrf.mxu3  ;;  %v3707_v56 = vmul.f32 %v6353_v20, %v3445_v6 }
 0x5e4   : > { %v4021_v1 = vpop.xlane.xlu0 %4020  ;;  %v2848_v61 = vpop.f32.mrf.mxu0  ;;  %v2523_v13 = vadd.f32 %v2522_v24, %v2194_v41  ;;  %v2199_v37 = vadd.f32 %v2198_v26, %v6337_v53 }
 0x5e5   : > { %v4231_v31 = vadd.f32 %v6453_v35, %v4021_v1  ;;  %v2849_v40 = vadd.f32 %v2848_v61, %v6341_v27  ;;  %v3182_v60 = vpop.f32.mrf.mxu1  ;;  %v4064_v44 = vadd.f32 %v3707_v56, %v3706_v33 }
 0x5e6   : > { %v3448_v28 = vmax.f32 %v2523_v13, 0.0 }
 0x5e7   : > { %v4600_v36 = vperm.slane %v4231_v31, %v6537_v50  ;;  %v3178_v9 = vadd.f32 %v3177_v39, %v2849_v40  ;;  %4065 = vadd.xlane.f32.xlu0 %v4064_v44 }
 0x5e8   : > { %v3710_v59 = vmul.f32 %v6351_v63, %v3448_v28  ;;  %v7803_v28 = vld [vmem:[#allocation76_spill] sm:$0xff] }
 0x5e9   : > { %v4601_v10 = vsel %vm4429_vm7, %v4600_v36, %v4599_v32  ;;  %v3447_v58 = vmax.f32 %v3178_v9, 0.0  ;;  %v7802_v32 = vld [vmem:[#allocation71_spill] sm:$0xff] }
 0x5ea   : > { %v4024_v55 = vpop.xlane.xlu1 %4023 }
 0x5eb   : > { %v2200_v45 = vpop.f32.mrf.mxu2  ;;  %v2524_v62 = vpop.f32.mrf.mxu3  ;;  %v4232_v17 = vadd.f32 %v6453_v35, %v4024_v55  ;;  %v3709_v4 = vmul.f32 %v6353_v20, %v3447_v58 }
 0x5ec   : > { %v2851_v15 = vpop.f32.mrf.mxu0  ;;  %v2525_v6 = vadd.f32 %v2524_v62, %v2196_v57 }
 0x5ed   : > { %v4602_v42 = vperm.slane %v4232_v17, %v6546_v34  ;;  %v2852_v39 = vadd.f32 %v2851_v15, %v6341_v27  ;;  %v3185_v18 = vpop.f32.mrf.mxu1  ;;  %v4067_v48 = vadd.f32 %v3709_v4, %v3708_v52 }
 0x5ee   : > { %v3450_v40 = vmax.f32 %v2525_v6, 0.0 }
 0x5ef   : > { %v4603_v25 = vsel %vm4433_vm8, %v4602_v42, %v4601_v10  ;;  %v3181_v54 = vadd.f32 %v3180_v5, %v2852_v39  ;;  %2890 = vmatmul.bf16.gmra.mxu0 %v7798_v47  ;;  %3224 = vmatmul.bf16.gmra.mxu1 %v7801_v8 }
 0x5f0   : > { %2242 = vmatmul.bf16.gmra.mxu2 %v7802_v32  ;;  %2566 = vmatmul.bf16.gmra.mxu3 %v7801_v8  ;;  %v3712_v10 = vmul.f32 %v6351_v63, %v3450_v40 }
 0x5f1   : > { %v3449_v7 = vmax.f32 %v3181_v54, 0.0  ;;  %4068 = vadd.xlane.f32.xlu1 %v4067_v48  ;;  %v2201_v54 = vadd.f32 %v2200_v45, %v6337_v53 }
 0x5f3   : > { %v2203_v33 = vpop.f32.mrf.mxu2  ;;  %v2527_v0 = vpop.f32.mrf.mxu3  ;;  %v3711_v24 = vmul.f32 %v6353_v20, %v3449_v7 }
 0x5f4   : > { %v4027_v5 = vpop.xlane.xlu2 %4026  ;;  %v2853_v56 = vpop.f32.mrf.mxu0  ;;  %v2528_v58 = vadd.f32 %v2527_v0, %v2199_v37  ;;  %v2204_v40 = vadd.f32 %v2203_v33, %v6337_v53 }
 0x5f5   : > { %v4233_v47 = vadd.f32 %v6453_v35, %v4027_v5  ;;  %v2854_v1 = vadd.f32 %v2853_v56, %v6341_v27  ;;  %v3187_v61 = vpop.f32.mrf.mxu1  ;;  %v4070_v31 = vadd.f32 %v3711_v24, %v3710_v59 }
 0x5f6   : > { %v3452_v42 = vmax.f32 %v2528_v58, 0.0 }
 0x5f7   : > { %v4604_v23 = vperm.slane %v4233_v47, %v6561_v14  ;;  %v3183_v44 = vadd.f32 %v3182_v60, %v2854_v1  ;;  %4071 = vadd.xlane.f32.xlu2 %v4070_v31 }
 0x5f8   : > { %v3714_v57 = vmul.f32 %v6351_v63, %v3452_v42  ;;  %v7805_v42 = vld [vmem:[#allocation79_spill] sm:$0xff] }
 0x5f9   : > { %v4605_v36 = vsel %vm4437_vm9, %v4604_v23, %v4603_v25  ;;  %v3451_v9 = vmax.f32 %v3183_v44, 0.0  ;;  %v7804_v25 = vld [vmem:[#allocation75_spill] sm:$0xff] }
 0x5fa   : > { %v4030_v41 = vpop.xlane.xlu0 %4029 }
 0x5fb   : > { %v2205_v55 = vpop.f32.mrf.mxu2  ;;  %v2529_v13 = vpop.f32.mrf.mxu3  ;;  %v4234_v62 = vadd.f32 %v6453_v35, %v4030_v41  ;;  %v3713_v17 = vmul.f32 %v6353_v20, %v3451_v9 }
 0x5fc   : > { %v2856_v52 = vpop.f32.mrf.mxu0  ;;  %v2530_v7 = vadd.f32 %v2529_v13, %v2201_v54 }
 0x5fd   : > { %v4606_v4 = vperm.slane %v4234_v62, %v6570_v49  ;;  %v2857_v60 = vadd.f32 %v2856_v52, %v6341_v27  ;;  %v3190_v15 = vpop.f32.mrf.mxu1  ;;  %v4073_v26 = vadd.f32 %v3713_v17, %v3712_v10 }
 0x5fe   : > { %v3454_v1 = vmax.f32 %v2530_v7, 0.0 }
 0x5ff   : > { %v4607_v39 = vsel %vm4441_vm10, %v4606_v4, %v4605_v36  ;;  %v3186_v48 = vadd.f32 %v3185_v18, %v2857_v60  ;;  %2895 = vmatmul.bf16.gmra.mxu0 %v7800_v19  ;;  %3229 = vmatmul.bf16.gmra.mxu1 %v7803_v28 }
 0x600   : > { %2247 = vmatmul.bf16.gmra.mxu2 %v7804_v25  ;;  %2571 = vmatmul.bf16.gmra.mxu3 %v7803_v28  ;;  %v3716_v36 = vmul.f32 %v6351_v63, %v3454_v1 }
 0x601   : > { %v3453_v8 = vmax.f32 %v3186_v48, 0.0  ;;  %4074 = vadd.xlane.f32.xlu0 %v4073_v26 }
 0x603   : > { %v2208_v59 = vpop.f32.mrf.mxu2  ;;  %v2532_v6 = vpop.f32.mrf.mxu3  ;;  %v3715_v0 = vmul.f32 %v6353_v20, %v3453_v8 }
 0x604   : > { %v4033_v18 = vpop.xlane.xlu1 %4032  ;;  %v2858_v24 = vpop.f32.mrf.mxu0  ;;  %v2533_v9 = vadd.f32 %v2532_v6, %v2204_v40 }
 0x605   : > { %v4235_v19 = vadd.f32 %v6453_v35, %v4033_v18  ;;  %v2859_v5 = vadd.f32 %v2858_v24, %v6341_v27  ;;  %v3192_v56 = vpop.f32.mrf.mxu1  ;;  %v4076_v47 = vadd.f32 %v3715_v0, %v3714_v57 }
 0x606   : > { %v3456_v4 = vmax.f32 %v2533_v9, 0.0 }
 0x607   : > { %v4608_v45 = vperm.slane %v4235_v19, %v6585_v38  ;;  %v3188_v31 = vadd.f32 %v3187_v61, %v2859_v5  ;;  %4077 = vadd.xlane.f32.xlu1 %v4076_v47  ;;  %v2209_v5 = vadd.f32 %v2208_v59, %v6337_v53 }
 0x608   : > { %v3718_v28 = vmul.f32 %v6351_v63, %v3456_v4 }
 0x609   : > { %v4609_v23 = vsel %vm4445_vm11, %v4608_v45, %v4607_v39  ;;  %v3455_v44 = vmax.f32 %v3188_v31, 0.0  ;;  %v2206_v39 = vadd.f32 %v2205_v55, %v6337_v53 }
 0x60a   : > { %v4036_v37 = vpop.xlane.xlu2 %4035 }
 0x60b   : > { %v2210_v41 = vpop.f32.mrf.mxu2  ;;  %v2534_v10 = vpop.f32.mrf.mxu3  ;;  %v4236_v58 = vadd.f32 %v6453_v35, %v4036_v37  ;;  %v3717_v13 = vmul.f32 %v6353_v20, %v3455_v44 }
 0x60c   : > { %v2861_v62 = vpop.f32.mrf.mxu0  ;;  %v2535_v54 = vadd.f32 %v2534_v10, %v2206_v39  ;;  %v2211_v45 = vadd.f32 %v2210_v41, %v6337_v53 }
 0x60d   : > { %v4610_v17 = vperm.slane %v4236_v58, %v6594_v43  ;;  %v2862_v61 = vadd.f32 %v2861_v62, %v6341_v27  ;;  %v3195_v52 = vpop.f32.mrf.mxu1  ;;  %v4079_v33 = vadd.f32 %v3717_v13, %v3716_v36 }
 0x60f   : > { %v4611_v60 = vsel %vm4449_vm12, %v4610_v17, %v4609_v23  ;;  %v3191_v26 = vadd.f32 %v3190_v15, %v2862_v61  ;;  %2900 = vmatmul.bf16.gmra.mxu0 %v7802_v32  ;;  %3234 = vmatmul.bf16.gmra.mxu1 %v7805_v42 }
 0x610   : > { %2576 = vmatmul.bf16.gmra.mxu3 %v7805_v42  ;;  %2905 = vmatmul.bf16.vlgmr.msra.gmra.mxu2 %v7804_v25  ;;  %v3458_v25 = vmax.f32 %v2535_v54, 0.0 }
 0x611   : > { %v3457_v48 = vmax.f32 %v3191_v26, 0.0  ;;  %4080 = vadd.xlane.f32.xlu2 %v4079_v33 }
 0x612   : > { %v3720_v40 = vmul.f32 %v6351_v63, %v3458_v25 }
 0x613   : > { %v2213_v8 = vpop.f32.mrf.mxu2  ;;  %v2537_v57 = vpop.f32.mrf.mxu3  ;;  %v3719_v7 = vmul.f32 %v6353_v20, %v3457_v48 }
 0x614   : > { %v4039_v15 = vpop.xlane.xlu0 %4038  ;;  %v2863_v6 = vpop.f32.mrf.mxu0  ;;  %v2538_v23 = vadd.f32 %v2537_v57, %v2209_v5 }
 0x615   : > { %v4237_v32 = vadd.f32 %v6453_v35, %v4039_v15  ;;  %v2864_v0 = vadd.f32 %v2863_v6, %v6341_v27  ;;  %v3197_v18 = vpop.f32.mrf.mxu1  ;;  %v4082_v24 = vadd.f32 %v3719_v7, %v3718_v28 }
 0x616   : > { %v3460_v17 = vmax.f32 %v2538_v23, 0.0 }
 0x617   : > { %v4612_v55 = vperm.slane %v4237_v32, %v6609_v30  ;;  %v3193_v19 = vadd.f32 %v3192_v56, %v2864_v0  ;;  %v2214_v32 = vadd.f32 %v2213_v8, %v6337_v53 }
 0x618   : > { %v3722_v4 = vmul.f32 %v6351_v63, %v3460_v17 }
 0x619   : > { %v4613_v47 = vsel %vm4453_vm13, %v4612_v55, %v4611_v60  ;;  %v3459_v1 = vmax.f32 %v3193_v19, 0.0  ;;  %4083 = vadd.xlane.f32.xlu2 %v4082_v24 }
 0x61a   : > { %v4042_v31 = vpop.xlane.xlu1 %4041 }
 0x61b   : > { %v2215_v44 = vpop.f32.mrf.mxu2  ;;  %v2539_v37 = vpop.f32.mrf.mxu3  ;;  %v4238_v36 = vadd.f32 %v6453_v35, %v4042_v31  ;;  %v3721_v9 = vmul.f32 %v6353_v20, %v3459_v1 }
 0x61c   : > { %v2540_v10 = vadd.f32 %v2539_v37, %v2211_v45  ;;  %v2866_v56 = vpop.f32.mrf.mxu0 }
 0x61d   : > { %v4614_v59 = vperm.slane %v4238_v36, %v6618_v22  ;;  %v2867_v58 = vadd.f32 %v2866_v56, %v6341_v27  ;;  %v3200_v13 = vpop.f32.mrf.mxu1  ;;  %v4085_v62 = vadd.f32 %v3721_v9, %v3720_v40  ;;  %v2216_v36 = vadd.f32 %v2215_v44, %v6337_v53 }
 0x61e   : > { %v3462_v15 = vmax.f32 %v2540_v10, 0.0 }
 0x61f   : > { %v4615_v41 = vsel %vm4457_vm14, %v4614_v59, %v4613_v47  ;;  %v3196_v61 = vadd.f32 %v3195_v52, %v2867_v58  ;;  %4086 = vadd.xlane.f32.xlu1 %v4085_v62 }
 0x620   : > { %v3724_v55 = vmul.f32 %v6351_v63, %v3462_v15 }
 0x621   : > { %v3461_v33 = vmax.f32 %v3196_v61, 0.0 }
 0x623   : > { %v2218_v60 = vpop.f32.mrf.mxu2  ;;  %v2542_v26 = vpop.f32.mrf.mxu3  ;;  %v3723_v42 = vmul.f32 %v6353_v20, %v3461_v33 }
 0x624   : > { %v4045_v39 = vpop.xlane.xlu2 %4044  ;;  %v2868_v48 = vpop.f32.mrf.mxu0  ;;  %v2543_v19 = vadd.f32 %v2542_v26, %v2214_v32 }
 0x625   : > { %v4239_v28 = vadd.f32 %v6453_v35, %v4045_v39  ;;  %v2869_v54 = vadd.f32 %v2868_v48, %v6341_v27  ;;  %v3202_v57 = vpop.f32.mrf.mxu1  ;;  %v4088_v7 = vadd.f32 %v3723_v42, %v3722_v4  ;;  %v2219_v48 = vadd.f32 %v2218_v60, %v6337_v53 }
 0x626   : > { %v3464_v8 = vmax.f32 %v2543_v19, 0.0 }
 0x627   : > { %v4616_v6 = vperm.slane %v4239_v28, %v6633_v29  ;;  %v3198_v52 = vadd.f32 %v3197_v18, %v2869_v54  ;;  %4089 = vadd.xlane.f32.xlu0 %v4088_v7 }
 0x628   : > { %v3726_v9 = vmul.f32 %v6351_v63, %v3464_v8 }
 0x629   : > { %v4617_v0 = vsel %vm4461_vm15, %v4616_v6, %v4615_v41  ;;  %v3463_v24 = vmax.f32 %v3198_v52, 0.0 }
 0x62a   : > { %v7367_v25 = vsel %vm4688_vm0, %v4617_v0, %v7225_v12  ;;  %v4048_v37 = vpop.xlane.xlu0 %4047 }
 0x62b   : > { %v2220_v5 = vpop.f32.mrf.mxu2  ;;  %v2544_v47 = vpop.f32.mrf.mxu3  ;;  %v3725_v1 = vmul.f32 %v6353_v20, %v3463_v24  ;;  %v4240_v56 = vadd.f32 %v6453_v35, %v4048_v37 }
 0x62c   : > { %v2871_v45 = vpop.f32.mrf.mxu0  ;;  %v2545_v10 = vadd.f32 %v2544_v47, %v2216_v36  ;;  %v2221_v60 = vadd.f32 %v2220_v5, %v6337_v53 }
 0x62d   : > { %v2872_v18 = vadd.f32 %v2871_v45, %v6341_v27  ;;  %v3205_v31 = vpop.f32.mrf.mxu1  ;;  %v7372_v40 = vadd.f32 %v3725_v1, %v3724_v55  ;;  %v4618_v44 = vperm.slane %v4240_v56, %v6455_v2 }
 0x62e   : > { %v3466_v26 = vmax.f32 %v2545_v10, 0.0 }
 0x62f   : > { %v3201_v23 = vadd.f32 %v3200_v13, %v2872_v18 }
 0x630   : > { %v3728_v7 = vmul.f32 %v6351_v63, %v3466_v26 }
 0x631   : > { %v3465_v12 = vmax.f32 %v3201_v23, 0.0 }
 0x633   : > { %v2223_v59 = vpop.f32.mrf.mxu2  ;;  %v2547_v58 = vpop.f32.mrf.mxu3  ;;  %v3727_v62 = vmul.f32 %v6353_v20, %v3465_v12 }
 0x634   : > { %v4051_v17 = vpop.xlane.xlu1 %4050  ;;  %v2873_v41 = vpop.f32.mrf.mxu0  ;;  %v2548_v15 = vadd.f32 %v2547_v58, %v2219_v48 }
 0x635   : > { %v4241_v61 = vadd.f32 %v6453_v35, %v4051_v17  ;;  %v2874_v33 = vadd.f32 %v2873_v41, %v6341_v27  ;;  %v3207_v13 = vpop.f32.mrf.mxu1  ;;  %v4094_v4 = vadd.f32 %v3727_v62, %v3726_v9 }
 0x637   : > { %v4619_v42 = vperm.slane %v4241_v61, %v6461_v21  ;;  %v3203_v39 = vadd.f32 %v3202_v57, %v2874_v33  ;;  %4095 = vadd.xlane.f32.xlu0 %v4094_v4  ;;  %v3468_v57 = vmax.f32 %v2548_v15, 0.0 }
 0x639   : > { %v7384_v28 = vsel %vm4405_vm1, %v4619_v42, %v4618_v44  ;;  %v3467_v54 = vmax.f32 %v3203_v39, 0.0  ;;  %v3730_v45 = vmul.f32 %v6351_v63, %v3468_v57 }
 0x63b   : > { %v2225_v6 = vpop.f32.mrf.mxu2  ;;  %v2549_v52 = vpop.f32.mrf.mxu3  ;;  %v3729_v32 = vmul.f32 %v6353_v20, %v3467_v54 }
 0x63c   : > { %v2876_v0 = vpop.f32.mrf.mxu0  ;;  %v2550_v18 = vadd.f32 %v2549_v52, %v2221_v60 }
 0x63d   : > { %v2877_v24 = vadd.f32 %v2876_v0, %v6341_v27  ;;  %v3210_v55 = vpop.f32.mrf.mxu1  ;;  %v4097_v19 = vadd.f32 %v3729_v32, %v3728_v7 }
 0x63e   : > { %v3470_v56 = vmax.f32 %v2550_v18, 0.0 }
 0x63f   : > { %v3206_v47 = vadd.f32 %v3205_v31, %v2877_v24  ;;  %4098 = vadd.xlane.f32.xlu1 %v4097_v19  ;;  %v2224_v31 = vadd.f32 %v2223_v59, %v6337_v53 }
 0x640   : > { %v3732_v5 = vmul.f32 %v6351_v63, %v3470_v56 }
 0x641   : > { %v3469_v1 = vmax.f32 %v3206_v47, 0.0 }
 0x643   : > { %v2228_v8 = vpop.f32.mrf.mxu2  ;;  %v2552_v23 = vpop.f32.mrf.mxu3  ;;  %v3731_v37 = vmul.f32 %v6353_v20, %v3469_v1 }
 0x644   : > { %v2878_v36 = vpop.f32.mrf.mxu0  ;;  %v2553_v17 = vadd.f32 %v2552_v23, %v2224_v31 }
 0x645   : > { %v2879_v12 = vadd.f32 %v2878_v36, %v6341_v27  ;;  %v3212_v9 = vpop.f32.mrf.mxu1  ;;  %v4100_v10 = vadd.f32 %v3731_v37, %v3730_v45 }
 0x646   : > { %v3472_v39 = vmax.f32 %v2553_v17, 0.0 }
 0x647   : > { %v3208_v58 = vadd.f32 %v3207_v13, %v2879_v12  ;;  %4101 = vadd.xlane.f32.xlu2 %v4100_v10  ;;  %v2226_v13 = vadd.f32 %v2225_v6, %v6337_v53 }
 0x648   : > { %v3734_v59 = vmul.f32 %v6351_v63, %v3472_v39 }
 0x649   : > { %v3471_v62 = vmax.f32 %v3208_v58, 0.0 }
 0x64b   : > { %v2230_v41 = vpop.f32.mrf.mxu2  ;;  %v2554_v61 = vpop.f32.mrf.mxu3  ;;  %v3733_v33 = vmul.f32 %v6353_v20, %v3471_v62 }
 0x64c   : > { %v2881_v4 = vpop.f32.mrf.mxu0  ;;  %v2555_v7 = vadd.f32 %v2554_v61, %v2226_v13 }
 0x64d   : > { %v2882_v26 = vadd.f32 %v2881_v4, %v6341_v27  ;;  %v3215_v44 = vpop.f32.mrf.mxu1  ;;  %v4103_v42 = vadd.f32 %v3733_v33, %v3732_v5 }
 0x64e   : > { %v3474_v47 = vmax.f32 %v2555_v7, 0.0 }
 0x64f   : > { %v3211_v48 = vadd.f32 %v3210_v55, %v2882_v26  ;;  %4104 = vadd.xlane.f32.xlu0 %v4103_v42  ;;  %v2229_v55 = vadd.f32 %v2228_v8, %v6337_v53 }
 0x650   : > { %v3736_v6 = vmul.f32 %v6351_v63, %v3474_v47 }
 0x651   : > { %v3473_v54 = vmax.f32 %v3211_v48, 0.0 }
 0x653   : > { %v2233_v15 = vpop.f32.mrf.mxu2  ;;  %v2557_v52 = vpop.f32.mrf.mxu3  ;;  %v3735_v32 = vmul.f32 %v6353_v20, %v3473_v54 }
 0x654   : > { %v2883_v0 = vpop.f32.mrf.mxu0  ;;  %v2558_v45 = vadd.f32 %v2557_v52, %v2229_v55 }
 0x655   : > { %v2884_v24 = vadd.f32 %v2883_v0, %v6341_v27  ;;  %v3217_v19 = vpop.f32.mrf.mxu1  ;;  %v4106_v57 = vadd.f32 %v3735_v32, %v3734_v59 }
 0x656   : > { %v3476_v58 = vmax.f32 %v2558_v45, 0.0 }
 0x657   : > { %v3213_v60 = vadd.f32 %v3212_v9, %v2884_v24  ;;  %4107 = vadd.xlane.f32.xlu1 %v4106_v57  ;;  %v2231_v9 = vadd.f32 %v2230_v41, %v6337_v53 }
 0x658   : > { %v3738_v8 = vmul.f32 %v6351_v63, %v3476_v58 }
 0x659   : > { %v3475_v1 = vmax.f32 %v3213_v60, 0.0 }
 0x65b   : > { %v2235_v18 = vpop.f32.mrf.mxu2  ;;  %v2559_v23 = vpop.f32.mrf.mxu3  ;;  %v3737_v37 = vmul.f32 %v6353_v20, %v3475_v1 }
 0x65c   : > { %v2886_v36 = vpop.f32.mrf.mxu0  ;;  %v2560_v5 = vadd.f32 %v2559_v23, %v2231_v9 }
 0x65d   : > { %v2887_v12 = vadd.f32 %v2886_v36, %v6341_v27  ;;  %v3220_v10 = vpop.f32.mrf.mxu1  ;;  %v4109_v56 = vadd.f32 %v3737_v37, %v3736_v6 }
 0x65e   : > { %v3478_v48 = vmax.f32 %v2560_v5, 0.0 }
 0x65f   : > { %v3216_v31 = vadd.f32 %v3215_v44, %v2887_v12  ;;  %4110 = vadd.xlane.f32.xlu2 %v4109_v56  ;;  %v2234_v44 = vadd.f32 %v2233_v15, %v6337_v53 }
 0x660   : > { %v3740_v41 = vmul.f32 %v6351_v63, %v3478_v48 }
 0x661   : > { %v3477_v62 = vmax.f32 %v3216_v31, 0.0 }
 0x663   : > { %v2238_v17 = vpop.f32.mrf.mxu2  ;;  %v2562_v61 = vpop.f32.mrf.mxu3  ;;  %v3739_v33 = vmul.f32 %v6353_v20, %v3477_v62 }
 0x664   : > { %v2888_v4 = vpop.f32.mrf.mxu0  ;;  %v2563_v59 = vadd.f32 %v2562_v61, %v2234_v44 }
 0x665   : > { %v2889_v26 = vadd.f32 %v2888_v4, %v6341_v27  ;;  %v3222_v42 = vpop.f32.mrf.mxu1  ;;  %v4112_v39 = vadd.f32 %v3739_v33, %v3738_v8 }
 0x666   : > { %v3480_v60 = vmax.f32 %v2563_v59, 0.0 }
 0x667   : > { %v3218_v13 = vadd.f32 %v3217_v19, %v2889_v26  ;;  %4113 = vadd.xlane.f32.xlu0 %v4112_v39  ;;  %v2236_v19 = vadd.f32 %v2235_v18, %v6337_v53 }
 0x668   : > { %v3742_v15 = vmul.f32 %v6351_v63, %v3480_v60 }
 0x669   : > { %v3479_v54 = vmax.f32 %v3218_v13, 0.0 }
 0x66b   : > { %v2240_v7 = vpop.f32.mrf.mxu2  ;;  %v2564_v52 = vpop.f32.mrf.mxu3  ;;  %v3741_v32 = vmul.f32 %v6353_v20, %v3479_v54 }
 0x66c   : > { %v2891_v0 = vpop.f32.mrf.mxu0  ;;  %v2565_v6 = vadd.f32 %v2564_v52, %v2236_v19 }
 0x66d   : > { %v2892_v24 = vadd.f32 %v2891_v0, %v6341_v27  ;;  %v3225_v57 = vpop.f32.mrf.mxu1  ;;  %v4115_v47 = vadd.f32 %v3741_v32, %v3740_v41 }
 0x66e   : > { %v3482_v31 = vmax.f32 %v2565_v6, 0.0 }
 0x66f   : > { %v3221_v55 = vadd.f32 %v3220_v10, %v2892_v24  ;;  %4116 = vadd.xlane.f32.xlu1 %v4115_v47  ;;  %v2239_v10 = vadd.f32 %v2238_v17, %v6337_v53 }
 0x670   : > { %v3744_v18 = vmul.f32 %v6351_v63, %v3482_v31 }
 0x671   : > { %v3481_v1 = vmax.f32 %v3221_v55, 0.0 }
 0x673   : > { %v2243_v45 = vpop.f32.mrf.mxu2  ;;  %v2567_v23 = vpop.f32.mrf.mxu3  ;;  %v3743_v37 = vmul.f32 %v6353_v20, %v3481_v1 }
 0x674   : > { %v2893_v36 = vpop.f32.mrf.mxu0  ;;  %v2568_v8 = vadd.f32 %v2567_v23, %v2239_v10 }
 0x675   : > { %v2894_v12 = vadd.f32 %v2893_v36, %v6341_v27  ;;  %v3227_v56 = vpop.f32.mrf.mxu1  ;;  %v4118_v58 = vadd.f32 %v3743_v37, %v3742_v15 }
 0x676   : > { %v3484_v13 = vmax.f32 %v2568_v8, 0.0 }
 0x677   : > { %v3223_v9 = vadd.f32 %v3222_v42, %v2894_v12  ;;  %4119 = vadd.xlane.f32.xlu2 %v4118_v58  ;;  %v2241_v42 = vadd.f32 %v2240_v7, %v6337_v53 }
 0x678   : > { %v3746_v17 = vmul.f32 %v6351_v63, %v3484_v13 }
 0x679   : > { %v3483_v62 = vmax.f32 %v3223_v9, 0.0 }
 0x67b   : > { %v2245_v5 = vpop.f32.mrf.mxu2  ;;  %v2569_v61 = vpop.f32.mrf.mxu3  ;;  %v3745_v33 = vmul.f32 %v6353_v20, %v3483_v62 }
 0x67c   : > { %v2896_v4 = vpop.f32.mrf.mxu0  ;;  %v2570_v41 = vadd.f32 %v2569_v61, %v2241_v42 }
 0x67d   : > { %v2897_v26 = vadd.f32 %v2896_v4, %v6341_v27  ;;  %v4121_v39 = vadd.f32 %v3745_v33, %v3744_v18  ;;  %v3230_v48 = vpop.f32.mrf.mxu1 }
 0x67e   : > { %v3486_v60 = vmax.f32 %v2570_v41, 0.0 }
 0x67f   : > { %v3226_v44 = vadd.f32 %v3225_v57, %v2897_v26  ;;  %4122 = vadd.xlane.f32.xlu0 %v4121_v39  ;;  %v2244_v57 = vadd.f32 %v2243_v45, %v6337_v53 }
 0x680   : > { %v3748_v7 = vmul.f32 %v6351_v63, %v3486_v60 }
 0x681   : > { %v3485_v54 = vmax.f32 %v3226_v44, 0.0 }
 0x683   : > { %v2248_v59 = vpop.f32.mrf.mxu2  ;;  %v2572_v52 = vpop.f32.mrf.mxu3  ;;  %v3747_v32 = vmul.f32 %v6353_v20, %v3485_v54 }
 0x684   : > { %v2898_v0 = vpop.f32.mrf.mxu0  ;;  %v2573_v15 = vadd.f32 %v2572_v52, %v2244_v57  ;;  %v2249_v45 = vadd.f32 %v2248_v59, %v6337_v53 }
 0x685   : > { %v2899_v24 = vadd.f32 %v2898_v0, %v6341_v27  ;;  %v4124_v47 = vadd.f32 %v3747_v32, %v3746_v17  ;;  %v3232_v19 = vpop.f32.mrf.mxu1 }
 0x686   : > { %v3488_v31 = vmax.f32 %v2573_v15, 0.0 }
 0x687   : > { %v3228_v55 = vadd.f32 %v3227_v56, %v2899_v24  ;;  %4125 = vadd.xlane.f32.xlu1 %v4124_v47  ;;  %v2246_v56 = vadd.f32 %v2245_v5, %v6337_v53 }
 0x688   : > { %v3750_v18 = vmul.f32 %v6351_v63, %v3488_v31  ;;  %v4057_v31 = vpop.xlane.xlu0 %4056 }
 0x689   : > { %v3487_v1 = vmax.f32 %v3228_v55, 0.0 }
 0x68b   : > { %v2250_v6 = vpop.f32.mrf.mxu2  ;;  %v2574_v23 = vpop.f32.mrf.mxu3  ;;  %v3749_v37 = vmul.f32 %v6353_v20, %v3487_v1 }
 0x68c   : > { %v2901_v36 = vpop.f32.mrf.mxu0  ;;  %v2575_v8 = vadd.f32 %v2574_v23, %v2246_v56  ;;  %v2251_v52 = vadd.f32 %v2250_v6, %v6337_v53 }
 0x68d   : > { %v2902_v12 = vadd.f32 %v2901_v36, %v6341_v27  ;;  %v4127_v58 = vadd.f32 %v3749_v37, %v3748_v7  ;;  %v3235_v62 = vpop.f32.mrf.mxu1 }
 0x68e   : > { %v3490_v54 = vmax.f32 %v2575_v8, 0.0 }
 0x68f   : > { %v3231_v9 = vadd.f32 %v3230_v48, %v2902_v12  ;;  %4128 = vadd.xlane.f32.xlu0 %v4127_v58  ;;  %v4054_v58 = vpop.xlane.xlu2 %4053 }
 0x690   : > { %v3752_v24 = vmul.f32 %v6351_v63, %v3490_v54  ;;  %v4066_v56 = vpop.xlane.xlu0 %4065 }
 0x691   : > { %v3489_v10 = vmax.f32 %v3231_v9, 0.0 }
 0x693   : > { %v2577_v61 = vpop.f32.mrf.mxu3  ;;  %v2906_v33 = vpop.f32.mrf.mxu2  ;;  %v3751_v4 = vmul.f32 %v6353_v20, %v3489_v10 }
 0x694   : > { %v2578_v26 = vadd.f32 %v2577_v61, %v2249_v45  ;;  %v2907_v39 = vadd.f32 %v2906_v33, %v6341_v27  ;;  %v2903_v13 = vpop.f32.mrf.mxu0 }
 0x695   : > { %v2904_v48 = vadd.f32 %v2903_v13, %v6341_v27  ;;  %v4130_v44 = vadd.f32 %v3751_v4, %v3750_v18 }
 0x696   : > { %v3492_v42 = vmax.f32 %v2578_v26, 0.0  ;;  %v3236_v5 = vadd.f32 %v3235_v62, %v2907_v39 }
 0x697   : > { %v3233_v17 = vadd.f32 %v3232_v19, %v2904_v48  ;;  %4131 = vadd.xlane.f32.xlu2 %v4130_v44  ;;  %v3237_v19 = vpop.f32.mrf.mxu1  ;;  %v4063_v9 = vpop.xlane.xlu2 %4062  ;;  %v4242_v48 = vadd.f32 %v6453_v35, %v4054_v58 }
 0x698   : > { %v3493_v41 = vmax.f32 %v3236_v5, 0.0  ;;  %v3754_v32 = vmul.f32 %v6351_v63, %v3492_v42  ;;  %v4075_v62 = vpop.xlane.xlu0 %4074  ;;  %v4243_v42 = vadd.f32 %v6453_v35, %v4057_v31  ;;  %v4245_v54 = vadd.f32 %v6453_v35, %v4063_v9 }
 0x699   : > { %v3491_v59 = vmax.f32 %v3233_v17, 0.0  ;;  %v4621_v17 = vperm.slane %v4242_v48, %v6473_v46 }
 0x69a   : > { %v3755_v0 = vmul.f32 %v6353_v20, %v3493_v41  ;;  %v4246_v41 = vadd.f32 %v6453_v35, %v4066_v56 }
 0x69b   : > { %v2579_v47 = vpop.f32.mrf.mxu3  ;;  %v2908_v60 = vpop.f32.mrf.mxu2  ;;  %v3753_v55 = vmul.f32 %v6353_v20, %v3491_v59  ;;  %v4623_v59 = vperm.slane %v4243_v42, %v6489_v51 }
 0x69c   : > { %v2580_v57 = vadd.f32 %v2579_v47, %v2251_v52  ;;  %v2909_v1 = vadd.f32 %v2908_v60, %v6341_v27  ;;  %v4136_v7 = vadd.f32 %v3755_v0, %v3754_v32  ;;  %v4060_v27 = vpop.xlane.xlu1 %4059  ;;  %v4627_v60 = vperm.slane %v4245_v54, %v6513_v16 }
 0x69d   : > { %v4133_v15 = vadd.f32 %v3753_v55, %v3752_v24  ;;  %v4244_v5 = vadd.f32 %v6453_v35, %v4060_v27  ;;  %v4249_v55 = vadd.f32 %v6453_v35, %v4075_v62 }
 0x69e   : > { %v3238_v23 = vadd.f32 %v3237_v19, %v2909_v1  ;;  %4137 = vadd.xlane.f32.xlu0 %v4136_v7  ;;  %v3494_v37 = vmax.f32 %v2580_v57, 0.0  ;;  %v4622_v57 = vsel %vm4409_vm2, %v4621_v17, %v7384_v28  ;;  %v4629_v1 = vperm.slane %v4246_v41, %v6522_v11 }
 0x69f   : > { %4092 = vadd.xlane.f32.xlu2 %v7372_v40  ;;  %4134 = vadd.xlane.f32.xlu1 %v4133_v15  ;;  %v4072_v10 = vpop.xlane.xlu2 %4071  ;;  %v4625_v24 = vperm.slane %v4244_v5, %v6498_v3  ;;  %v4624_v19 = vsel %vm4413_vm3, %v4623_v59, %v4622_v57  ;;  %v4635_v28 = vperm.slane %v4249_v55, %v6561_v14 }
 0x6a0   : > { %v3495_v53 = vmax.f32 %v3238_v23, 0.0  ;;  %v3756_v36 = vmul.f32 %v6351_v63, %v3494_v37  ;;  %v4090_v61 = vpop.xlane.xlu0 %4089  ;;  %v4248_v47 = vadd.f32 %v6453_v35, %v4072_v10 }
 0x6a1   : > { %v4626_v37 = vsel %vm4417_vm4, %v4625_v24, %v4624_v19 }
 0x6a2   : > { %v3757_v6 = vmul.f32 %v6353_v20, %v3495_v53  ;;  %v4633_v53 = vperm.slane %v4248_v47, %v6546_v34 }
 0x6a4   : > { %v4139_v12 = vadd.f32 %v3757_v6, %v3756_v36  ;;  %v4069_v45 = vpop.xlane.xlu1 %4068 }
 0x6a5   : > { %v4247_v52 = vadd.f32 %v6453_v35, %v4069_v45 }
 0x6a7   : > { %4140 = vadd.xlane.f32.xlu1 %v4139_v12  ;;  %v4081_v18 = vpop.xlane.xlu2 %4080  ;;  %v4631_v15 = vperm.slane %v4247_v52, %v6537_v50  ;;  %v4628_v12 = vsel %vm4421_vm5, %v4627_v60, %v4626_v37 }
 0x6a8   : > { %v4251_v6 = vadd.f32 %v6453_v35, %v4081_v18  ;;  %v4630_v31 = vsel %vm4425_vm6, %v4629_v1, %v4628_v12 }
 0x6a9   : > { %v4632_v10 = vsel %vm4429_vm7, %v4631_v15, %v4630_v31 }
 0x6aa   : > { %v4096_v4 = vpop.xlane.xlu0 %4095 }
 0x6ab   : > { %v4256_v27 = vadd.f32 %v6453_v35, %v4096_v4 }
 0x6ac   : > { %v4078_v8 = vpop.xlane.xlu1 %4077 }
 0x6ad   : > { %v4250_v23 = vadd.f32 %v6453_v35, %v4078_v8  ;;  %v4649_v54 = vperm.slane %v4256_v27, %v6455_v2 }
 0x6af   : > { %v4084_v40 = vpop.xlane.xlu2 %4083  ;;  %v4637_v45 = vperm.slane %v4250_v23, %v6570_v49 }
 0x6b0   : > { %v4252_v9 = vadd.f32 %v6453_v35, %v4084_v40 }
 0x6b4   : > { %v4087_v33 = vpop.xlane.xlu1 %4086 }
 0x6ba   : > { %v4102_v20 = vpop.xlane.xlu2 %4101 }
 0x6bb   : > { %v4258_v58 = vadd.f32 %v6453_v35, %v4102_v20  ;;  %v4639_v20 = vperm.slane %v4251_v6, %v6585_v38 }
 0x6bc   : > { %v4099_v26 = vpop.xlane.xlu1 %4098 }
 0x6bd   : > { %v4257_v36 = vadd.f32 %v6453_v35, %v4099_v26  ;;  %v4634_v26 = vsel %vm4433_vm8, %v4633_v53, %v4632_v10  ;;  %v4652_v42 = vperm.slane %v4258_v58, %v6473_v46 }
 0x6be   : > { %v4636_v4 = vsel %vm4437_vm9, %v4635_v28, %v4634_v26 }
 0x6bf   : > { %v4650_v48 = vperm.slane %v4257_v36, %v6461_v21  ;;  %v4638_v21 = vsel %vm4441_vm10, %v4637_v45, %v4636_v4 }
 0x6c0   : > { %v4640_v46 = vsel %vm4445_vm11, %v4639_v20, %v4638_v21 }
 0x6c2   : > { %v4105_v39 = vpop.xlane.xlu0 %4104 }
 0x6c3   : > { %v4259_v56 = vadd.f32 %v6453_v35, %v4105_v39  ;;  %v4253_v39 = vadd.f32 %v6453_v35, %v4087_v33 }
 0x6c5   : > { %v4654_v17 = vperm.slane %v4259_v56, %v6489_v51  ;;  %v4643_v51 = vperm.slane %v4253_v39, %v6609_v30 }
 0x6ca   : > { %v4108_v63 = vpop.xlane.xlu1 %4107 }
 0x6cb   : > { %v4260_v62 = vadd.f32 %v6453_v35, %v4108_v63  ;;  %v4641_v63 = vperm.slane %v4252_v9, %v6594_v43 }
 0x6cd   : > { %v4656_v52 = vperm.slane %v4260_v62, %v6498_v3  ;;  %v4642_v3 = vsel %vm4449_vm12, %v4641_v63, %v4640_v46 }
 0x6ce   : > { %v4644_v53 = vsel %vm4453_vm13, %v4643_v51, %v4642_v3 }
 0x6d2   : > { %v4111_v13 = vpop.xlane.xlu2 %4110 }
 0x6d3   : > { %v4261_v40 = vadd.f32 %v6453_v35, %v4111_v13  ;;  %v4254_v13 = vadd.f32 %v6453_v35, %v4090_v61 }
 0x6d5   : > { %v4658_v24 = vperm.slane %v4261_v40, %v6513_v16  ;;  %v4645_v16 = vperm.slane %v4254_v13, %v6618_v22 }
 0x6da   : > { %v4114_v44 = vpop.xlane.xlu0 %4113 }
 0x6db   : > { %v4262_v5 = vadd.f32 %v6453_v35, %v4114_v44  ;;  %v4651_v44 = vsel %vm4405_vm1, %v4650_v48, %v4649_v54  ;;  %vm4690_vm1 = vcmask 1046534  }
 0x6dd   : > { %v4660_v47 = vperm.slane %v4262_v5, %v6522_v11 }
 0x6e2   : > { %v4117_v32 = vpop.xlane.xlu1 %4116 }
 0x6e3   : > { %v4263_v41 = vadd.f32 %v6453_v35, %v4117_v32  ;;  %v4653_v32 = vsel %vm4409_vm2, %v4652_v42, %v4651_v44  ;;  %vm4692_vm2 = vcmask 1047559  }
 0x6e5   : > { %v4662_v60 = vperm.slane %v4263_v41, %v6537_v50 }
 0x6ea   : > { %v4120_v0 = vpop.xlane.xlu2 %4119 }
 0x6eb   : > { %v4264_v33 = vadd.f32 %v6453_v35, %v4120_v0  ;;  %v4655_v0 = vsel %vm4413_vm3, %v4654_v17, %v4653_v32 }
 0x6ec   : > { %v4657_v57 = vsel %vm4417_vm4, %v4656_v52, %v4655_v0 }
 0x6ed   : > { %v4664_v1 = vperm.slane %v4264_v33, %v6546_v34  ;;  %v4659_v15 = vsel %vm4421_vm5, %v4658_v24, %v4657_v57 }
 0x6ee   : > { %v4661_v6 = vsel %vm4425_vm6, %v4660_v47, %v4659_v15 }
 0x6ef   : > { %v4663_v36 = vsel %vm4429_vm7, %v4662_v60, %v4661_v6 }
 0x6f0   : > { %v4665_v31 = vsel %vm4433_vm8, %v4664_v1, %v4663_v36 }
 0x6f2   : > { %v4123_v7 = vpop.xlane.xlu0 %4122 }
 0x6f3   : > { %v4265_v2 = vadd.f32 %v6453_v35, %v4123_v7 }
 0x6f5   : > { %v4666_v23 = vperm.slane %v4265_v2, %v6561_v14  ;;  %v4646_v14 = vsel %vm4457_vm14, %v4645_v16, %v4644_v53 }
 0x6f7   : > { %v4667_v27 = vsel %vm4437_vm9, %v4666_v23, %v4665_v31 }
 0x6fa   : > { %v4126_v18 = vpop.xlane.xlu1 %4125 }
 0x6fb   : > { %v4266_v61 = vadd.f32 %v6453_v35, %v4126_v18 }
 0x6fd   : > { %v4668_v34 = vperm.slane %v4266_v61, %v6570_v49 }
 0x702   : > { %v4129_v59 = vpop.xlane.xlu0 %4128 }
 0x703   : > { %v4267_v55 = vadd.f32 %v6453_v35, %v4129_v59 }
 0x705   : > { %v4670_v12 = vperm.slane %v4267_v55, %v6585_v38  ;;  %v4669_v38 = vsel %vm4441_vm10, %v4668_v34, %v4667_v27 }
 0x707   : > { %v4671_v62 = vsel %vm4445_vm11, %v4670_v12, %v4669_v38 }
 0x70a   : > { %v4132_v8 = vpop.xlane.xlu2 %4131 }
 0x70b   : > { %v4268_v7 = vadd.f32 %v6453_v35, %v4132_v8 }
 0x70d   : > { %v4672_v9 = vperm.slane %v4268_v7, %v6594_v43 }
 0x70f   : > { %v4673_v43 = vsel %vm4449_vm12, %v4672_v9, %v4671_v62 }
 0x711   : > { %v4138_v28 = vpop.xlane.xlu0 %4137 }
 0x712   : > { %v4093_v11 = vpop.xlane.xlu2 %4092  ;;  %v4135_v19 = vpop.xlane.xlu1 %4134  ;;  %v4270_v10 = vadd.f32 %v6453_v35, %v4138_v28 }
 0x713   : > { %v4255_v50 = vadd.f32 %v6453_v35, %v4093_v11  ;;  %v4269_v37 = vadd.f32 %v6453_v35, %v4135_v19 }
 0x714   : > { %v4676_v26 = vperm.slane %v4270_v10, %v6618_v22 }
 0x715   : > { %v4647_v58 = vperm.slane %v4255_v50, %v6633_v29  ;;  %v4674_v56 = vperm.slane %v4269_v37, %v6609_v30 }
 0x717   : > { %v4648_v49 = vsel %vm4461_vm15, %v4647_v58, %v4646_v14  ;;  %v4675_v8 = vsel %vm4453_vm13, %v4674_v56, %v4673_v43 }
 0x718   : > { %v4691_v45 = vsel %vm4690_vm1, %v4648_v49, %v7367_v25  ;;  %v4677_v20 = vsel %vm4457_vm14, %v4676_v26, %v4675_v8 }
 0x71a   : > { %v4141_v18 = vpop.xlane.xlu1 %4140 }
 0x71b   : > { %v4271_v30 = vadd.f32 %v6453_v35, %v4141_v18 }
 0x71d   : > { %v4678_v25 = vperm.slane %v4271_v30, %v6633_v29 }
 0x71f   : > { %v4679_v48 = vsel %vm4461_vm15, %v4678_v25, %v4677_v20 }
 0x720   : > { %v4693_v40 = vsel %vm4692_vm2, %v4679_v48, %v4691_v45 }
 0x721   : > { %4695 = vst [vmem:[%s273_s6] sm:$0xff] %v4693_v40 }
 0x722   : > { %5156 = shalt.err (!%p5153_p3)
}
 0x723   : > { %5090 = dma.vmem_to_hbm [thread:$0]  (%p5274_p5), %s4710_s30, 128, %s4712_s9, %s4697_s22  }
 0x724 PF: > { %p5096_p4 = scmp.ge.s32.totalorder %s5191_s29, 2  ;;  %s4723_s19 = sand.u32 1, %s5179_s26  }
 0x725   : > { %s4724_s21 = scalar_lea.sflag [#allocation4], %s4723_s19 }
 0x726   : > { %p5093_p7 = pnand %p5096_p4, %p5278_p6 }
 0x728   : > { %p5094_p8 = pneg %p5093_p7 }
 0x72a   : > { %5174 = dma.done.wait (%p5094_p8), %s4724_s21, 128  }
 0x72b   : > { %5176 = vsyncadd (%p5094_p8), %s4724_s21, 4294967168  ;;  %p18_p9 = scmp.ge.s32.totalorder %s5261_s8, 5   ;;  %s7806_s26 = smov %s5183_s27 }
 0x72c   : > { %s7807_s27 = smov %s5187_s28  ;;  %s7808_s28 = smov %s5272_s11 }
 0x72d   : > { %s7809_s29 = smov %s5261_s8  ;;  %20 = sbr.rel (!%p18_p9) target bundleno = 5 (0x5), region = 83 }
 0x732   :  { %4730 = vsyncpa [#allocation4], 1 }
 0x733   :  { %4732 = vsyncpa [#allocation4 + $0x1], 1 }

</bundles_post_ra>
